<compile_context>
chip_gen: v6e
topology: v6e:2x2x1
jax: 0.10.0
libtpu: 0.0.40
codegen_flags: <defaults>
</compile_context>

<pallas_src>
import functools

import jax
import jax.numpy as jnp
from jax.experimental import pallas as pl
from jax.experimental.pallas import tpu as pltpu


# --------------------------------- helpers ------------------------------------

def _round_up(x, m):
    return ((x + m - 1) // m) * m


def _weight_spec(shape, index_map, single_buffer):
    """BlockSpec for a resident weight; single-buffer when index is constant."""
    if single_buffer:
        return pl.BlockSpec(shape, index_map, pipeline_mode=pl.Buffered(1))
    return pl.BlockSpec(shape, index_map)


def _pick_time_chunk(T):
    """Recurrent time chunk: multiple of 8 (so unroll=8 divides), <= 32,
    chosen so that padding T up to a multiple costs <= 25% extra steps."""
    for cand in (32, 24, 16, 8):
        waste = (-T) % cand
        if waste * 4 <= T:
            return cand
    return 8


def _pick_n_tile(H4, max_tn=2048):
    """N tile for the projection GEMM: full 4H if small, else a 128-multiple
    divisor of 4H (4H is a multiple of 512 after H padding)."""
    if H4 <= max_tn:
        return H4
    for tn in range(max_tn, 0, -128):
        if H4 % tn == 0:
            return tn
    return 128


def _pick_proj_chunk(T_pad, Tt, Bp, Din, Tn, budget=8 << 20):
    """Projection time chunk: largest multiple of Tt dividing T_pad whose
    double-buffered in+out blocks fit the VMEM budget."""
    n_chunks = T_pad // Tt
    for d in range(n_chunks, 0, -1):
        if n_chunks % d:
            continue
        Tp = d * Tt
        blk_bytes = Tp * Bp * (Din + Tn) * 4 * 2
        if blk_bytes <= budget:
            return Tp
    return Tt


def _vmem_limit(bytes_needed):
    return int(min(max(int(bytes_needed * 1.5) + (2 << 20), 16 << 20), 64 << 20))


def _pad_gate_cols(w, H, Hp):
    """Pad the 4H gate axis (order [i, f, g, o]) to 4*Hp with zeros per gate."""
    if Hp == H:
        return w
    lead = w.shape[:-1]
    w = w.reshape(lead + (4, H))
    w = jnp.pad(w, [(0, 0)] * len(lead) + [(0, 0), (0, Hp - H)])
    return w.reshape(lead + (4 * Hp,))


# ----------------------- Kernel 1: input projection GEMM ----------------------

def _input_proj_kernel(x_ref, wih_ref, b_ref, gx_ref):
    """gx[t] = x[t] @ W_ih + (b_ih + b_hh) for a chunk of Tp timesteps.

    x_ref  : (Tp, Bp, Din)
    wih_ref: (Din, Tn)
    b_ref  : (1, Tn)          (f32)
    gx_ref : (Tp, Bp, Tn)
    """
    Tp, Bp, Din = x_ref.shape
    Tn = wih_ref.shape[-1]
    w = wih_ref[...]
    x2 = x_ref[...].reshape(Tp * Bp, Din).astype(w.dtype)
    g = jnp.dot(x2, w, preferred_element_type=jnp.float32) + b_ref[...]
    gx_ref[...] = g.reshape(Tp, Bp, Tn).astype(gx_ref.dtype)


def lstm_input_proj(x_tbd, w_ih, b, Tp, Tn, gx_dtype):
    """(T_pad, Bp, Din) -> (T_pad, Bp, 4Hp) gate pre-activations (bias folded)."""
    T_pad, Bp, Din = x_tbd.shape
    H4 = w_ih.shape[1]
    nt = T_pad // Tp
    nn = H4 // Tn
    single = (nn == 1)  # weight block index constant -> single-buffer it

    bytes_needed = (
        2 * Tp * Bp * Din * x_tbd.dtype.itemsize
        + (1 if single else 2) * Din * Tn * w_ih.dtype.itemsize
        + Tn * 4
        + 2 * Tp * Bp * Tn * jnp.dtype(gx_dtype).itemsize
        + Tp * Bp * Tn * 4)

    return pl.pallas_call(
        _input_proj_kernel,
        out_shape=jax.ShapeDtypeStruct((T_pad, Bp, H4), gx_dtype),
        grid=(nn, nt),
        in_specs=[
            pl.BlockSpec((Tp, Bp, Din), lambda n, t: (t, 0, 0)),
            _weight_spec((Din, Tn), lambda n, t: (0, n), single),
            _weight_spec((1, Tn), lambda n, t: (0, n), single),
        ],
        out_specs=pl.BlockSpec((Tp, Bp, Tn), lambda n, t: (t, 0, n)),
        compiler_params=pltpu.CompilerParams(
            dimension_semantics=("parallel", "parallel"),
            vmem_limit_bytes=_vmem_limit(bytes_needed)),
    )(x_tbd, w_ih, b)


# ------------------------ Kernel 2: recurrent (h @ W_hh) ----------------------

def _cell_update(gates, c, Hp):
    """Gate nonlinearities + state update.  Gate order [i, f, g, o] (f32)."""
    i_g = jax.nn.sigmoid(gates[:, 0 * Hp:1 * Hp])
    f_g = jax.nn.sigmoid(gates[:, 1 * Hp:2 * Hp])
    g_g = jnp.tanh(gates[:, 2 * Hp:3 * Hp])
    o_g = jax.nn.sigmoid(gates[:, 3 * Hp:4 * Hp])
    c_new = f_g * c + i_g * g_g
    h_new = o_g * jnp.tanh(c_new)
    return h_new, c_new


def _make_recurrent_seq_kernel(Hp, Tt, T_valid, unroll):
    need_mask = (T_valid % Tt) != 0

    def kernel(gx_ref, whh_ref, out_ref, h_scr, c_scr):
        t = pl.program_id(1)  # time axis (last grid axis, "arbitrary")

        @pl.when(t == 0)
        def _():
            h_scr[...] = jnp.zeros_like(h_scr)
            c_scr[...] = jnp.zeros_like(c_scr)

        whh = whh_ref[...]  # hoisted out of the step body

        def step(s, carry):
            h, c = carry
            gates = gx_ref[s].astype(jnp.float32) + jnp.dot(
                h.astype(whh.dtype), whh, preferred_element_type=jnp.float32)
            h_new, c_new = _cell_update(gates, c, Hp)
            if need_mask:
                valid = (t * Tt + s) < T_valid
                h_new = jnp.where(valid, h_new, h)
                c_new = jnp.where(valid, c_new, c)
            out_ref[s] = h_new.astype(out_ref.dtype)
            return h_new, c_new

        h, c = jax.lax.fori_loop(0, Tt, step, (h_scr[...], c_scr[...]),
                                 unroll=unroll)
        h_scr[...] = h
        c_scr[...] = c

    return kernel


def lstm_recurrent_seq(gx, w_hh, Tt, Bt, T_valid, unroll, out_dtype):
    """(T_pad, Bp, 4Hp) gate pre-activations -> (T_pad, Bp, Hp) hidden sequence."""
    T_pad, Bp, H4 = gx.shape
    Hp = H4 // 4
    nb = Bp // Bt
    nt = T_pad // Tt

    bytes_needed = (
        2 * Tt * Bt * H4 * gx.dtype.itemsize
        + Hp * H4 * w_hh.dtype.itemsize
        + 2 * Tt * Bt * Hp * jnp.dtype(out_dtype).itemsize
        + 2 * Bt * Hp * 4
        + unroll * Bt * H4 * 4)

    kernel = _make_recurrent_seq_kernel(Hp, Tt, T_valid, unroll)
    return pl.pallas_call(
        kernel,
        out_shape=jax.ShapeDtypeStruct((T_pad, Bp, Hp), out_dtype),
        grid=(nb, nt),
        in_specs=[
            pl.BlockSpec((Tt, Bt, H4), lambda b, t: (t, b, 0)),
            _weight_spec((Hp, H4), lambda b, t: (0, 0), True),
        ],
        out_specs=pl.BlockSpec((Tt, Bt, Hp), lambda b, t: (t, b, 0)),
        scratch_shapes=[
            pltpu.VMEM((Bt, Hp), jnp.float32),
            pltpu.VMEM((Bt, Hp), jnp.float32),
        ],
        compiler_params=pltpu.CompilerParams(
            dimension_semantics=("parallel", "arbitrary"),
            vmem_limit_bytes=_vmem_limit(bytes_needed)),
    )(gx, w_hh)


# ---------------- Kernel 3: final layer recurrence + fused Linear -------------

def _make_recurrent_final_kernel(Hp, Tt, T_valid, unroll):
    need_mask = (T_valid % Tt) != 0

    def kernel(gx_ref, whh_ref, wfc_ref, bfc_ref, logits_ref, h_scr, c_scr):
        t = pl.program_id(1)

        @pl.when(t == 0)
        def _():
            h_scr[...] = jnp.zeros_like(h_scr)
            c_scr[...] = jnp.zeros_like(c_scr)

        whh = whh_ref[...]

        def step(s, carry):
            h, c = carry
            gates = gx_ref[s].astype(jnp.float32) + jnp.dot(
                h.astype(whh.dtype), whh, preferred_element_type=jnp.float32)
            h_new, c_new = _cell_update(gates, c, Hp)
            if need_mask:
                valid = (t * Tt + s) < T_valid
                h_new = jnp.where(valid, h_new, h)
                c_new = jnp.where(valid, c_new, c)
            return h_new, c_new

        h, c = jax.lax.fori_loop(0, Tt, step, (h_scr[...], c_scr[...]),
                                 unroll=unroll)
        h_scr[...] = h
        c_scr[...] = c

        @pl.when(t == pl.num_programs(1) - 1)
        def _():
            wfc = wfc_ref[...]
            logits_ref[...] = (
                jnp.dot(h.astype(wfc.dtype), wfc,
                        preferred_element_type=jnp.float32)
                + bfc_ref[...])

    return kernel


def lstm_recurrent_final(gx, w_hh, w_fc, b_fc, Tt, Bt, T_valid, unroll):
    """(T_pad, Bp, 4Hp) gate pre-activations -> (Bp, Cp) logits (fused fc)."""
    T_pad, Bp, H4 = gx.shape
    Hp = H4 // 4
    Cp = w_fc.shape[1]
    nb = Bp // Bt
    nt = T_pad // Tt

    bytes_needed = (
        2 * Tt * Bt * H4 * gx.dtype.itemsize
        + Hp * H4 * w_hh.dtype.itemsize
        + Hp * Cp * w_fc.dtype.itemsize
        + Cp * 4
        + 2 * Bt * Cp * 4
        + 2 * Bt * Hp * 4
        + unroll * Bt * H4 * 4)

    kernel = _make_recurrent_final_kernel(Hp, Tt, T_valid, unroll)
    return pl.pallas_call(
        kernel,
        out_shape=jax.ShapeDtypeStruct((Bp, Cp), jnp.float32),
        grid=(nb, nt),
        in_specs=[
            pl.BlockSpec((Tt, Bt, H4), lambda b, t: (t, b, 0)),
            _weight_spec((Hp, H4), lambda b, t: (0, 0), True),
            _weight_spec((Hp, Cp), lambda b, t: (0, 0), True),
            _weight_spec((1, Cp), lambda b, t: (0, 0), True),
        ],
        out_specs=pl.BlockSpec((Bt, Cp), lambda b, t: (b, 0)),
        scratch_shapes=[
            pltpu.VMEM((Bt, Hp), jnp.float32),
            pltpu.VMEM((Bt, Hp), jnp.float32),
        ],
        compiler_params=pltpu.CompilerParams(
            dimension_semantics=("parallel", "arbitrary"),
            vmem_limit_bytes=_vmem_limit(bytes_needed)),
    )(gx, w_hh, w_fc, b_fc)


# --------------------------------- Full model ---------------------------------

@functools.partial(jax.jit, static_argnames=("num_layers",))
def lstm_model_forward(x_btd, params, num_layers):
    """Matches LSTM.forward: multi-layer LSTM over x, then fc(out[:, -1, :])."""
    B, T, D = x_btd.shape
    H = params["lstm"][0][1].shape[0]       # w_hh is (H, 4H)
    C = params["fc_w"].shape[1]

    # Lane/sublane-aligned padded dims (exact-zero padding keeps math identical:
    # padded hidden lanes stay exactly 0, padded batch rows / classes are sliced).
    Hp = _round_up(H, 128)
    Cp = _round_up(C, 128)
    Bp = max(8, _round_up(B, 8))

    # bf16 weights/activations at large H (f32 accumulation / carry / logits).
    wdt = jnp.bfloat16 if Hp >= 512 else jnp.float32
    adt = jnp.bfloat16 if Hp >= 512 else jnp.float32

    Tt = _pick_time_chunk(T)
    T_pad = _round_up(T, Tt)
    unroll = min(8, Tt)

    # Batch-tile axis: lets v7x's second TensorCore take half the batch.
    nb = 2 if (Bp >= 16 and Bp % 16 == 0) else 1
    Bt = Bp // nb

    # batch-first -> time-major; pad time (masked in-kernel) and batch.
    seq = jnp.transpose(x_btd, (1, 0, 2)).astype(jnp.float32)
    seq = jnp.pad(seq, ((0, T_pad - T), (0, Bp - B), (0, 0)))

    logits = None
    for layer in range(num_layers):
        w_ih, w_hh, b = params["lstm"][layer]
        in_dim = w_ih.shape[0]

        if layer > 0 and in_dim != Hp:              # rows come from padded h
            w_ih = jnp.pad(w_ih, ((0, Hp - in_dim), (0, 0)))
        w_ih_p = _pad_gate_cols(w_ih, H, Hp).astype(wdt)
        w_hh_p = _pad_gate_cols(jnp.pad(w_hh, ((0, Hp - H), (0, 0))),
                                H, Hp).astype(wdt)
        b_p = _pad_gate_cols(b, H, Hp).astype(jnp.float32)

        Din = seq.shape[-1]
        H4 = 4 * Hp
        Tn = _pick_n_tile(H4)
        Tp = _pick_proj_chunk(T_pad, Tt, Bp, Din, Tn)

        gx = lstm_input_proj(seq, w_ih_p, b_p, Tp, Tn, adt)

        if layer < num_layers - 1:
            seq = lstm_recurrent_seq(gx, w_hh_p, Tt, Bt, T, unroll, adt)
        else:
            w_fc = jnp.pad(params["fc_w"],
                           ((0, Hp - H), (0, Cp - C))).astype(wdt)
            b_fc = jnp.pad(params["fc_b"],
                           ((0, 0), (0, Cp - C))).astype(jnp.float32)
            logits = lstm_recurrent_final(gx, w_hh_p, w_fc, b_fc,
                                          Tt, Bt, T, unroll)

    return logits[:B, :C]


# ------------------------------ Parameter setup -------------------------------

def init_params(key, input_dim, hidden_dim, num_layers, num_classes):
    """Deterministic init mimicking PyTorch's U(-1/sqrt(H), 1/sqrt(H))."""
    params = {"lstm": []}
    bound = 1.0 / jnp.sqrt(hidden_dim).astype(jnp.float32)
    for layer in range(num_layers):
        in_dim = input_dim if layer == 0 else hidden_dim
        key, k1, k2, k3, k4 = jax.random.split(key, 5)
        # stored transposed vs torch: (in, 4H) / (H, 4H); gate order [i,f,g,o]
        w_ih = jax.random.uniform(k1, (in_dim, 4 * hidden_dim),
                                  jnp.float32, -bound, bound)
        w_hh = jax.random.uniform(k2, (hidden_dim, 4 * hidden_dim),
                                  jnp.float32, -bound, bound)
        b_ih = jax.random.uniform(k3, (4 * hidden_dim,),
                                  jnp.float32, -bound, bound)
        b_hh = jax.random.uniform(k4, (4 * hidden_dim,),
                                  jnp.float32, -bound, bound)
        params["lstm"].append((w_ih, w_hh, (b_ih + b_hh)[None, :]))
    key, k1, k2 = jax.random.split(key, 3)
    params["fc_w"] = jax.random.uniform(k1, (hidden_dim, num_classes),
                                        jnp.float32, -bound, bound)
    params["fc_b"] = jax.random.uniform(k2, (1, num_classes),
                                        jnp.float32, -bound, bound)
    return params


# ------------------------------ Pure-JAX reference ----------------------------

def reference_forward(x_btd, params, num_layers, hidden_dim):
    B = x_btd.shape[0]
    seq = jnp.transpose(x_btd, (1, 0, 2))  # (T, B, D)
    for layer in range(num_layers):
        w_ih, w_hh, b = params["lstm"][layer]

        def step(carry, x_t):
            h, c = carry
            gates = x_t @ w_ih + h @ w_hh + b
            i = jax.nn.sigmoid(gates[:, 0 * hidden_dim:1 * hidden_dim])
            f = jax.nn.sigmoid(gates[:, 1 * hidden_dim:2 * hidden_dim])
            g = jnp.tanh(gates[:, 2 * hidden_dim:3 * hidden_dim])
            o = jax.nn.sigmoid(gates[:, 3 * hidden_dim:4 * hidden_dim])
            c = f * c + i * g
            h = o * jnp.tanh(c)
            return (h, c), h

        init = (jnp.zeros((B, hidden_dim), jnp.float32),
                jnp.zeros((B, hidden_dim), jnp.float32))
        _, seq = jax.lax.scan(step, init, seq)
    return seq[-1] @ params["fc_w"] + params["fc_b"]


# ----------------------------------- Main --------------------------------------

if __name__ == "__main__":
    batch, seq_len = 2, 8
    input_dim, hidden_dim, num_layers, num_classes = 16, 32, 2, 4
    dropout = 0.0  # inference: dropout is a no-op

    key = jax.random.PRNGKey(0)
    key, pkey, xkey = jax.random.split(key, 3)
    params = init_params(pkey, input_dim, hidden_dim, num_layers, num_classes)
    x = jax.random.normal(xkey, (batch, seq_len, input_dim), jnp.float32)

    out = lstm_model_forward(x, params, num_layers)
    out = jax.block_until_ready(out)

    ref = reference_forward(x, params, num_layers, hidden_dim)
    assert out.shape == (batch, num_classes)
    assert jnp.allclose(out, ref, atol=1e-4, rtol=1e-4), "mismatch vs reference"

    print("KERNEL_OK")
</pallas_src>

<mosaic_0001>
module attributes {stable_mosaic.version = 11 : i64} {
  func.func @kernel(%arg0: i32, %arg1: i32, %arg2: memref<8x8x512xf32, #tpu.memory_space<vmem>>, %arg3: memref<128x512xf32, #tpu.memory_space<vmem>>, %arg4: memref<8x8x128xf32, #tpu.memory_space<vmem>>, %arg5: memref<8x128xf32, #tpu.memory_space<vmem>>, %arg6: memref<8x128xf32, #tpu.memory_space<vmem>>) attributes {dimension_semantics = [#tpu.dimension_semantics<parallel>, #tpu.dimension_semantics<arbitrary>], iteration_bounds = array<i64: 1, 1>, scalar_prefetch = 0 : i64, scratch_operands = 2 : i64, tpu.core_type = #tpu.core_type<tc>, window_params = [{transform_indices = @transform_0, window_bounds = array<i64: 8, 8, 512>}, {pipeline_mode = #tpu.pipeline_mode<synchronous>, transform_indices = @transform_1, window_bounds = array<i64: 128, 512>}, {transform_indices = @transform_2, window_bounds = array<i64: 8, 8, 128>}]} {
    %c0_i32 = arith.constant 0 : i32
    %0 = arith.cmpi eq, %arg1, %c0_i32 : i32
    %1 = arith.extui %0 : i1 to i32
    %c0_i32_0 = arith.constant 0 : i32
    %2 = arith.cmpi ne, %1, %c0_i32_0 : i32
    scf.if %2 {
      %cst_74 = arith.constant 0.000000e+00 : f32
      %280 = vector.broadcast %cst_74 : f32 to vector<8x128xf32>
      %c0_75 = arith.constant 0 : index
      %c0_76 = arith.constant 0 : index
      %281 = vector.load %arg5[%c0_75, %c0_76] : memref<8x128xf32, #tpu.memory_space<vmem>>, vector<8x128xf32>
      tpu.vector_store %arg5[%c0_75, %c0_76], %280 {strides = array<i32>} : memref<8x128xf32, #tpu.memory_space<vmem>>, vector<8x128xf32>,
      %cst_77 = arith.constant 0.000000e+00 : f32
      %282 = vector.broadcast %cst_77 : f32 to vector<8x128xf32>
      %c0_78 = arith.constant 0 : index
      %c0_79 = arith.constant 0 : index
      %283 = vector.load %arg6[%c0_78, %c0_79] : memref<8x128xf32, #tpu.memory_space<vmem>>, vector<8x128xf32>
      tpu.vector_store %arg6[%c0_78, %c0_79], %282 {strides = array<i32>} : memref<8x128xf32, #tpu.memory_space<vmem>>, vector<8x128xf32>,
    } else {
    }
    %c0 = arith.constant 0 : index
    %c0_1 = arith.constant 0 : index
    %3 = vector.load %arg3[%c0, %c0_1] : memref<128x512xf32, #tpu.memory_space<vmem>>, vector<128x512xf32>
    %c0_2 = arith.constant 0 : index
    %c0_3 = arith.constant 0 : index
    %4 = vector.load %arg5[%c0_2, %c0_3] : memref<8x128xf32, #tpu.memory_space<vmem>>, vector<8x128xf32>
    %c0_4 = arith.constant 0 : index
    %c0_5 = arith.constant 0 : index
    %5 = vector.load %arg6[%c0_4, %c0_5] : memref<8x128xf32, #tpu.memory_space<vmem>>, vector<8x128xf32>
    %c0_i32_6 = arith.constant 0 : i32
    %6 = arith.index_cast %c0_i32_6 : i32 to index
    %c0_7 = arith.constant 0 : index
    %c0_8 = arith.constant 0 : index
    %7 = vector.load %arg2[%6, %c0_7, %c0_8] : memref<8x8x512xf32, #tpu.memory_space<vmem>>, vector<1x8x512xf32>
    %8 = vector.shape_cast %7 : vector<1x8x512xf32> to vector<8x512xf32>
    %cst = arith.constant dense<0.000000e+00> : vector<8x512xf32>
    %9 = tpu.matmul %4, %3, %cst {dimension_numbers = #tpu.dot_dimension_numbers<[1], [0], [0], [1], [0, 0, 1, 1], [], []>} : vector<8x128xf32>, vector<128x512xf32>, vector<8x512xf32> -> vector<8x512xf32>
    %10 = arith.addf %8, %9 : vector<8x512xf32>
    %11 = vector.extract_strided_slice %10 {offsets = [0, 0], sizes = [8, 128], strides = [1, 1]} : vector<8x512xf32> to vector<8x128xf32>
    %12 = arith.negf %11 : vector<8x128xf32>
    %13 = math.exp %12 : vector<8x128xf32>
    %cst_9 = arith.constant 1.000000e+00 : f32
    %14 = vector.broadcast %cst_9 : f32 to vector<8x128xf32>
    %15 = arith.addf %14, %13 : vector<8x128xf32>
    %16 = arith.divf %14, %15 : vector<8x128xf32>
    %17 = vector.extract_strided_slice %10 {offsets = [0, 128], sizes = [8, 128], strides = [1, 1]} : vector<8x512xf32> to vector<8x128xf32>
    %18 = arith.negf %17 : vector<8x128xf32>
    %19 = math.exp %18 : vector<8x128xf32>
    %cst_10 = arith.constant 1.000000e+00 : f32
    %20 = vector.broadcast %cst_10 : f32 to vector<8x128xf32>
    %21 = arith.addf %20, %19 : vector<8x128xf32>
    %22 = arith.divf %20, %21 : vector<8x128xf32>
    %23 = vector.extract_strided_slice %10 {offsets = [0, 256], sizes = [8, 128], strides = [1, 1]} : vector<8x512xf32> to vector<8x128xf32>
    %24 = math.tanh %23 : vector<8x128xf32>
    %25 = vector.extract_strided_slice %10 {offsets = [0, 384], sizes = [8, 128], strides = [1, 1]} : vector<8x512xf32> to vector<8x128xf32>
    %26 = arith.negf %25 : vector<8x128xf32>
    %27 = math.exp %26 : vector<8x128xf32>
    %cst_11 = arith.constant 1.000000e+00 : f32
    %28 = vector.broadcast %cst_11 : f32 to vector<8x128xf32>
    %29 = arith.addf %28, %27 : vector<8x128xf32>
    %30 = arith.divf %28, %29 : vector<8x128xf32>
    %31 = arith.mulf %22, %5 : vector<8x128xf32>
    %32 = arith.mulf %16, %24 : vector<8x128xf32>
    %33 = arith.addf %31, %32 : vector<8x128xf32>
    %34 = math.tanh %33 : vector<8x128xf32>
    %35 = arith.mulf %30, %34 : vector<8x128xf32>
    %36 = arith.index_cast %c0_i32_6 : i32 to index
    %c0_12 = arith.constant 0 : index
    %c0_13 = arith.constant 0 : index
    %37 = vector.load %arg4[%36, %c0_12, %c0_13] : memref<8x8x128xf32, #tpu.memory_space<vmem>>, vector<1x8x128xf32>
    %38 = vector.shape_cast %37 : vector<1x8x128xf32> to vector<8x128xf32>
    %39 = vector.shape_cast %35 : vector<8x128xf32> to vector<1x8x128xf32>
    tpu.vector_store %arg4[%36, %c0_12, %c0_13], %39 {strides = array<i32>} : memref<8x8x128xf32, #tpu.memory_space<vmem>>, vector<1x8x128xf32>,
    %c1_i32 = arith.constant 1 : i32
    %40 = arith.index_cast %c1_i32 : i32 to index
    %c0_14 = arith.constant 0 : index
    %c0_15 = arith.constant 0 : index
    %41 = vector.load %arg2[%40, %c0_14, %c0_15] : memref<8x8x512xf32, #tpu.memory_space<vmem>>, vector<1x8x512xf32>
    %42 = vector.shape_cast %41 : vector<1x8x512xf32> to vector<8x512xf32>
    %cst_16 = arith.constant dense<0.000000e+00> : vector<8x512xf32>
    %43 = tpu.matmul %35, %3, %cst_16 {dimension_numbers = #tpu.dot_dimension_numbers<[1], [0], [0], [1], [0, 0, 1, 1], [], []>} : vector<8x128xf32>, vector<128x512xf32>, vector<8x512xf32> -> vector<8x512xf32>
    %44 = arith.addf %42, %43 : vector<8x512xf32>
    %45 = vector.extract_strided_slice %44 {offsets = [0, 0], sizes = [8, 128], strides = [1, 1]} : vector<8x512xf32> to vector<8x128xf32>
    %46 = arith.negf %45 : vector<8x128xf32>
    %47 = math.exp %46 : vector<8x128xf32>
    %cst_17 = arith.constant 1.000000e+00 : f32
    %48 = vector.broadcast %cst_17 : f32 to vector<8x128xf32>
    %49 = arith.addf %48, %47 : vector<8x128xf32>
    %50 = arith.divf %48, %49 : vector<8x128xf32>
    %51 = vector.extract_strided_slice %44 {offsets = [0, 128], sizes = [8, 128], strides = [1, 1]} : vector<8x512xf32> to vector<8x128xf32>
    %52 = arith.negf %51 : vector<8x128xf32>
    %53 = math.exp %52 : vector<8x128xf32>
    %cst_18 = arith.constant 1.000000e+00 : f32
    %54 = vector.broadcast %cst_18 : f32 to vector<8x128xf32>
    %55 = arith.addf %54, %53 : vector<8x128xf32>
    %56 = arith.divf %54, %55 : vector<8x128xf32>
    %57 = vector.extract_strided_slice %44 {offsets = [0, 256], sizes = [8, 128], strides = [1, 1]} : vector<8x512xf32> to vector<8x128xf32>
    %58 = math.tanh %57 : vector<8x128xf32>
    %59 = vector.extract_strided_slice %44 {offsets = [0, 384], sizes = [8, 128], strides = [1, 1]} : vector<8x512xf32> to vector<8x128xf32>
    %60 = arith.negf %59 : vector<8x128xf32>
    %61 = math.exp %60 : vector<8x128xf32>
    %cst_19 = arith.constant 1.000000e+00 : f32
    %62 = vector.broadcast %cst_19 : f32 to vector<8x128xf32>
    %63 = arith.addf %62, %61 : vector<8x128xf32>
    %64 = arith.divf %62, %63 : vector<8x128xf32>
    %65 = arith.mulf %56, %33 : vector<8x128xf32>
    %66 = arith.mulf %50, %58 : vector<8x128xf32>
    %67 = arith.addf %65, %66 : vector<8x128xf32>
    %68 = math.tanh %67 : vector<8x128xf32>
    %69 = arith.mulf %64, %68 : vector<8x128xf32>
    %70 = arith.index_cast %c1_i32 : i32 to index
    %c0_20 = arith.constant 0 : index
    %c0_21 = arith.constant 0 : index
    %71 = vector.load %arg4[%70, %c0_20, %c0_21] : memref<8x8x128xf32, #tpu.memory_space<vmem>>, vector<1x8x128xf32>
    %72 = vector.shape_cast %71 : vector<1x8x128xf32> to vector<8x128xf32>
    %73 = vector.shape_cast %69 : vector<8x128xf32> to vector<1x8x128xf32>
    tpu.vector_store %arg4[%70, %c0_20, %c0_21], %73 {strides = array<i32>} : memref<8x8x128xf32, #tpu.memory_space<vmem>>, vector<1x8x128xf32>,
    %c2_i32 = arith.constant 2 : i32
    %74 = arith.index_cast %c2_i32 : i32 to index
    %c0_22 = arith.constant 0 : index
    %c0_23 = arith.constant 0 : index
    %75 = vector.load %arg2[%74, %c0_22, %c0_23] : memref<8x8x512xf32, #tpu.memory_space<vmem>>, vector<1x8x512xf32>
    %76 = vector.shape_cast %75 : vector<1x8x512xf32> to vector<8x512xf32>
    %cst_24 = arith.constant dense<0.000000e+00> : vector<8x512xf32>
    %77 = tpu.matmul %69, %3, %cst_24 {dimension_numbers = #tpu.dot_dimension_numbers<[1], [0], [0], [1], [0, 0, 1, 1], [], []>} : vector<8x128xf32>, vector<128x512xf32>, vector<8x512xf32> -> vector<8x512xf32>
    %78 = arith.addf %76, %77 : vector<8x512xf32>
    %79 = vector.extract_strided_slice %78 {offsets = [0, 0], sizes = [8, 128], strides = [1, 1]} : vector<8x512xf32> to vector<8x128xf32>
    %80 = arith.negf %79 : vector<8x128xf32>
    %81 = math.exp %80 : vector<8x128xf32>
    %cst_25 = arith.constant 1.000000e+00 : f32
    %82 = vector.broadcast %cst_25 : f32 to vector<8x128xf32>
    %83 = arith.addf %82, %81 : vector<8x128xf32>
    %84 = arith.divf %82, %83 : vector<8x128xf32>
    %85 = vector.extract_strided_slice %78 {offsets = [0, 128], sizes = [8, 128], strides = [1, 1]} : vector<8x512xf32> to vector<8x128xf32>
    %86 = arith.negf %85 : vector<8x128xf32>
    %87 = math.exp %86 : vector<8x128xf32>
    %cst_26 = arith.constant 1.000000e+00 : f32
    %88 = vector.broadcast %cst_26 : f32 to vector<8x128xf32>
    %89 = arith.addf %88, %87 : vector<8x128xf32>
    %90 = arith.divf %88, %89 : vector<8x128xf32>
    %91 = vector.extract_strided_slice %78 {offsets = [0, 256], sizes = [8, 128], strides = [1, 1]} : vector<8x512xf32> to vector<8x128xf32>
    %92 = math.tanh %91 : vector<8x128xf32>
    %93 = vector.extract_strided_slice %78 {offsets = [0, 384], sizes = [8, 128], strides = [1, 1]} : vector<8x512xf32> to vector<8x128xf32>
    %94 = arith.negf %93 : vector<8x128xf32>
    %95 = math.exp %94 : vector<8x128xf32>
    %cst_27 = arith.constant 1.000000e+00 : f32
    %96 = vector.broadcast %cst_27 : f32 to vector<8x128xf32>
    %97 = arith.addf %96, %95 : vector<8x128xf32>
    %98 = arith.divf %96, %97 : vector<8x128xf32>
    %99 = arith.mulf %90, %67 : vector<8x128xf32>
    %100 = arith.mulf %84, %92 : vector<8x128xf32>
    %101 = arith.addf %99, %100 : vector<8x128xf32>
    %102 = math.tanh %101 : vector<8x128xf32>
    %103 = arith.mulf %98, %102 : vector<8x128xf32>
    %104 = arith.index_cast %c2_i32 : i32 to index
    %c0_28 = arith.constant 0 : index
    %c0_29 = arith.constant 0 : index
    %105 = vector.load %arg4[%104, %c0_28, %c0_29] : memref<8x8x128xf32, #tpu.memory_space<vmem>>, vector<1x8x128xf32>
    %106 = vector.shape_cast %105 : vector<1x8x128xf32> to vector<8x128xf32>
    %107 = vector.shape_cast %103 : vector<8x128xf32> to vector<1x8x128xf32>
    tpu.vector_store %arg4[%104, %c0_28, %c0_29], %107 {strides = array<i32>} : memref<8x8x128xf32, #tpu.memory_space<vmem>>, vector<1x8x128xf32>,
    %c3_i32 = arith.constant 3 : i32
    %108 = arith.index_cast %c3_i32 : i32 to index
    %c0_30 = arith.constant 0 : index
    %c0_31 = arith.constant 0 : index
    %109 = vector.load %arg2[%108, %c0_30, %c0_31] : memref<8x8x512xf32, #tpu.memory_space<vmem>>, vector<1x8x512xf32>
    %110 = vector.shape_cast %109 : vector<1x8x512xf32> to vector<8x512xf32>
    %cst_32 = arith.constant dense<0.000000e+00> : vector<8x512xf32>
    %111 = tpu.matmul %103, %3, %cst_32 {dimension_numbers = #tpu.dot_dimension_numbers<[1], [0], [0], [1], [0, 0, 1, 1], [], []>} : vector<8x128xf32>, vector<128x512xf32>, vector<8x512xf32> -> vector<8x512xf32>
    %112 = arith.addf %110, %111 : vector<8x512xf32>
    %113 = vector.extract_strided_slice %112 {offsets = [0, 0], sizes = [8, 128], strides = [1, 1]} : vector<8x512xf32> to vector<8x128xf32>
    %114 = arith.negf %113 : vector<8x128xf32>
    %115 = math.exp %114 : vector<8x128xf32>
    %cst_33 = arith.constant 1.000000e+00 : f32
    %116 = vector.broadcast %cst_33 : f32 to vector<8x128xf32>
    %117 = arith.addf %116, %115 : vector<8x128xf32>
    %118 = arith.divf %116, %117 : vector<8x128xf32>
    %119 = vector.extract_strided_slice %112 {offsets = [0, 128], sizes = [8, 128], strides = [1, 1]} : vector<8x512xf32> to vector<8x128xf32>
    %120 = arith.negf %119 : vector<8x128xf32>
    %121 = math.exp %120 : vector<8x128xf32>
    %cst_34 = arith.constant 1.000000e+00 : f32
    %122 = vector.broadcast %cst_34 : f32 to vector<8x128xf32>
    %123 = arith.addf %122, %121 : vector<8x128xf32>
    %124 = arith.divf %122, %123 : vector<8x128xf32>
    %125 = vector.extract_strided_slice %112 {offsets = [0, 256], sizes = [8, 128], strides = [1, 1]} : vector<8x512xf32> to vector<8x128xf32>
    %126 = math.tanh %125 : vector<8x128xf32>
    %127 = vector.extract_strided_slice %112 {offsets = [0, 384], sizes = [8, 128], strides = [1, 1]} : vector<8x512xf32> to vector<8x128xf32>
    %128 = arith.negf %127 : vector<8x128xf32>
    %129 = math.exp %128 : vector<8x128xf32>
    %cst_35 = arith.constant 1.000000e+00 : f32
    %130 = vector.broadcast %cst_35 : f32 to vector<8x128xf32>
    %131 = arith.addf %130, %129 : vector<8x128xf32>
    %132 = arith.divf %130, %131 : vector<8x128xf32>
    %133 = arith.mulf %124, %101 : vector<8x128xf32>
    %134 = arith.mulf %118, %126 : vector<8x128xf32>
    %135 = arith.addf %133, %134 : vector<8x128xf32>
    %136 = math.tanh %135 : vector<8x128xf32>
    %137 = arith.mulf %132, %136 : vector<8x128xf32>
    %138 = arith.index_cast %c3_i32 : i32 to index
    %c0_36 = arith.constant 0 : index
    %c0_37 = arith.constant 0 : index
    %139 = vector.load %arg4[%138, %c0_36, %c0_37] : memref<8x8x128xf32, #tpu.memory_space<vmem>>, vector<1x8x128xf32>
    %140 = vector.shape_cast %139 : vector<1x8x128xf32> to vector<8x128xf32>
    %141 = vector.shape_cast %137 : vector<8x128xf32> to vector<1x8x128xf32>
    tpu.vector_store %arg4[%138, %c0_36, %c0_37], %141 {strides = array<i32>} : memref<8x8x128xf32, #tpu.memory_space<vmem>>, vector<1x8x128xf32>,
    %c4_i32 = arith.constant 4 : i32
    %142 = arith.index_cast %c4_i32 : i32 to index
    %c0_38 = arith.constant 0 : index
    %c0_39 = arith.constant 0 : index
    %143 = vector.load %arg2[%142, %c0_38, %c0_39] : memref<8x8x512xf32, #tpu.memory_space<vmem>>, vector<1x8x512xf32>
    %144 = vector.shape_cast %143 : vector<1x8x512xf32> to vector<8x512xf32>
    %cst_40 = arith.constant dense<0.000000e+00> : vector<8x512xf32>
    %145 = tpu.matmul %137, %3, %cst_40 {dimension_numbers = #tpu.dot_dimension_numbers<[1], [0], [0], [1], [0, 0, 1, 1], [], []>} : vector<8x128xf32>, vector<128x512xf32>, vector<8x512xf32> -> vector<8x512xf32>
    %146 = arith.addf %144, %145 : vector<8x512xf32>
    %147 = vector.extract_strided_slice %146 {offsets = [0, 0], sizes = [8, 128], strides = [1, 1]} : vector<8x512xf32> to vector<8x128xf32>
    %148 = arith.negf %147 : vector<8x128xf32>
    %149 = math.exp %148 : vector<8x128xf32>
    %cst_41 = arith.constant 1.000000e+00 : f32
    %150 = vector.broadcast %cst_41 : f32 to vector<8x128xf32>
    %151 = arith.addf %150, %149 : vector<8x128xf32>
    %152 = arith.divf %150, %151 : vector<8x128xf32>
    %153 = vector.extract_strided_slice %146 {offsets = [0, 128], sizes = [8, 128], strides = [1, 1]} : vector<8x512xf32> to vector<8x128xf32>
    %154 = arith.negf %153 : vector<8x128xf32>
    %155 = math.exp %154 : vector<8x128xf32>
    %cst_42 = arith.constant 1.000000e+00 : f32
    %156 = vector.broadcast %cst_42 : f32 to vector<8x128xf32>
    %157 = arith.addf %156, %155 : vector<8x128xf32>
    %158 = arith.divf %156, %157 : vector<8x128xf32>
    %159 = vector.extract_strided_slice %146 {offsets = [0, 256], sizes = [8, 128], strides = [1, 1]} : vector<8x512xf32> to vector<8x128xf32>
    %160 = math.tanh %159 : vector<8x128xf32>
    %161 = vector.extract_strided_slice %146 {offsets = [0, 384], sizes = [8, 128], strides = [1, 1]} : vector<8x512xf32> to vector<8x128xf32>
    %162 = arith.negf %161 : vector<8x128xf32>
    %163 = math.exp %162 : vector<8x128xf32>
    %cst_43 = arith.constant 1.000000e+00 : f32
    %164 = vector.broadcast %cst_43 : f32 to vector<8x128xf32>
    %165 = arith.addf %164, %163 : vector<8x128xf32>
    %166 = arith.divf %164, %165 : vector<8x128xf32>
    %167 = arith.mulf %158, %135 : vector<8x128xf32>
    %168 = arith.mulf %152, %160 : vector<8x128xf32>
    %169 = arith.addf %167, %168 : vector<8x128xf32>
    %170 = math.tanh %169 : vector<8x128xf32>
    %171 = arith.mulf %166, %170 : vector<8x128xf32>
    %172 = arith.index_cast %c4_i32 : i32 to index
    %c0_44 = arith.constant 0 : index
    %c0_45 = arith.constant 0 : index
    %173 = vector.load %arg4[%172, %c0_44, %c0_45] : memref<8x8x128xf32, #tpu.memory_space<vmem>>, vector<1x8x128xf32>
    %174 = vector.shape_cast %173 : vector<1x8x128xf32> to vector<8x128xf32>
    %175 = vector.shape_cast %171 : vector<8x128xf32> to vector<1x8x128xf32>
    tpu.vector_store %arg4[%172, %c0_44, %c0_45], %175 {strides = array<i32>} : memref<8x8x128xf32, #tpu.memory_space<vmem>>, vector<1x8x128xf32>,
    %c5_i32 = arith.constant 5 : i32
    %176 = arith.index_cast %c5_i32 : i32 to index
    %c0_46 = arith.constant 0 : index
    %c0_47 = arith.constant 0 : index
    %177 = vector.load %arg2[%176, %c0_46, %c0_47] : memref<8x8x512xf32, #tpu.memory_space<vmem>>, vector<1x8x512xf32>
    %178 = vector.shape_cast %177 : vector<1x8x512xf32> to vector<8x512xf32>
    %cst_48 = arith.constant dense<0.000000e+00> : vector<8x512xf32>
    %179 = tpu.matmul %171, %3, %cst_48 {dimension_numbers = #tpu.dot_dimension_numbers<[1], [0], [0], [1], [0, 0, 1, 1], [], []>} : vector<8x128xf32>, vector<128x512xf32>, vector<8x512xf32> -> vector<8x512xf32>
    %180 = arith.addf %178, %179 : vector<8x512xf32>
    %181 = vector.extract_strided_slice %180 {offsets = [0, 0], sizes = [8, 128], strides = [1, 1]} : vector<8x512xf32> to vector<8x128xf32>
    %182 = arith.negf %181 : vector<8x128xf32>
    %183 = math.exp %182 : vector<8x128xf32>
    %cst_49 = arith.constant 1.000000e+00 : f32
    %184 = vector.broadcast %cst_49 : f32 to vector<8x128xf32>
    %185 = arith.addf %184, %183 : vector<8x128xf32>
    %186 = arith.divf %184, %185 : vector<8x128xf32>
    %187 = vector.extract_strided_slice %180 {offsets = [0, 128], sizes = [8, 128], strides = [1, 1]} : vector<8x512xf32> to vector<8x128xf32>
    %188 = arith.negf %187 : vector<8x128xf32>
    %189 = math.exp %188 : vector<8x128xf32>
    %cst_50 = arith.constant 1.000000e+00 : f32
    %190 = vector.broadcast %cst_50 : f32 to vector<8x128xf32>
    %191 = arith.addf %190, %189 : vector<8x128xf32>
    %192 = arith.divf %190, %191 : vector<8x128xf32>
    %193 = vector.extract_strided_slice %180 {offsets = [0, 256], sizes = [8, 128], strides = [1, 1]} : vector<8x512xf32> to vector<8x128xf32>
    %194 = math.tanh %193 : vector<8x128xf32>
    %195 = vector.extract_strided_slice %180 {offsets = [0, 384], sizes = [8, 128], strides = [1, 1]} : vector<8x512xf32> to vector<8x128xf32>
    %196 = arith.negf %195 : vector<8x128xf32>
    %197 = math.exp %196 : vector<8x128xf32>
    %cst_51 = arith.constant 1.000000e+00 : f32
    %198 = vector.broadcast %cst_51 : f32 to vector<8x128xf32>
    %199 = arith.addf %198, %197 : vector<8x128xf32>
    %200 = arith.divf %198, %199 : vector<8x128xf32>
    %201 = arith.mulf %192, %169 : vector<8x128xf32>
    %202 = arith.mulf %186, %194 : vector<8x128xf32>
    %203 = arith.addf %201, %202 : vector<8x128xf32>
    %204 = math.tanh %203 : vector<8x128xf32>
    %205 = arith.mulf %200, %204 : vector<8x128xf32>
    %206 = arith.index_cast %c5_i32 : i32 to index
    %c0_52 = arith.constant 0 : index
    %c0_53 = arith.constant 0 : index
    %207 = vector.load %arg4[%206, %c0_52, %c0_53] : memref<8x8x128xf32, #tpu.memory_space<vmem>>, vector<1x8x128xf32>
    %208 = vector.shape_cast %207 : vector<1x8x128xf32> to vector<8x128xf32>
    %209 = vector.shape_cast %205 : vector<8x128xf32> to vector<1x8x128xf32>
    tpu.vector_store %arg4[%206, %c0_52, %c0_53], %209 {strides = array<i32>} : memref<8x8x128xf32, #tpu.memory_space<vmem>>, vector<1x8x128xf32>,
    %c6_i32 = arith.constant 6 : i32
    %210 = arith.index_cast %c6_i32 : i32 to index
    %c0_54 = arith.constant 0 : index
    %c0_55 = arith.constant 0 : index
    %211 = vector.load %arg2[%210, %c0_54, %c0_55] : memref<8x8x512xf32, #tpu.memory_space<vmem>>, vector<1x8x512xf32>
    %212 = vector.shape_cast %211 : vector<1x8x512xf32> to vector<8x512xf32>
    %cst_56 = arith.constant dense<0.000000e+00> : vector<8x512xf32>
    %213 = tpu.matmul %205, %3, %cst_56 {dimension_numbers = #tpu.dot_dimension_numbers<[1], [0], [0], [1], [0, 0, 1, 1], [], []>} : vector<8x128xf32>, vector<128x512xf32>, vector<8x512xf32> -> vector<8x512xf32>
    %214 = arith.addf %212, %213 : vector<8x512xf32>
    %215 = vector.extract_strided_slice %214 {offsets = [0, 0], sizes = [8, 128], strides = [1, 1]} : vector<8x512xf32> to vector<8x128xf32>
    %216 = arith.negf %215 : vector<8x128xf32>
    %217 = math.exp %216 : vector<8x128xf32>
    %cst_57 = arith.constant 1.000000e+00 : f32
    %218 = vector.broadcast %cst_57 : f32 to vector<8x128xf32>
    %219 = arith.addf %218, %217 : vector<8x128xf32>
    %220 = arith.divf %218, %219 : vector<8x128xf32>
    %221 = vector.extract_strided_slice %214 {offsets = [0, 128], sizes = [8, 128], strides = [1, 1]} : vector<8x512xf32> to vector<8x128xf32>
    %222 = arith.negf %221 : vector<8x128xf32>
    %223 = math.exp %222 : vector<8x128xf32>
    %cst_58 = arith.constant 1.000000e+00 : f32
    %224 = vector.broadcast %cst_58 : f32 to vector<8x128xf32>
    %225 = arith.addf %224, %223 : vector<8x128xf32>
    %226 = arith.divf %224, %225 : vector<8x128xf32>
    %227 = vector.extract_strided_slice %214 {offsets = [0, 256], sizes = [8, 128], strides = [1, 1]} : vector<8x512xf32> to vector<8x128xf32>
    %228 = math.tanh %227 : vector<8x128xf32>
    %229 = vector.extract_strided_slice %214 {offsets = [0, 384], sizes = [8, 128], strides = [1, 1]} : vector<8x512xf32> to vector<8x128xf32>
    %230 = arith.negf %229 : vector<8x128xf32>
    %231 = math.exp %230 : vector<8x128xf32>
    %cst_59 = arith.constant 1.000000e+00 : f32
    %232 = vector.broadcast %cst_59 : f32 to vector<8x128xf32>
    %233 = arith.addf %232, %231 : vector<8x128xf32>
    %234 = arith.divf %232, %233 : vector<8x128xf32>
    %235 = arith.mulf %226, %203 : vector<8x128xf32>
    %236 = arith.mulf %220, %228 : vector<8x128xf32>
    %237 = arith.addf %235, %236 : vector<8x128xf32>
    %238 = math.tanh %237 : vector<8x128xf32>
    %239 = arith.mulf %234, %238 : vector<8x128xf32>
    %240 = arith.index_cast %c6_i32 : i32 to index
    %c0_60 = arith.constant 0 : index
    %c0_61 = arith.constant 0 : index
    %241 = vector.load %arg4[%240, %c0_60, %c0_61] : memref<8x8x128xf32, #tpu.memory_space<vmem>>, vector<1x8x128xf32>
    %242 = vector.shape_cast %241 : vector<1x8x128xf32> to vector<8x128xf32>
    %243 = vector.shape_cast %239 : vector<8x128xf32> to vector<1x8x128xf32>
    tpu.vector_store %arg4[%240, %c0_60, %c0_61], %243 {strides = array<i32>} : memref<8x8x128xf32, #tpu.memory_space<vmem>>, vector<1x8x128xf32>,
    %c7_i32 = arith.constant 7 : i32
    %244 = arith.index_cast %c7_i32 : i32 to index
    %c0_62 = arith.constant 0 : index
    %c0_63 = arith.constant 0 : index
    %245 = vector.load %arg2[%244, %c0_62, %c0_63] : memref<8x8x512xf32, #tpu.memory_space<vmem>>, vector<1x8x512xf32>
    %246 = vector.shape_cast %245 : vector<1x8x512xf32> to vector<8x512xf32>
    %cst_64 = arith.constant dense<0.000000e+00> : vector<8x512xf32>
    %247 = tpu.matmul %239, %3, %cst_64 {dimension_numbers = #tpu.dot_dimension_numbers<[1], [0], [0], [1], [0, 0, 1, 1], [], []>} : vector<8x128xf32>, vector<128x512xf32>, vector<8x512xf32> -> vector<8x512xf32>
    %248 = arith.addf %246, %247 : vector<8x512xf32>
    %249 = vector.extract_strided_slice %248 {offsets = [0, 0], sizes = [8, 128], strides = [1, 1]} : vector<8x512xf32> to vector<8x128xf32>
    %250 = arith.negf %249 : vector<8x128xf32>
    %251 = math.exp %250 : vector<8x128xf32>
    %cst_65 = arith.constant 1.000000e+00 : f32
    %252 = vector.broadcast %cst_65 : f32 to vector<8x128xf32>
    %253 = arith.addf %252, %251 : vector<8x128xf32>
    %254 = arith.divf %252, %253 : vector<8x128xf32>
    %255 = vector.extract_strided_slice %248 {offsets = [0, 128], sizes = [8, 128], strides = [1, 1]} : vector<8x512xf32> to vector<8x128xf32>
    %256 = arith.negf %255 : vector<8x128xf32>
    %257 = math.exp %256 : vector<8x128xf32>
    %cst_66 = arith.constant 1.000000e+00 : f32
    %258 = vector.broadcast %cst_66 : f32 to vector<8x128xf32>
    %259 = arith.addf %258, %257 : vector<8x128xf32>
    %260 = arith.divf %258, %259 : vector<8x128xf32>
    %261 = vector.extract_strided_slice %248 {offsets = [0, 256], sizes = [8, 128], strides = [1, 1]} : vector<8x512xf32> to vector<8x128xf32>
    %262 = math.tanh %261 : vector<8x128xf32>
    %263 = vector.extract_strided_slice %248 {offsets = [0, 384], sizes = [8, 128], strides = [1, 1]} : vector<8x512xf32> to vector<8x128xf32>
    %264 = arith.negf %263 : vector<8x128xf32>
    %265 = math.exp %264 : vector<8x128xf32>
    %cst_67 = arith.constant 1.000000e+00 : f32
    %266 = vector.broadcast %cst_67 : f32 to vector<8x128xf32>
    %267 = arith.addf %266, %265 : vector<8x128xf32>
    %268 = arith.divf %266, %267 : vector<8x128xf32>
    %269 = arith.mulf %260, %237 : vector<8x128xf32>
    %270 = arith.mulf %254, %262 : vector<8x128xf32>
    %271 = arith.addf %269, %270 : vector<8x128xf32>
    %272 = math.tanh %271 : vector<8x128xf32>
    %273 = arith.mulf %268, %272 : vector<8x128xf32>
    %274 = arith.index_cast %c7_i32 : i32 to index
    %c0_68 = arith.constant 0 : index
    %c0_69 = arith.constant 0 : index
    %275 = vector.load %arg4[%274, %c0_68, %c0_69] : memref<8x8x128xf32, #tpu.memory_space<vmem>>, vector<1x8x128xf32>
    %276 = vector.shape_cast %275 : vector<1x8x128xf32> to vector<8x128xf32>
    %277 = vector.shape_cast %273 : vector<8x128xf32> to vector<1x8x128xf32>
    tpu.vector_store %arg4[%274, %c0_68, %c0_69], %277 {strides = array<i32>} : memref<8x8x128xf32, #tpu.memory_space<vmem>>, vector<1x8x128xf32>,
    %c8_i32 = arith.constant 8 : i32
    %c0_70 = arith.constant 0 : index
    %c0_71 = arith.constant 0 : index
    %278 = vector.load %arg5[%c0_70, %c0_71] : memref<8x128xf32, #tpu.memory_space<vmem>>, vector<8x128xf32>
    tpu.vector_store %arg5[%c0_70, %c0_71], %273 {strides = array<i32>} : memref<8x128xf32, #tpu.memory_space<vmem>>, vector<8x128xf32>,
    %c0_72 = arith.constant 0 : index
    %c0_73 = arith.constant 0 : index
    %279 = vector.load %arg6[%c0_72, %c0_73] : memref<8x128xf32, #tpu.memory_space<vmem>>, vector<8x128xf32>
    tpu.vector_store %arg6[%c0_72, %c0_73], %271 {strides = array<i32>} : memref<8x128xf32, #tpu.memory_space<vmem>>, vector<8x128xf32>,
    return
  }
  func.func @transform_0(%arg0: i32, %arg1: i32) -> (i32, i32, i32) {
    %c0_i32 = arith.constant 0 : i32
    %c0_i32_0 = arith.constant 0 : i32
    return %arg1, %arg0, %c0_i32 : i32, i32, i32
  }
  func.func @transform_1(%arg0: i32, %arg1: i32) -> (i32, i32) {
    %c0_i32 = arith.constant 0 : i32
    %c0_i32_0 = arith.constant 0 : i32
    %c0_i32_1 = arith.constant 0 : i32
    return %c0_i32, %c0_i32_0 : i32, i32
  }
  func.func @transform_2(%arg0: i32, %arg1: i32) -> (i32, i32, i32) {
    %c0_i32 = arith.constant 0 : i32
    %c0_i32_0 = arith.constant 0 : i32
    return %arg1, %arg0, %c0_i32 : i32, i32, i32
  }
}

module attributes {stable_mosaic.version = 11 : i64} {
  func.func @_input_proj_kernel(%arg0: i32, %arg1: i32, %arg2: memref<8x8x16xf32, #tpu.memory_space<vmem>>, %arg3: memref<16x512xf32, #tpu.memory_space<vmem>>, %arg4: memref<1x512xf32, #tpu.memory_space<vmem>>, %arg5: memref<8x8x512xf32, #tpu.memory_space<vmem>>) attributes {dimension_semantics = [#tpu.dimension_semantics<parallel>, #tpu.dimension_semantics<parallel>], iteration_bounds = array<i64: 1, 1>, scalar_prefetch = 0 : i64, scratch_operands = 0 : i64, tpu.core_type = #tpu.core_type<tc>, window_params = [{transform_indices = @transform_0, window_bounds = array<i64: 8, 8, 16>}, {pipeline_mode = #tpu.pipeline_mode<synchronous>, transform_indices = @transform_1, window_bounds = array<i64: 16, 512>}, {pipeline_mode = #tpu.pipeline_mode<synchronous>, transform_indices = @transform_2, window_bounds = array<i64: 1, 512>}, {transform_indices = @transform_3, window_bounds = array<i64: 8, 8, 512>}]} {
    %c0 = arith.constant 0 : index
    %c0_0 = arith.constant 0 : index
    %0 = vector.load %arg3[%c0, %c0_0] : memref<16x512xf32, #tpu.memory_space<vmem>>, vector<16x512xf32>
    %c0_1 = arith.constant 0 : index
    %c0_2 = arith.constant 0 : index
    %c0_3 = arith.constant 0 : index
    %1 = vector.load %arg2[%c0_1, %c0_2, %c0_3] : memref<8x8x16xf32, #tpu.memory_space<vmem>>, vector<8x8x16xf32>
    %2 = vector.shape_cast %1 : vector<8x8x16xf32> to vector<64x16xf32>
    %cst = arith.constant dense<0.000000e+00> : vector<64x512xf32>
    %3 = tpu.matmul %2, %0, %cst {dimension_numbers = #tpu.dot_dimension_numbers<[1], [0], [0], [1], [0, 0, 1, 1], [], []>} : vector<64x16xf32>, vector<16x512xf32>, vector<64x512xf32> -> vector<64x512xf32>
    %c0_4 = arith.constant 0 : index
    %c0_5 = arith.constant 0 : index
    %4 = vector.load %arg4[%c0_4, %c0_5] : memref<1x512xf32, #tpu.memory_space<vmem>>, vector<1x512xf32>
    %5 = vector.broadcast %4 : vector<1x512xf32> to vector<64x512xf32>
    %6 = arith.addf %3, %5 : vector<64x512xf32>
    %7 = vector.shape_cast %6 : vector<64x512xf32> to vector<8x8x512xf32>
    %c0_6 = arith.constant 0 : index
    %c0_7 = arith.constant 0 : index
    %c0_8 = arith.constant 0 : index
    %8 = vector.load %arg5[%c0_6, %c0_7, %c0_8] : memref<8x8x512xf32, #tpu.memory_space<vmem>>, vector<8x8x512xf32>
    tpu.vector_store %arg5[%c0_6, %c0_7, %c0_8], %7 {strides = array<i32>} : memref<8x8x512xf32, #tpu.memory_space<vmem>>, vector<8x8x512xf32>,
    return
  }
  func.func @transform_0(%arg0: i32, %arg1: i32) -> (i32, i32, i32) {
    %c0_i32 = arith.constant 0 : i32
    %c0_i32_0 = arith.constant 0 : i32
    %c0_i32_1 = arith.constant 0 : i32
    return %arg1, %c0_i32, %c0_i32_0 : i32, i32, i32
  }
  func.func @transform_1(%arg0: i32, %arg1: i32) -> (i32, i32) {
    %c0_i32 = arith.constant 0 : i32
    %c0_i32_0 = arith.constant 0 : i32
    return %c0_i32, %arg0 : i32, i32
  }
  func.func @transform_2(%arg0: i32, %arg1: i32) -> (i32, i32) {
    %c0_i32 = arith.constant 0 : i32
    %c0_i32_0 = arith.constant 0 : i32
    return %c0_i32, %arg0 : i32, i32
  }
  func.func @transform_3(%arg0: i32, %arg1: i32) -> (i32, i32, i32) {
    %c0_i32 = arith.constant 0 : i32
    %c0_i32_0 = arith.constant 0 : i32
    return %arg1, %c0_i32, %arg0 : i32, i32, i32
  }
}

module attributes {stable_mosaic.version = 11 : i64} {
  func.func @_input_proj_kernel(%arg0: i32, %arg1: i32, %arg2: memref<8x8x128xf32, #tpu.memory_space<vmem>>, %arg3: memref<128x512xf32, #tpu.memory_space<vmem>>, %arg4: memref<1x512xf32, #tpu.memory_space<vmem>>, %arg5: memref<8x8x512xf32, #tpu.memory_space<vmem>>) attributes {dimension_semantics = [#tpu.dimension_semantics<parallel>, #tpu.dimension_semantics<parallel>], iteration_bounds = array<i64: 1, 1>, scalar_prefetch = 0 : i64, scratch_operands = 0 : i64, tpu.core_type = #tpu.core_type<tc>, window_params = [{transform_indices = @transform_0, window_bounds = array<i64: 8, 8, 128>}, {pipeline_mode = #tpu.pipeline_mode<synchronous>, transform_indices = @transform_1, window_bounds = array<i64: 128, 512>}, {pipeline_mode = #tpu.pipeline_mode<synchronous>, transform_indices = @transform_2, window_bounds = array<i64: 1, 512>}, {transform_indices = @transform_3, window_bounds = array<i64: 8, 8, 512>}]} {
    %c0 = arith.constant 0 : index
    %c0_0 = arith.constant 0 : index
    %0 = vector.load %arg3[%c0, %c0_0] : memref<128x512xf32, #tpu.memory_space<vmem>>, vector<128x512xf32>
    %c0_1 = arith.constant 0 : index
    %c0_2 = arith.constant 0 : index
    %c0_3 = arith.constant 0 : index
    %1 = vector.load %arg2[%c0_1, %c0_2, %c0_3] : memref<8x8x128xf32, #tpu.memory_space<vmem>>, vector<8x8x128xf32>
    %2 = vector.shape_cast %1 : vector<8x8x128xf32> to vector<64x128xf32>
    %cst = arith.constant dense<0.000000e+00> : vector<64x512xf32>
    %3 = tpu.matmul %2, %0, %cst {dimension_numbers = #tpu.dot_dimension_numbers<[1], [0], [0], [1], [0, 0, 1, 1], [], []>} : vector<64x128xf32>, vector<128x512xf32>, vector<64x512xf32> -> vector<64x512xf32>
    %c0_4 = arith.constant 0 : index
    %c0_5 = arith.constant 0 : index
    %4 = vector.load %arg4[%c0_4, %c0_5] : memref<1x512xf32, #tpu.memory_space<vmem>>, vector<1x512xf32>
    %5 = vector.broadcast %4 : vector<1x512xf32> to vector<64x512xf32>
    %6 = arith.addf %3, %5 : vector<64x512xf32>
    %7 = vector.shape_cast %6 : vector<64x512xf32> to vector<8x8x512xf32>
    %c0_6 = arith.constant 0 : index
    %c0_7 = arith.constant 0 : index
    %c0_8 = arith.constant 0 : index
    %8 = vector.load %arg5[%c0_6, %c0_7, %c0_8] : memref<8x8x512xf32, #tpu.memory_space<vmem>>, vector<8x8x512xf32>
    tpu.vector_store %arg5[%c0_6, %c0_7, %c0_8], %7 {strides = array<i32>} : memref<8x8x512xf32, #tpu.memory_space<vmem>>, vector<8x8x512xf32>,
    return
  }
  func.func @transform_0(%arg0: i32, %arg1: i32) -> (i32, i32, i32) {
    %c0_i32 = arith.constant 0 : i32
    %c0_i32_0 = arith.constant 0 : i32
    %c0_i32_1 = arith.constant 0 : i32
    return %arg1, %c0_i32, %c0_i32_0 : i32, i32, i32
  }
  func.func @transform_1(%arg0: i32, %arg1: i32) -> (i32, i32) {
    %c0_i32 = arith.constant 0 : i32
    %c0_i32_0 = arith.constant 0 : i32
    return %c0_i32, %arg0 : i32, i32
  }
  func.func @transform_2(%arg0: i32, %arg1: i32) -> (i32, i32) {
    %c0_i32 = arith.constant 0 : i32
    %c0_i32_0 = arith.constant 0 : i32
    return %c0_i32, %arg0 : i32, i32
  }
  func.func @transform_3(%arg0: i32, %arg1: i32) -> (i32, i32, i32) {
    %c0_i32 = arith.constant 0 : i32
    %c0_i32_0 = arith.constant 0 : i32
    return %arg1, %c0_i32, %arg0 : i32, i32, i32
  }
}

module attributes {stable_mosaic.version = 11 : i64} {
  func.func @kernel(%arg0: i32, %arg1: i32, %arg2: memref<8x8x512xf32, #tpu.memory_space<vmem>>, %arg3: memref<128x512xf32, #tpu.memory_space<vmem>>, %arg4: memref<128x128xf32, #tpu.memory_space<vmem>>, %arg5: memref<1x128xf32, #tpu.memory_space<vmem>>, %arg6: memref<8x128xf32, #tpu.memory_space<vmem>>, %arg7: memref<8x128xf32, #tpu.memory_space<vmem>>, %arg8: memref<8x128xf32, #tpu.memory_space<vmem>>) attributes {dimension_semantics = [#tpu.dimension_semantics<parallel>, #tpu.dimension_semantics<arbitrary>], iteration_bounds = array<i64: 1, 1>, scalar_prefetch = 0 : i64, scratch_operands = 2 : i64, tpu.core_type = #tpu.core_type<tc>, window_params = [{transform_indices = @transform_0, window_bounds = array<i64: 8, 8, 512>}, {pipeline_mode = #tpu.pipeline_mode<synchronous>, transform_indices = @transform_1, window_bounds = array<i64: 128, 512>}, {pipeline_mode = #tpu.pipeline_mode<synchronous>, transform_indices = @transform_2, window_bounds = array<i64: 128, 128>}, {pipeline_mode = #tpu.pipeline_mode<synchronous>, transform_indices = @transform_3, window_bounds = array<i64: 1, 128>}, {transform_indices = @transform_4, window_bounds = array<i64: 8, 128>}]} {
    %c0_i32 = arith.constant 0 : i32
    %0 = arith.cmpi eq, %arg1, %c0_i32 : i32
    %1 = arith.extui %0 : i1 to i32
    %c0_i32_0 = arith.constant 0 : i32
    %2 = arith.cmpi ne, %1, %c0_i32_0 : i32
    scf.if %2 {
      %cst_60 = arith.constant 0.000000e+00 : f32
      %251 = vector.broadcast %cst_60 : f32 to vector<8x128xf32>
      %c0_61 = arith.constant 0 : index
      %c0_62 = arith.constant 0 : index
      %252 = vector.load %arg7[%c0_61, %c0_62] : memref<8x128xf32, #tpu.memory_space<vmem>>, vector<8x128xf32>
      tpu.vector_store %arg7[%c0_61, %c0_62], %251 {strides = array<i32>} : memref<8x128xf32, #tpu.memory_space<vmem>>, vector<8x128xf32>,
      %cst_63 = arith.constant 0.000000e+00 : f32
      %253 = vector.broadcast %cst_63 : f32 to vector<8x128xf32>
      %c0_64 = arith.constant 0 : index
      %c0_65 = arith.constant 0 : index
      %254 = vector.load %arg8[%c0_64, %c0_65] : memref<8x128xf32, #tpu.memory_space<vmem>>, vector<8x128xf32>
      tpu.vector_store %arg8[%c0_64, %c0_65], %253 {strides = array<i32>} : memref<8x128xf32, #tpu.memory_space<vmem>>, vector<8x128xf32>,
    } else {
    }
    %c0 = arith.constant 0 : index
    %c0_1 = arith.constant 0 : index
    %3 = vector.load %arg3[%c0, %c0_1] : memref<128x512xf32, #tpu.memory_space<vmem>>, vector<128x512xf32>
    %c0_2 = arith.constant 0 : index
    %c0_3 = arith.constant 0 : index
    %4 = vector.load %arg7[%c0_2, %c0_3] : memref<8x128xf32, #tpu.memory_space<vmem>>, vector<8x128xf32>
    %c0_4 = arith.constant 0 : index
    %c0_5 = arith.constant 0 : index
    %5 = vector.load %arg8[%c0_4, %c0_5] : memref<8x128xf32, #tpu.memory_space<vmem>>, vector<8x128xf32>
    %c0_i32_6 = arith.constant 0 : i32
    %6 = arith.index_cast %c0_i32_6 : i32 to index
    %c0_7 = arith.constant 0 : index
    %c0_8 = arith.constant 0 : index
    %7 = vector.load %arg2[%6, %c0_7, %c0_8] : memref<8x8x512xf32, #tpu.memory_space<vmem>>, vector<1x8x512xf32>
    %8 = vector.shape_cast %7 : vector<1x8x512xf32> to vector<8x512xf32>
    %cst = arith.constant dense<0.000000e+00> : vector<8x512xf32>
    %9 = tpu.matmul %4, %3, %cst {dimension_numbers = #tpu.dot_dimension_numbers<[1], [0], [0], [1], [0, 0, 1, 1], [], []>} : vector<8x128xf32>, vector<128x512xf32>, vector<8x512xf32> -> vector<8x512xf32>
    %10 = arith.addf %8, %9 : vector<8x512xf32>
    %11 = vector.extract_strided_slice %10 {offsets = [0, 0], sizes = [8, 128], strides = [1, 1]} : vector<8x512xf32> to vector<8x128xf32>
    %12 = arith.negf %11 : vector<8x128xf32>
    %13 = math.exp %12 : vector<8x128xf32>
    %cst_9 = arith.constant 1.000000e+00 : f32
    %14 = vector.broadcast %cst_9 : f32 to vector<8x128xf32>
    %15 = arith.addf %14, %13 : vector<8x128xf32>
    %16 = arith.divf %14, %15 : vector<8x128xf32>
    %17 = vector.extract_strided_slice %10 {offsets = [0, 128], sizes = [8, 128], strides = [1, 1]} : vector<8x512xf32> to vector<8x128xf32>
    %18 = arith.negf %17 : vector<8x128xf32>
    %19 = math.exp %18 : vector<8x128xf32>
    %cst_10 = arith.constant 1.000000e+00 : f32
    %20 = vector.broadcast %cst_10 : f32 to vector<8x128xf32>
    %21 = arith.addf %20, %19 : vector<8x128xf32>
    %22 = arith.divf %20, %21 : vector<8x128xf32>
    %23 = vector.extract_strided_slice %10 {offsets = [0, 256], sizes = [8, 128], strides = [1, 1]} : vector<8x512xf32> to vector<8x128xf32>
    %24 = math.tanh %23 : vector<8x128xf32>
    %25 = vector.extract_strided_slice %10 {offsets = [0, 384], sizes = [8, 128], strides = [1, 1]} : vector<8x512xf32> to vector<8x128xf32>
    %26 = arith.negf %25 : vector<8x128xf32>
    %27 = math.exp %26 : vector<8x128xf32>
    %cst_11 = arith.constant 1.000000e+00 : f32
    %28 = vector.broadcast %cst_11 : f32 to vector<8x128xf32>
    %29 = arith.addf %28, %27 : vector<8x128xf32>
    %30 = arith.divf %28, %29 : vector<8x128xf32>
    %31 = arith.mulf %22, %5 : vector<8x128xf32>
    %32 = arith.mulf %16, %24 : vector<8x128xf32>
    %33 = arith.addf %31, %32 : vector<8x128xf32>
    %34 = math.tanh %33 : vector<8x128xf32>
    %35 = arith.mulf %30, %34 : vector<8x128xf32>
    %c1_i32 = arith.constant 1 : i32
    %36 = arith.index_cast %c1_i32 : i32 to index
    %c0_12 = arith.constant 0 : index
    %c0_13 = arith.constant 0 : index
    %37 = vector.load %arg2[%36, %c0_12, %c0_13] : memref<8x8x512xf32, #tpu.memory_space<vmem>>, vector<1x8x512xf32>
    %38 = vector.shape_cast %37 : vector<1x8x512xf32> to vector<8x512xf32>
    %cst_14 = arith.constant dense<0.000000e+00> : vector<8x512xf32>
    %39 = tpu.matmul %35, %3, %cst_14 {dimension_numbers = #tpu.dot_dimension_numbers<[1], [0], [0], [1], [0, 0, 1, 1], [], []>} : vector<8x128xf32>, vector<128x512xf32>, vector<8x512xf32> -> vector<8x512xf32>
    %40 = arith.addf %38, %39 : vector<8x512xf32>
    %41 = vector.extract_strided_slice %40 {offsets = [0, 0], sizes = [8, 128], strides = [1, 1]} : vector<8x512xf32> to vector<8x128xf32>
    %42 = arith.negf %41 : vector<8x128xf32>
    %43 = math.exp %42 : vector<8x128xf32>
    %cst_15 = arith.constant 1.000000e+00 : f32
    %44 = vector.broadcast %cst_15 : f32 to vector<8x128xf32>
    %45 = arith.addf %44, %43 : vector<8x128xf32>
    %46 = arith.divf %44, %45 : vector<8x128xf32>
    %47 = vector.extract_strided_slice %40 {offsets = [0, 128], sizes = [8, 128], strides = [1, 1]} : vector<8x512xf32> to vector<8x128xf32>
    %48 = arith.negf %47 : vector<8x128xf32>
    %49 = math.exp %48 : vector<8x128xf32>
    %cst_16 = arith.constant 1.000000e+00 : f32
    %50 = vector.broadcast %cst_16 : f32 to vector<8x128xf32>
    %51 = arith.addf %50, %49 : vector<8x128xf32>
    %52 = arith.divf %50, %51 : vector<8x128xf32>
    %53 = vector.extract_strided_slice %40 {offsets = [0, 256], sizes = [8, 128], strides = [1, 1]} : vector<8x512xf32> to vector<8x128xf32>
    %54 = math.tanh %53 : vector<8x128xf32>
    %55 = vector.extract_strided_slice %40 {offsets = [0, 384], sizes = [8, 128], strides = [1, 1]} : vector<8x512xf32> to vector<8x128xf32>
    %56 = arith.negf %55 : vector<8x128xf32>
    %57 = math.exp %56 : vector<8x128xf32>
    %cst_17 = arith.constant 1.000000e+00 : f32
    %58 = vector.broadcast %cst_17 : f32 to vector<8x128xf32>
    %59 = arith.addf %58, %57 : vector<8x128xf32>
    %60 = arith.divf %58, %59 : vector<8x128xf32>
    %61 = arith.mulf %52, %33 : vector<8x128xf32>
    %62 = arith.mulf %46, %54 : vector<8x128xf32>
    %63 = arith.addf %61, %62 : vector<8x128xf32>
    %64 = math.tanh %63 : vector<8x128xf32>
    %65 = arith.mulf %60, %64 : vector<8x128xf32>
    %c2_i32 = arith.constant 2 : i32
    %66 = arith.index_cast %c2_i32 : i32 to index
    %c0_18 = arith.constant 0 : index
    %c0_19 = arith.constant 0 : index
    %67 = vector.load %arg2[%66, %c0_18, %c0_19] : memref<8x8x512xf32, #tpu.memory_space<vmem>>, vector<1x8x512xf32>
    %68 = vector.shape_cast %67 : vector<1x8x512xf32> to vector<8x512xf32>
    %cst_20 = arith.constant dense<0.000000e+00> : vector<8x512xf32>
    %69 = tpu.matmul %65, %3, %cst_20 {dimension_numbers = #tpu.dot_dimension_numbers<[1], [0], [0], [1], [0, 0, 1, 1], [], []>} : vector<8x128xf32>, vector<128x512xf32>, vector<8x512xf32> -> vector<8x512xf32>
    %70 = arith.addf %68, %69 : vector<8x512xf32>
    %71 = vector.extract_strided_slice %70 {offsets = [0, 0], sizes = [8, 128], strides = [1, 1]} : vector<8x512xf32> to vector<8x128xf32>
    %72 = arith.negf %71 : vector<8x128xf32>
    %73 = math.exp %72 : vector<8x128xf32>
    %cst_21 = arith.constant 1.000000e+00 : f32
    %74 = vector.broadcast %cst_21 : f32 to vector<8x128xf32>
    %75 = arith.addf %74, %73 : vector<8x128xf32>
    %76 = arith.divf %74, %75 : vector<8x128xf32>
    %77 = vector.extract_strided_slice %70 {offsets = [0, 128], sizes = [8, 128], strides = [1, 1]} : vector<8x512xf32> to vector<8x128xf32>
    %78 = arith.negf %77 : vector<8x128xf32>
    %79 = math.exp %78 : vector<8x128xf32>
    %cst_22 = arith.constant 1.000000e+00 : f32
    %80 = vector.broadcast %cst_22 : f32 to vector<8x128xf32>
    %81 = arith.addf %80, %79 : vector<8x128xf32>
    %82 = arith.divf %80, %81 : vector<8x128xf32>
    %83 = vector.extract_strided_slice %70 {offsets = [0, 256], sizes = [8, 128], strides = [1, 1]} : vector<8x512xf32> to vector<8x128xf32>
    %84 = math.tanh %83 : vector<8x128xf32>
    %85 = vector.extract_strided_slice %70 {offsets = [0, 384], sizes = [8, 128], strides = [1, 1]} : vector<8x512xf32> to vector<8x128xf32>
    %86 = arith.negf %85 : vector<8x128xf32>
    %87 = math.exp %86 : vector<8x128xf32>
    %cst_23 = arith.constant 1.000000e+00 : f32
    %88 = vector.broadcast %cst_23 : f32 to vector<8x128xf32>
    %89 = arith.addf %88, %87 : vector<8x128xf32>
    %90 = arith.divf %88, %89 : vector<8x128xf32>
    %91 = arith.mulf %82, %63 : vector<8x128xf32>
    %92 = arith.mulf %76, %84 : vector<8x128xf32>
    %93 = arith.addf %91, %92 : vector<8x128xf32>
    %94 = math.tanh %93 : vector<8x128xf32>
    %95 = arith.mulf %90, %94 : vector<8x128xf32>
    %c3_i32 = arith.constant 3 : i32
    %96 = arith.index_cast %c3_i32 : i32 to index
    %c0_24 = arith.constant 0 : index
    %c0_25 = arith.constant 0 : index
    %97 = vector.load %arg2[%96, %c0_24, %c0_25] : memref<8x8x512xf32, #tpu.memory_space<vmem>>, vector<1x8x512xf32>
    %98 = vector.shape_cast %97 : vector<1x8x512xf32> to vector<8x512xf32>
    %cst_26 = arith.constant dense<0.000000e+00> : vector<8x512xf32>
    %99 = tpu.matmul %95, %3, %cst_26 {dimension_numbers = #tpu.dot_dimension_numbers<[1], [0], [0], [1], [0, 0, 1, 1], [], []>} : vector<8x128xf32>, vector<128x512xf32>, vector<8x512xf32> -> vector<8x512xf32>
    %100 = arith.addf %98, %99 : vector<8x512xf32>
    %101 = vector.extract_strided_slice %100 {offsets = [0, 0], sizes = [8, 128], strides = [1, 1]} : vector<8x512xf32> to vector<8x128xf32>
    %102 = arith.negf %101 : vector<8x128xf32>
    %103 = math.exp %102 : vector<8x128xf32>
    %cst_27 = arith.constant 1.000000e+00 : f32
    %104 = vector.broadcast %cst_27 : f32 to vector<8x128xf32>
    %105 = arith.addf %104, %103 : vector<8x128xf32>
    %106 = arith.divf %104, %105 : vector<8x128xf32>
    %107 = vector.extract_strided_slice %100 {offsets = [0, 128], sizes = [8, 128], strides = [1, 1]} : vector<8x512xf32> to vector<8x128xf32>
    %108 = arith.negf %107 : vector<8x128xf32>
    %109 = math.exp %108 : vector<8x128xf32>
    %cst_28 = arith.constant 1.000000e+00 : f32
    %110 = vector.broadcast %cst_28 : f32 to vector<8x128xf32>
    %111 = arith.addf %110, %109 : vector<8x128xf32>
    %112 = arith.divf %110, %111 : vector<8x128xf32>
    %113 = vector.extract_strided_slice %100 {offsets = [0, 256], sizes = [8, 128], strides = [1, 1]} : vector<8x512xf32> to vector<8x128xf32>
    %114 = math.tanh %113 : vector<8x128xf32>
    %115 = vector.extract_strided_slice %100 {offsets = [0, 384], sizes = [8, 128], strides = [1, 1]} : vector<8x512xf32> to vector<8x128xf32>
    %116 = arith.negf %115 : vector<8x128xf32>
    %117 = math.exp %116 : vector<8x128xf32>
    %cst_29 = arith.constant 1.000000e+00 : f32
    %118 = vector.broadcast %cst_29 : f32 to vector<8x128xf32>
    %119 = arith.addf %118, %117 : vector<8x128xf32>
    %120 = arith.divf %118, %119 : vector<8x128xf32>
    %121 = arith.mulf %112, %93 : vector<8x128xf32>
    %122 = arith.mulf %106, %114 : vector<8x128xf32>
    %123 = arith.addf %121, %122 : vector<8x128xf32>
    %124 = math.tanh %123 : vector<8x128xf32>
    %125 = arith.mulf %120, %124 : vector<8x128xf32>
    %c4_i32 = arith.constant 4 : i32
    %126 = arith.index_cast %c4_i32 : i32 to index
    %c0_30 = arith.constant 0 : index
    %c0_31 = arith.constant 0 : index
    %127 = vector.load %arg2[%126, %c0_30, %c0_31] : memref<8x8x512xf32, #tpu.memory_space<vmem>>, vector<1x8x512xf32>
    %128 = vector.shape_cast %127 : vector<1x8x512xf32> to vector<8x512xf32>
    %cst_32 = arith.constant dense<0.000000e+00> : vector<8x512xf32>
    %129 = tpu.matmul %125, %3, %cst_32 {dimension_numbers = #tpu.dot_dimension_numbers<[1], [0], [0], [1], [0, 0, 1, 1], [], []>} : vector<8x128xf32>, vector<128x512xf32>, vector<8x512xf32> -> vector<8x512xf32>
    %130 = arith.addf %128, %129 : vector<8x512xf32>
    %131 = vector.extract_strided_slice %130 {offsets = [0, 0], sizes = [8, 128], strides = [1, 1]} : vector<8x512xf32> to vector<8x128xf32>
    %132 = arith.negf %131 : vector<8x128xf32>
    %133 = math.exp %132 : vector<8x128xf32>
    %cst_33 = arith.constant 1.000000e+00 : f32
    %134 = vector.broadcast %cst_33 : f32 to vector<8x128xf32>
    %135 = arith.addf %134, %133 : vector<8x128xf32>
    %136 = arith.divf %134, %135 : vector<8x128xf32>
    %137 = vector.extract_strided_slice %130 {offsets = [0, 128], sizes = [8, 128], strides = [1, 1]} : vector<8x512xf32> to vector<8x128xf32>
    %138 = arith.negf %137 : vector<8x128xf32>
    %139 = math.exp %138 : vector<8x128xf32>
    %cst_34 = arith.constant 1.000000e+00 : f32
    %140 = vector.broadcast %cst_34 : f32 to vector<8x128xf32>
    %141 = arith.addf %140, %139 : vector<8x128xf32>
    %142 = arith.divf %140, %141 : vector<8x128xf32>
    %143 = vector.extract_strided_slice %130 {offsets = [0, 256], sizes = [8, 128], strides = [1, 1]} : vector<8x512xf32> to vector<8x128xf32>
    %144 = math.tanh %143 : vector<8x128xf32>
    %145 = vector.extract_strided_slice %130 {offsets = [0, 384], sizes = [8, 128], strides = [1, 1]} : vector<8x512xf32> to vector<8x128xf32>
    %146 = arith.negf %145 : vector<8x128xf32>
    %147 = math.exp %146 : vector<8x128xf32>
    %cst_35 = arith.constant 1.000000e+00 : f32
    %148 = vector.broadcast %cst_35 : f32 to vector<8x128xf32>
    %149 = arith.addf %148, %147 : vector<8x128xf32>
    %150 = arith.divf %148, %149 : vector<8x128xf32>
    %151 = arith.mulf %142, %123 : vector<8x128xf32>
    %152 = arith.mulf %136, %144 : vector<8x128xf32>
    %153 = arith.addf %151, %152 : vector<8x128xf32>
    %154 = math.tanh %153 : vector<8x128xf32>
    %155 = arith.mulf %150, %154 : vector<8x128xf32>
    %c5_i32 = arith.constant 5 : i32
    %156 = arith.index_cast %c5_i32 : i32 to index
    %c0_36 = arith.constant 0 : index
    %c0_37 = arith.constant 0 : index
    %157 = vector.load %arg2[%156, %c0_36, %c0_37] : memref<8x8x512xf32, #tpu.memory_space<vmem>>, vector<1x8x512xf32>
    %158 = vector.shape_cast %157 : vector<1x8x512xf32> to vector<8x512xf32>
    %cst_38 = arith.constant dense<0.000000e+00> : vector<8x512xf32>
    %159 = tpu.matmul %155, %3, %cst_38 {dimension_numbers = #tpu.dot_dimension_numbers<[1], [0], [0], [1], [0, 0, 1, 1], [], []>} : vector<8x128xf32>, vector<128x512xf32>, vector<8x512xf32> -> vector<8x512xf32>
    %160 = arith.addf %158, %159 : vector<8x512xf32>
    %161 = vector.extract_strided_slice %160 {offsets = [0, 0], sizes = [8, 128], strides = [1, 1]} : vector<8x512xf32> to vector<8x128xf32>
    %162 = arith.negf %161 : vector<8x128xf32>
    %163 = math.exp %162 : vector<8x128xf32>
    %cst_39 = arith.constant 1.000000e+00 : f32
    %164 = vector.broadcast %cst_39 : f32 to vector<8x128xf32>
    %165 = arith.addf %164, %163 : vector<8x128xf32>
    %166 = arith.divf %164, %165 : vector<8x128xf32>
    %167 = vector.extract_strided_slice %160 {offsets = [0, 128], sizes = [8, 128], strides = [1, 1]} : vector<8x512xf32> to vector<8x128xf32>
    %168 = arith.negf %167 : vector<8x128xf32>
    %169 = math.exp %168 : vector<8x128xf32>
    %cst_40 = arith.constant 1.000000e+00 : f32
    %170 = vector.broadcast %cst_40 : f32 to vector<8x128xf32>
    %171 = arith.addf %170, %169 : vector<8x128xf32>
    %172 = arith.divf %170, %171 : vector<8x128xf32>
    %173 = vector.extract_strided_slice %160 {offsets = [0, 256], sizes = [8, 128], strides = [1, 1]} : vector<8x512xf32> to vector<8x128xf32>
    %174 = math.tanh %173 : vector<8x128xf32>
    %175 = vector.extract_strided_slice %160 {offsets = [0, 384], sizes = [8, 128], strides = [1, 1]} : vector<8x512xf32> to vector<8x128xf32>
    %176 = arith.negf %175 : vector<8x128xf32>
    %177 = math.exp %176 : vector<8x128xf32>
    %cst_41 = arith.constant 1.000000e+00 : f32
    %178 = vector.broadcast %cst_41 : f32 to vector<8x128xf32>
    %179 = arith.addf %178, %177 : vector<8x128xf32>
    %180 = arith.divf %178, %179 : vector<8x128xf32>
    %181 = arith.mulf %172, %153 : vector<8x128xf32>
    %182 = arith.mulf %166, %174 : vector<8x128xf32>
    %183 = arith.addf %181, %182 : vector<8x128xf32>
    %184 = math.tanh %183 : vector<8x128xf32>
    %185 = arith.mulf %180, %184 : vector<8x128xf32>
    %c6_i32 = arith.constant 6 : i32
    %186 = arith.index_cast %c6_i32 : i32 to index
    %c0_42 = arith.constant 0 : index
    %c0_43 = arith.constant 0 : index
    %187 = vector.load %arg2[%186, %c0_42, %c0_43] : memref<8x8x512xf32, #tpu.memory_space<vmem>>, vector<1x8x512xf32>
    %188 = vector.shape_cast %187 : vector<1x8x512xf32> to vector<8x512xf32>
    %cst_44 = arith.constant dense<0.000000e+00> : vector<8x512xf32>
    %189 = tpu.matmul %185, %3, %cst_44 {dimension_numbers = #tpu.dot_dimension_numbers<[1], [0], [0], [1], [0, 0, 1, 1], [], []>} : vector<8x128xf32>, vector<128x512xf32>, vector<8x512xf32> -> vector<8x512xf32>
    %190 = arith.addf %188, %189 : vector<8x512xf32>
    %191 = vector.extract_strided_slice %190 {offsets = [0, 0], sizes = [8, 128], strides = [1, 1]} : vector<8x512xf32> to vector<8x128xf32>
    %192 = arith.negf %191 : vector<8x128xf32>
    %193 = math.exp %192 : vector<8x128xf32>
    %cst_45 = arith.constant 1.000000e+00 : f32
    %194 = vector.broadcast %cst_45 : f32 to vector<8x128xf32>
    %195 = arith.addf %194, %193 : vector<8x128xf32>
    %196 = arith.divf %194, %195 : vector<8x128xf32>
    %197 = vector.extract_strided_slice %190 {offsets = [0, 128], sizes = [8, 128], strides = [1, 1]} : vector<8x512xf32> to vector<8x128xf32>
    %198 = arith.negf %197 : vector<8x128xf32>
    %199 = math.exp %198 : vector<8x128xf32>
    %cst_46 = arith.constant 1.000000e+00 : f32
    %200 = vector.broadcast %cst_46 : f32 to vector<8x128xf32>
    %201 = arith.addf %200, %199 : vector<8x128xf32>
    %202 = arith.divf %200, %201 : vector<8x128xf32>
    %203 = vector.extract_strided_slice %190 {offsets = [0, 256], sizes = [8, 128], strides = [1, 1]} : vector<8x512xf32> to vector<8x128xf32>
    %204 = math.tanh %203 : vector<8x128xf32>
    %205 = vector.extract_strided_slice %190 {offsets = [0, 384], sizes = [8, 128], strides = [1, 1]} : vector<8x512xf32> to vector<8x128xf32>
    %206 = arith.negf %205 : vector<8x128xf32>
    %207 = math.exp %206 : vector<8x128xf32>
    %cst_47 = arith.constant 1.000000e+00 : f32
    %208 = vector.broadcast %cst_47 : f32 to vector<8x128xf32>
    %209 = arith.addf %208, %207 : vector<8x128xf32>
    %210 = arith.divf %208, %209 : vector<8x128xf32>
    %211 = arith.mulf %202, %183 : vector<8x128xf32>
    %212 = arith.mulf %196, %204 : vector<8x128xf32>
    %213 = arith.addf %211, %212 : vector<8x128xf32>
    %214 = math.tanh %213 : vector<8x128xf32>
    %215 = arith.mulf %210, %214 : vector<8x128xf32>
    %c7_i32 = arith.constant 7 : i32
    %216 = arith.index_cast %c7_i32 : i32 to index
    %c0_48 = arith.constant 0 : index
    %c0_49 = arith.constant 0 : index
    %217 = vector.load %arg2[%216, %c0_48, %c0_49] : memref<8x8x512xf32, #tpu.memory_space<vmem>>, vector<1x8x512xf32>
    %218 = vector.shape_cast %217 : vector<1x8x512xf32> to vector<8x512xf32>
    %cst_50 = arith.constant dense<0.000000e+00> : vector<8x512xf32>
    %219 = tpu.matmul %215, %3, %cst_50 {dimension_numbers = #tpu.dot_dimension_numbers<[1], [0], [0], [1], [0, 0, 1, 1], [], []>} : vector<8x128xf32>, vector<128x512xf32>, vector<8x512xf32> -> vector<8x512xf32>
    %220 = arith.addf %218, %219 : vector<8x512xf32>
    %221 = vector.extract_strided_slice %220 {offsets = [0, 0], sizes = [8, 128], strides = [1, 1]} : vector<8x512xf32> to vector<8x128xf32>
    %222 = arith.negf %221 : vector<8x128xf32>
    %223 = math.exp %222 : vector<8x128xf32>
    %cst_51 = arith.constant 1.000000e+00 : f32
    %224 = vector.broadcast %cst_51 : f32 to vector<8x128xf32>
    %225 = arith.addf %224, %223 : vector<8x128xf32>
    %226 = arith.divf %224, %225 : vector<8x128xf32>
    %227 = vector.extract_strided_slice %220 {offsets = [0, 128], sizes = [8, 128], strides = [1, 1]} : vector<8x512xf32> to vector<8x128xf32>
    %228 = arith.negf %227 : vector<8x128xf32>
    %229 = math.exp %228 : vector<8x128xf32>
    %cst_52 = arith.constant 1.000000e+00 : f32
    %230 = vector.broadcast %cst_52 : f32 to vector<8x128xf32>
    %231 = arith.addf %230, %229 : vector<8x128xf32>
    %232 = arith.divf %230, %231 : vector<8x128xf32>
    %233 = vector.extract_strided_slice %220 {offsets = [0, 256], sizes = [8, 128], strides = [1, 1]} : vector<8x512xf32> to vector<8x128xf32>
    %234 = math.tanh %233 : vector<8x128xf32>
    %235 = vector.extract_strided_slice %220 {offsets = [0, 384], sizes = [8, 128], strides = [1, 1]} : vector<8x512xf32> to vector<8x128xf32>
    %236 = arith.negf %235 : vector<8x128xf32>
    %237 = math.exp %236 : vector<8x128xf32>
    %cst_53 = arith.constant 1.000000e+00 : f32
    %238 = vector.broadcast %cst_53 : f32 to vector<8x128xf32>
    %239 = arith.addf %238, %237 : vector<8x128xf32>
    %240 = arith.divf %238, %239 : vector<8x128xf32>
    %241 = arith.mulf %232, %213 : vector<8x128xf32>
    %242 = arith.mulf %226, %234 : vector<8x128xf32>
    %243 = arith.addf %241, %242 : vector<8x128xf32>
    %244 = math.tanh %243 : vector<8x128xf32>
    %245 = arith.mulf %240, %244 : vector<8x128xf32>
    %c8_i32 = arith.constant 8 : i32
    %c0_54 = arith.constant 0 : index
    %c0_55 = arith.constant 0 : index
    %246 = vector.load %arg7[%c0_54, %c0_55] : memref<8x128xf32, #tpu.memory_space<vmem>>, vector<8x128xf32>
    tpu.vector_store %arg7[%c0_54, %c0_55], %245 {strides = array<i32>} : memref<8x128xf32, #tpu.memory_space<vmem>>, vector<8x128xf32>,
    %c0_56 = arith.constant 0 : index
    %c0_57 = arith.constant 0 : index
    %247 = vector.load %arg8[%c0_56, %c0_57] : memref<8x128xf32, #tpu.memory_space<vmem>>, vector<8x128xf32>
    tpu.vector_store %arg8[%c0_56, %c0_57], %243 {strides = array<i32>} : memref<8x128xf32, #tpu.memory_space<vmem>>, vector<8x128xf32>,
    %c0_i32_58 = arith.constant 0 : i32
    %248 = arith.cmpi eq, %arg1, %c0_i32_58 : i32
    %249 = arith.extui %248 : i1 to i32
    %c0_i32_59 = arith.constant 0 : i32
    %250 = arith.cmpi ne, %249, %c0_i32_59 : i32
    scf.if %250 {
      %c0_60 = arith.constant 0 : index
      %c0_61 = arith.constant 0 : index
      %251 = vector.load %arg4[%c0_60, %c0_61] : memref<128x128xf32, #tpu.memory_space<vmem>>, vector<128x128xf32>
      %cst_62 = arith.constant dense<0.000000e+00> : vector<8x128xf32>
      %252 = tpu.matmul %245, %251, %cst_62 {dimension_numbers = #tpu.dot_dimension_numbers<[1], [0], [0], [1], [0, 0, 1, 1], [], []>} : vector<8x128xf32>, vector<128x128xf32>, vector<8x128xf32> -> vector<8x128xf32>
      %c0_63 = arith.constant 0 : index
      %c0_64 = arith.constant 0 : index
      %253 = vector.load %arg5[%c0_63, %c0_64] : memref<1x128xf32, #tpu.memory_space<vmem>>, vector<1x128xf32>
      %254 = vector.broadcast %253 : vector<1x128xf32> to vector<8x128xf32>
      %255 = arith.addf %252, %254 : vector<8x128xf32>
      %c0_65 = arith.constant 0 : index
      %c0_66 = arith.constant 0 : index
      %256 = vector.load %arg6[%c0_65, %c0_66] : memref<8x128xf32, #tpu.memory_space<vmem>>, vector<8x128xf32>
      tpu.vector_store %arg6[%c0_65, %c0_66], %255 {strides = array<i32>} : memref<8x128xf32, #tpu.memory_space<vmem>>, vector<8x128xf32>,
    } else {
    }
    return
  }
  func.func @transform_0(%arg0: i32, %arg1: i32) -> (i32, i32, i32) {
    %c0_i32 = arith.constant 0 : i32
    %c0_i32_0 = arith.constant 0 : i32
    return %arg1, %arg0, %c0_i32 : i32, i32, i32
  }
  func.func @transform_1(%arg0: i32, %arg1: i32) -> (i32, i32) {
    %c0_i32 = arith.constant 0 : i32
    %c0_i32_0 = arith.constant 0 : i32
    %c0_i32_1 = arith.constant 0 : i32
    return %c0_i32, %c0_i32_0 : i32, i32
  }
  func.func @transform_2(%arg0: i32, %arg1: i32) -> (i32, i32) {
    %c0_i32 = arith.constant 0 : i32
    %c0_i32_0 = arith.constant 0 : i32
    %c0_i32_1 = arith.constant 0 : i32
    return %c0_i32, %c0_i32_0 : i32, i32
  }
  func.func @transform_3(%arg0: i32, %arg1: i32) -> (i32, i32) {
    %c0_i32 = arith.constant 0 : i32
    %c0_i32_0 = arith.constant 0 : i32
    %c0_i32_1 = arith.constant 0 : i32
    return %c0_i32, %c0_i32_0 : i32, i32
  }
  func.func @transform_4(%arg0: i32, %arg1: i32) -> (i32, i32) {
    %c0_i32 = arith.constant 0 : i32
    %c0_i32_0 = arith.constant 0 : i32
    return %arg0, %c0_i32 : i32, i32
  }
}

</mosaic_0001>

<bundles_post_ra>
// kernel: lstm_model_forward.4
= control target key start
LH: loop header
LB: loop body
LE: loop exit
PB: predicated region body
PF: predicated region fallthrough
CT: control target
= control target key end

     0   :  { %v356_v3 = vmov 0.0   ;;  %vm52_vm0 = vcmask 130048   ;;  %v32_v17 = vlaneseq  ;;  %s580_s1 = inlined_call_operand.vmem [shape: f32[16,512], index: 1, kind: input, shape index: {}]   ;;  %s581_s0 = inlined_call_operand.vmem [shape: f32[8,8,16], index: 0, kind: input, shape index: {}]   ;;  %s582_s2 = inlined_call_operand.vmem [shape: f32[1,512], index: 2, kind: input, shape index: {}]   ;;  %s583_s3 = inlined_call_operand.vmem [shape: f32[8,8,512], index: 3, kind: output, shape index: {}]  }
   0x1   :  { %v19_v0 = vld [vmem:[%s580_s1 + $0x28] sm:$0xff]  ;;  %v21_v1 = vld [vmem:[%s580_s1 + $0x38] sm:$0xff]  ;;  %v18_v2 = vld [vmem:[%s580_s1 + $0x20] sm:$0xff]  ;;  %141 = vmatprep.mubr.f32.mxu0 %v356_v3  ;;  %254 = vmatprep.mubr.f32.mxu1 %v356_v3 }
   0x2   :  { %105 = vmatprep.subr.mxu0 %v19_v0  ;;  %218 = vmatprep.subr.mxu1 %v21_v1  ;;  %v20_v4 = vld [vmem:[%s580_s1 + $0x30] sm:$0xff]  ;;  %v15_v5 = vld [vmem:[%s580_s1 + $0x8] sm:$0xff]  ;;  %v17_v6 = vld [vmem:[%s580_s1 + $0x18] sm:$0xff]  ;;  %v33_v18 = vshrl.u32 %v32_v17, 7 }
   0x3   :  { %106 = vmatpush1.msra.mxu0 %v18_v2  ;;  %219 = vmatpush1.msra.mxu1 %v20_v4  ;;  %v14_v7 = vld [vmem:[%s580_s1] sm:$0xff]  ;;  %v16_v8 = vld [vmem:[%s580_s1 + $0x10] sm:$0xff]  ;;  %v23_v10 = vld [vmem:[%s581_s0 + $0x8] sm:$0xff] }
   0x4   :  { %v22_v9 = vld [vmem:[%s581_s0] sm:$0xff]  ;;  %107 = vmatprep.subr.mxu0 %v15_v5  ;;  %220 = vmatprep.subr.mxu1 %v17_v6  ;;  %v24_v11 = vld [vmem:[%s581_s0 + $0x10] sm:$0xff]  ;;  %v25_v12 = vld [vmem:[%s581_s0 + $0x18] sm:$0xff]  ;;  %v34_v19 = vsub.s32 0, %v33_v18  ;;  %v42_v20 = vsub.s32 2, %v33_v18  ;;  %v38_v22 = vsub.s32 1, %v33_v18 }
   0x5   :  { %108 = vmatpush1.msra.mxu0 %v14_v7  ;;  %221 = vmatpush1.msra.mxu1 %v16_v8  ;;  %v26_v13 = vld [vmem:[%s581_s0 + $0x20] sm:$0xff]  ;;  %v27_v14 = vld [vmem:[%s581_s0 + $0x28] sm:$0xff]  ;;  %v28_v15 = vld [vmem:[%s581_s0 + $0x30] sm:$0xff]  ;;  %v46_v23 = vsub.s32 3, %v33_v18 }
   0x6   :  { %339 = vmatmul.mubr.msk.f32.vlgmr.msra.gmra.mxu0 %vm52_vm0, %v22_v9  ;;  %347 = vmatmul.mubr.msk.f32.vlgmr.msra.gmra.mxu1 %vm52_vm0, %v22_v9  ;;  %v29_v16 = vld [vmem:[%s581_s0 + $0x38] sm:$0xff]  ;;  %v30_v21 = vld [vmem:[%s582_s2] sm:$0xf] }
   0x7   :  { %147 = vmatprep.mubr.f32.mxu0 %v356_v3  ;;  %260 = vmatprep.mubr.f32.mxu1 %v356_v3  ;;  %v444_v24 = vrot.slane %v30_v21, %v34_v19  ;;  %v446_v25 = vrot.slane %v30_v21, %v42_v20  ;;  %v448_v26 = vrot.slane %v30_v21, %v38_v22 }
   0x8   :  { %v450_v27 = vrot.slane %v30_v21, %v46_v23 }
   0xa   :  { %340 = vmatmul.mubr.msk.f32.gmra.mxu0 %vm52_vm0, %v23_v10  ;;  %348 = vmatmul.mubr.msk.f32.gmra.mxu1 %vm52_vm0, %v23_v10 }
   0xb   :  { %153 = vmatprep.mubr.f32.mxu0 %v356_v3  ;;  %266 = vmatprep.mubr.f32.mxu1 %v356_v3 }
   0xe   :  { %341 = vmatmul.mubr.msk.f32.gmra.mxu0 %vm52_vm0, %v24_v11  ;;  %349 = vmatmul.mubr.msk.f32.gmra.mxu1 %vm52_vm0, %v24_v11 }
   0xf   :  { %159 = vmatprep.mubr.f32.mxu0 %v356_v3  ;;  %272 = vmatprep.mubr.f32.mxu1 %v356_v3 }
  0x12   :  { %342 = vmatmul.mubr.msk.f32.gmra.mxu0 %vm52_vm0, %v25_v12  ;;  %350 = vmatmul.mubr.msk.f32.gmra.mxu1 %vm52_vm0, %v25_v12 }
  0x13   :  { %165 = vmatprep.mubr.f32.mxu0 %v356_v3  ;;  %278 = vmatprep.mubr.f32.mxu1 %v356_v3 }
  0x16   :  { %343 = vmatmul.mubr.msk.f32.gmra.mxu0 %vm52_vm0, %v26_v13  ;;  %351 = vmatmul.mubr.msk.f32.gmra.mxu1 %vm52_vm0, %v26_v13 }
  0x17   :  { %171 = vmatprep.mubr.f32.mxu0 %v356_v3  ;;  %284 = vmatprep.mubr.f32.mxu1 %v356_v3 }
  0x1a   :  { %344 = vmatmul.mubr.msk.f32.gmra.mxu0 %vm52_vm0, %v27_v14  ;;  %352 = vmatmul.mubr.msk.f32.gmra.mxu1 %vm52_vm0, %v27_v14 }
  0x1b   :  { %177 = vmatprep.mubr.f32.mxu0 %v356_v3  ;;  %290 = vmatprep.mubr.f32.mxu1 %v356_v3 }
  0x1e   :  { %345 = vmatmul.mubr.msk.f32.gmra.mxu0 %vm52_vm0, %v28_v15  ;;  %353 = vmatmul.mubr.msk.f32.gmra.mxu1 %vm52_vm0, %v28_v15 }
  0x1f   :  { %183 = vmatprep.mubr.f32.mxu0 %v356_v3  ;;  %296 = vmatprep.mubr.f32.mxu1 %v356_v3 }
  0x22   :  { %346 = vmatmul.mubr.msk.f32.gmra.mxu0 %vm52_vm0, %v29_v16  ;;  %354 = vmatmul.mubr.msk.f32.gmra.mxu1 %vm52_vm0, %v29_v16 }
  0xc6   :  { %v143_v28 = vpop.f32.mrf.mxu0  ;;  %v256_v29 = vpop.f32.mrf.mxu1 }
  0xc7   :  { %v144_v30 = vadd.f32 %v143_v28, %v444_v24  ;;  %v257_v31 = vadd.f32 %v256_v29, %v446_v25 }
  0xc8   :  { %v145_v32 = vpop.f32.mrf.mxu0  ;;  %v258_v33 = vpop.f32.mrf.mxu1 }
  0xc9   :  { %303 = vst [vmem:[%s583_s3] sm:$0xff] %v144_v30  ;;  %305 = vst [vmem:[%s583_s3 + $0x10] sm:$0xff] %v257_v31  ;;  %v146_v34 = vadd.f32 %v145_v32, %v448_v26  ;;  %v259_v35 = vadd.f32 %v258_v33, %v450_v27 }
  0xca   :  { %v149_v36 = vpop.f32.mrf.mxu0  ;;  %v262_v37 = vpop.f32.mrf.mxu1 }
  0xcb   :  { %304 = vst [vmem:[%s583_s3 + $0x8] sm:$0xff] %v146_v34  ;;  %306 = vst [vmem:[%s583_s3 + $0x18] sm:$0xff] %v259_v35  ;;  %v150_v38 = vadd.f32 %v149_v36, %v444_v24  ;;  %v263_v39 = vadd.f32 %v262_v37, %v446_v25 }
  0xcc   :  { %v151_v40 = vpop.f32.mrf.mxu0  ;;  %v264_v41 = vpop.f32.mrf.mxu1 }
  0xcd   :  { %307 = vst [vmem:[%s583_s3 + $0x20] sm:$0xff] %v150_v38  ;;  %309 = vst [vmem:[%s583_s3 + $0x30] sm:$0xff] %v263_v39  ;;  %v152_v42 = vadd.f32 %v151_v40, %v448_v26  ;;  %v265_v43 = vadd.f32 %v264_v41, %v450_v27 }
  0xce   :  { %v155_v44 = vpop.f32.mrf.mxu0  ;;  %v268_v45 = vpop.f32.mrf.mxu1 }
  0xcf   :  { %308 = vst [vmem:[%s583_s3 + $0x28] sm:$0xff] %v152_v42  ;;  %310 = vst [vmem:[%s583_s3 + $0x38] sm:$0xff] %v265_v43  ;;  %v156_v46 = vadd.f32 %v155_v44, %v444_v24  ;;  %v269_v47 = vadd.f32 %v268_v45, %v446_v25 }
  0xd0   :  { %v157_v48 = vpop.f32.mrf.mxu0  ;;  %v270_v49 = vpop.f32.mrf.mxu1 }
  0xd1   :  { %311 = vst [vmem:[%s583_s3 + $0x40] sm:$0xff] %v156_v46  ;;  %313 = vst [vmem:[%s583_s3 + $0x50] sm:$0xff] %v269_v47  ;;  %v158_v50 = vadd.f32 %v157_v48, %v448_v26  ;;  %v271_v51 = vadd.f32 %v270_v49, %v450_v27 }
  0xd2   :  { %v161_v52 = vpop.f32.mrf.mxu0  ;;  %v274_v53 = vpop.f32.mrf.mxu1 }
  0xd3   :  { %312 = vst [vmem:[%s583_s3 + $0x48] sm:$0xff] %v158_v50  ;;  %314 = vst [vmem:[%s583_s3 + $0x58] sm:$0xff] %v271_v51  ;;  %v162_v54 = vadd.f32 %v161_v52, %v444_v24  ;;  %v275_v55 = vadd.f32 %v274_v53, %v446_v25 }
  0xd4   :  { %v163_v56 = vpop.f32.mrf.mxu0  ;;  %v276_v57 = vpop.f32.mrf.mxu1 }
  0xd5   :  { %315 = vst [vmem:[%s583_s3 + $0x60] sm:$0xff] %v162_v54  ;;  %317 = vst [vmem:[%s583_s3 + $0x70] sm:$0xff] %v275_v55  ;;  %v164_v58 = vadd.f32 %v163_v56, %v448_v26  ;;  %v277_v59 = vadd.f32 %v276_v57, %v450_v27 }
  0xd6   :  { %v167_v60 = vpop.f32.mrf.mxu0  ;;  %v280_v61 = vpop.f32.mrf.mxu1 }
  0xd7   :  { %316 = vst [vmem:[%s583_s3 + $0x68] sm:$0xff] %v164_v58  ;;  %318 = vst [vmem:[%s583_s3 + $0x78] sm:$0xff] %v277_v59  ;;  %v168_v62 = vadd.f32 %v167_v60, %v444_v24  ;;  %v281_v63 = vadd.f32 %v280_v61, %v446_v25 }
  0xd8   :  { %v169_v0 = vpop.f32.mrf.mxu0  ;;  %v282_v1 = vpop.f32.mrf.mxu1 }
  0xd9   :  { %319 = vst [vmem:[%s583_s3 + $0x80] sm:$0xff] %v168_v62  ;;  %321 = vst [vmem:[%s583_s3 + $0x90] sm:$0xff] %v281_v63  ;;  %v170_v2 = vadd.f32 %v169_v0, %v448_v26  ;;  %v283_v3 = vadd.f32 %v282_v1, %v450_v27 }
  0xda   :  { %v173_v4 = vpop.f32.mrf.mxu0  ;;  %v286_v5 = vpop.f32.mrf.mxu1 }
  0xdb   :  { %320 = vst [vmem:[%s583_s3 + $0x88] sm:$0xff] %v170_v2  ;;  %322 = vst [vmem:[%s583_s3 + $0x98] sm:$0xff] %v283_v3  ;;  %v174_v6 = vadd.f32 %v173_v4, %v444_v24  ;;  %v287_v7 = vadd.f32 %v286_v5, %v446_v25 }
  0xdc   :  { %v175_v8 = vpop.f32.mrf.mxu0  ;;  %v288_v9 = vpop.f32.mrf.mxu1 }
  0xdd   :  { %323 = vst [vmem:[%s583_s3 + $0xa0] sm:$0xff] %v174_v6  ;;  %325 = vst [vmem:[%s583_s3 + $0xb0] sm:$0xff] %v287_v7  ;;  %v176_v10 = vadd.f32 %v175_v8, %v448_v26  ;;  %v289_v11 = vadd.f32 %v288_v9, %v450_v27 }
  0xde   :  { %v179_v12 = vpop.f32.mrf.mxu0  ;;  %v292_v13 = vpop.f32.mrf.mxu1 }
  0xdf   :  { %324 = vst [vmem:[%s583_s3 + $0xa8] sm:$0xff] %v176_v10  ;;  %326 = vst [vmem:[%s583_s3 + $0xb8] sm:$0xff] %v289_v11  ;;  %v180_v14 = vadd.f32 %v179_v12, %v444_v24  ;;  %v293_v15 = vadd.f32 %v292_v13, %v446_v25 }
  0xe0   :  { %v181_v16 = vpop.f32.mrf.mxu0  ;;  %v294_v17 = vpop.f32.mrf.mxu1 }
  0xe1   :  { %327 = vst [vmem:[%s583_s3 + $0xc0] sm:$0xff] %v180_v14  ;;  %329 = vst [vmem:[%s583_s3 + $0xd0] sm:$0xff] %v293_v15  ;;  %v182_v18 = vadd.f32 %v181_v16, %v448_v26  ;;  %v295_v19 = vadd.f32 %v294_v17, %v450_v27 }
  0xe2   :  { %v185_v20 = vpop.f32.mrf.mxu0  ;;  %v298_v21 = vpop.f32.mrf.mxu1 }
  0xe3   :  { %328 = vst [vmem:[%s583_s3 + $0xc8] sm:$0xff] %v182_v18  ;;  %330 = vst [vmem:[%s583_s3 + $0xd8] sm:$0xff] %v295_v19  ;;  %v186_v22 = vadd.f32 %v185_v20, %v444_v24  ;;  %v299_v23 = vadd.f32 %v298_v21, %v446_v25 }
  0xe4   :  { %v187_v28 = vpop.f32.mrf.mxu0  ;;  %v300_v29 = vpop.f32.mrf.mxu1 }
  0xe5   :  { %331 = vst [vmem:[%s583_s3 + $0xe0] sm:$0xff] %v186_v22  ;;  %333 = vst [vmem:[%s583_s3 + $0xf0] sm:$0xff] %v299_v23  ;;  %v188_v30 = vadd.f32 %v187_v28, %v448_v26  ;;  %v301_v31 = vadd.f32 %v300_v29, %v450_v27 }
  0xe7   :  { %332 = vst [vmem:[%s583_s3 + $0xe8] sm:$0xff] %v188_v30  ;;  %334 = vst [vmem:[%s583_s3 + $0xf8] sm:$0xff] %v301_v31 }

// kernel: lstm_model_forward.6
= control target key start
LH: loop header
LB: loop body
LE: loop exit
PB: predicated region body
PF: predicated region fallthrough
CT: control target
= control target key end

     0   :  { %v371_v3 = vmov 0.0   ;;  %s763_s1 = inlined_call_operand.vmem [shape: f32[128,512], index: 1, kind: input, shape index: {}]   ;;  %s764_s0 = inlined_call_operand.vmem [shape: f32[8,8,128], index: 0, kind: input, shape index: {}]   ;;  %s765_s2 = inlined_call_operand.vmem [shape: f32[1,512], index: 2, kind: input, shape index: {}]   ;;  %s766_s3 = inlined_call_operand.vmem [shape: f32[8,8,512], index: 3, kind: output, shape index: {}]  }
   0x1   :  { %v75_v0 = vld [vmem:[%s763_s1 + $0x1e8] sm:$0xff]  ;;  %v77_v1 = vld [vmem:[%s763_s1 + $0x1f8] sm:$0xff]  ;;  %v74_v2 = vld [vmem:[%s763_s1 + $0x1e0] sm:$0xff]  ;;  %172 = vmatprep.mubr.f32.mxu0 %v371_v3  ;;  %285 = vmatprep.mubr.f32.mxu1 %v371_v3 }
   0x2   :  { %108 = vmatprep.subr.mxu0 %v75_v0  ;;  %221 = vmatprep.subr.mxu1 %v77_v1  ;;  %v76_v4 = vld [vmem:[%s763_s1 + $0x1f0] sm:$0xff]  ;;  %v71_v5 = vld [vmem:[%s763_s1 + $0x1c8] sm:$0xff]  ;;  %v73_v6 = vld [vmem:[%s763_s1 + $0x1d8] sm:$0xff] }
   0x3   :  { %109 = vmatpush1.msra.mxu0 %v74_v2  ;;  %222 = vmatpush1.msra.mxu1 %v76_v4  ;;  %v70_v7 = vld [vmem:[%s763_s1 + $0x1c0] sm:$0xff]  ;;  %v72_v8 = vld [vmem:[%s763_s1 + $0x1d0] sm:$0xff]  ;;  %v67_v9 = vld [vmem:[%s763_s1 + $0x1a8] sm:$0xff] }
   0x4   :  { %110 = vmatprep.subr.mxu0 %v71_v5  ;;  %223 = vmatprep.subr.mxu1 %v73_v6  ;;  %v69_v10 = vld [vmem:[%s763_s1 + $0x1b8] sm:$0xff]  ;;  %v66_v11 = vld [vmem:[%s763_s1 + $0x1a0] sm:$0xff]  ;;  %v68_v12 = vld [vmem:[%s763_s1 + $0x1b0] sm:$0xff] }
   0x5   :  { %111 = vmatpush1.msra.mxu0 %v70_v7  ;;  %224 = vmatpush1.msra.mxu1 %v72_v8  ;;  %v63_v13 = vld [vmem:[%s763_s1 + $0x188] sm:$0xff]  ;;  %v65_v14 = vld [vmem:[%s763_s1 + $0x198] sm:$0xff]  ;;  %v62_v15 = vld [vmem:[%s763_s1 + $0x180] sm:$0xff] }
   0x6   :  { %112 = vmatprep.subr.mxu0 %v67_v9  ;;  %225 = vmatprep.subr.mxu1 %v69_v10  ;;  %v64_v16 = vld [vmem:[%s763_s1 + $0x190] sm:$0xff]  ;;  %v59_v17 = vld [vmem:[%s763_s1 + $0x168] sm:$0xff]  ;;  %v61_v18 = vld [vmem:[%s763_s1 + $0x178] sm:$0xff]  ;;  %v88_v10 = vlaneseq }
   0x7   :  { %113 = vmatpush1.msra.mxu0 %v66_v11  ;;  %226 = vmatpush1.msra.mxu1 %v68_v12  ;;  %v58_v19 = vld [vmem:[%s763_s1 + $0x160] sm:$0xff]  ;;  %v60_v20 = vld [vmem:[%s763_s1 + $0x170] sm:$0xff]  ;;  %v55_v21 = vld [vmem:[%s763_s1 + $0x148] sm:$0xff] }
   0x8   :  { %114 = vmatprep.subr.mxu0 %v63_v13  ;;  %227 = vmatprep.subr.mxu1 %v65_v14  ;;  %v57_v22 = vld [vmem:[%s763_s1 + $0x158] sm:$0xff]  ;;  %v54_v23 = vld [vmem:[%s763_s1 + $0x140] sm:$0xff]  ;;  %v56_v24 = vld [vmem:[%s763_s1 + $0x150] sm:$0xff]  ;;  %v89_v11 = vshrl.u32 %v88_v10, 7 }
   0x9   :  { %115 = vmatpush1.msra.mxu0 %v62_v15  ;;  %228 = vmatpush1.msra.mxu1 %v64_v16  ;;  %v51_v25 = vld [vmem:[%s763_s1 + $0x128] sm:$0xff]  ;;  %v53_v26 = vld [vmem:[%s763_s1 + $0x138] sm:$0xff]  ;;  %v50_v27 = vld [vmem:[%s763_s1 + $0x120] sm:$0xff] }
   0xa   :  { %116 = vmatprep.subr.mxu0 %v59_v17  ;;  %229 = vmatprep.subr.mxu1 %v61_v18  ;;  %v52_v28 = vld [vmem:[%s763_s1 + $0x130] sm:$0xff]  ;;  %v47_v29 = vld [vmem:[%s763_s1 + $0x108] sm:$0xff]  ;;  %v49_v30 = vld [vmem:[%s763_s1 + $0x118] sm:$0xff]  ;;  %v90_v12 = vsub.s32 0, %v89_v11  ;;  %v98_v13 = vsub.s32 2, %v89_v11  ;;  %v94_v15 = vsub.s32 1, %v89_v11 }
   0xb   :  { %117 = vmatpush1.msra.mxu0 %v58_v19  ;;  %230 = vmatpush1.msra.mxu1 %v60_v20  ;;  %v46_v31 = vld [vmem:[%s763_s1 + $0x100] sm:$0xff]  ;;  %v48_v32 = vld [vmem:[%s763_s1 + $0x110] sm:$0xff]  ;;  %v43_v33 = vld [vmem:[%s763_s1 + $0xe8] sm:$0xff]  ;;  %v102_v16 = vsub.s32 3, %v89_v11 }
   0xc   :  { %118 = vmatprep.subr.mxu0 %v55_v21  ;;  %231 = vmatprep.subr.mxu1 %v57_v22  ;;  %v45_v34 = vld [vmem:[%s763_s1 + $0xf8] sm:$0xff]  ;;  %v42_v35 = vld [vmem:[%s763_s1 + $0xe0] sm:$0xff]  ;;  %v44_v36 = vld [vmem:[%s763_s1 + $0xf0] sm:$0xff] }
   0xd   :  { %119 = vmatpush1.msra.mxu0 %v54_v23  ;;  %232 = vmatpush1.msra.mxu1 %v56_v24  ;;  %v39_v37 = vld [vmem:[%s763_s1 + $0xc8] sm:$0xff]  ;;  %v41_v38 = vld [vmem:[%s763_s1 + $0xd8] sm:$0xff]  ;;  %v38_v39 = vld [vmem:[%s763_s1 + $0xc0] sm:$0xff] }
   0xe   :  { %120 = vmatprep.subr.mxu0 %v51_v25  ;;  %233 = vmatprep.subr.mxu1 %v53_v26  ;;  %v40_v40 = vld [vmem:[%s763_s1 + $0xd0] sm:$0xff]  ;;  %v35_v41 = vld [vmem:[%s763_s1 + $0xa8] sm:$0xff]  ;;  %v37_v42 = vld [vmem:[%s763_s1 + $0xb8] sm:$0xff] }
   0xf   :  { %121 = vmatpush1.msra.mxu0 %v50_v27  ;;  %234 = vmatpush1.msra.mxu1 %v52_v28  ;;  %v34_v43 = vld [vmem:[%s763_s1 + $0xa0] sm:$0xff]  ;;  %v36_v44 = vld [vmem:[%s763_s1 + $0xb0] sm:$0xff]  ;;  %v31_v45 = vld [vmem:[%s763_s1 + $0x88] sm:$0xff] }
  0x10   :  { %122 = vmatprep.subr.mxu0 %v47_v29  ;;  %235 = vmatprep.subr.mxu1 %v49_v30  ;;  %v33_v46 = vld [vmem:[%s763_s1 + $0x98] sm:$0xff]  ;;  %v30_v47 = vld [vmem:[%s763_s1 + $0x80] sm:$0xff]  ;;  %v32_v48 = vld [vmem:[%s763_s1 + $0x90] sm:$0xff] }
  0x11   :  { %123 = vmatpush1.msra.mxu0 %v46_v31  ;;  %236 = vmatpush1.msra.mxu1 %v48_v32  ;;  %v27_v49 = vld [vmem:[%s763_s1 + $0x68] sm:$0xff]  ;;  %v29_v50 = vld [vmem:[%s763_s1 + $0x78] sm:$0xff]  ;;  %v26_v51 = vld [vmem:[%s763_s1 + $0x60] sm:$0xff] }
  0x12   :  { %124 = vmatprep.subr.mxu0 %v43_v33  ;;  %237 = vmatprep.subr.mxu1 %v45_v34  ;;  %v28_v52 = vld [vmem:[%s763_s1 + $0x70] sm:$0xff]  ;;  %v23_v53 = vld [vmem:[%s763_s1 + $0x48] sm:$0xff]  ;;  %v25_v54 = vld [vmem:[%s763_s1 + $0x58] sm:$0xff] }
  0x13   :  { %125 = vmatpush1.msra.mxu0 %v42_v35  ;;  %238 = vmatpush1.msra.mxu1 %v44_v36  ;;  %v22_v55 = vld [vmem:[%s763_s1 + $0x40] sm:$0xff]  ;;  %v24_v56 = vld [vmem:[%s763_s1 + $0x50] sm:$0xff]  ;;  %v19_v57 = vld [vmem:[%s763_s1 + $0x28] sm:$0xff] }
  0x14   :  { %126 = vmatprep.subr.mxu0 %v39_v37  ;;  %239 = vmatprep.subr.mxu1 %v41_v38  ;;  %v21_v58 = vld [vmem:[%s763_s1 + $0x38] sm:$0xff]  ;;  %v18_v59 = vld [vmem:[%s763_s1 + $0x20] sm:$0xff]  ;;  %v20_v60 = vld [vmem:[%s763_s1 + $0x30] sm:$0xff] }
  0x15   :  { %127 = vmatpush1.msra.mxu0 %v38_v39  ;;  %240 = vmatpush1.msra.mxu1 %v40_v40  ;;  %v15_v61 = vld [vmem:[%s763_s1 + $0x8] sm:$0xff]  ;;  %v17_v62 = vld [vmem:[%s763_s1 + $0x18] sm:$0xff]  ;;  %v14_v63 = vld [vmem:[%s763_s1] sm:$0xff] }
  0x16   :  { %128 = vmatprep.subr.mxu0 %v35_v41  ;;  %241 = vmatprep.subr.mxu1 %v37_v42  ;;  %v16_v0 = vld [vmem:[%s763_s1 + $0x10] sm:$0xff]  ;;  %v78_v1 = vld [vmem:[%s764_s0] sm:$0xff]  ;;  %v79_v2 = vld [vmem:[%s764_s0 + $0x8] sm:$0xff] }
  0x17   :  { %129 = vmatpush1.msra.mxu0 %v34_v43  ;;  %242 = vmatpush1.msra.mxu1 %v36_v44  ;;  %v80_v4 = vld [vmem:[%s764_s0 + $0x10] sm:$0xff]  ;;  %v81_v5 = vld [vmem:[%s764_s0 + $0x18] sm:$0xff]  ;;  %v82_v6 = vld [vmem:[%s764_s0 + $0x20] sm:$0xff] }
  0x18   :  { %130 = vmatprep.subr.mxu0 %v31_v45  ;;  %243 = vmatprep.subr.mxu1 %v33_v46  ;;  %v83_v7 = vld [vmem:[%s764_s0 + $0x28] sm:$0xff]  ;;  %v84_v8 = vld [vmem:[%s764_s0 + $0x30] sm:$0xff]  ;;  %v85_v9 = vld [vmem:[%s764_s0 + $0x38] sm:$0xff] }
  0x19   :  { %131 = vmatpush1.msra.mxu0 %v30_v47  ;;  %244 = vmatpush1.msra.mxu1 %v32_v48  ;;  %v86_v14 = vld [vmem:[%s765_s2] sm:$0xf] }
  0x1a   :  { %132 = vmatprep.subr.mxu0 %v27_v49  ;;  %245 = vmatprep.subr.mxu1 %v29_v50  ;;  %v627_v17 = vrot.slane %v86_v14, %v90_v12  ;;  %v629_v18 = vrot.slane %v86_v14, %v98_v13  ;;  %v633_v19 = vrot.slane %v86_v14, %v102_v16 }
  0x1b   :  { %133 = vmatpush1.msra.mxu0 %v26_v51  ;;  %246 = vmatpush1.msra.mxu1 %v28_v52 }
  0x1c   :  { %134 = vmatprep.subr.mxu0 %v23_v53  ;;  %247 = vmatprep.subr.mxu1 %v25_v54 }
  0x1d   :  { %135 = vmatpush1.msra.mxu0 %v22_v55  ;;  %248 = vmatpush1.msra.mxu1 %v24_v56 }
  0x1e   :  { %136 = vmatprep.subr.mxu0 %v19_v57  ;;  %249 = vmatprep.subr.mxu1 %v21_v58 }
  0x1f   :  { %137 = vmatpush1.msra.mxu0 %v18_v59  ;;  %250 = vmatpush1.msra.mxu1 %v20_v60 }
  0x20   :  { %138 = vmatprep.subr.mxu0 %v15_v61  ;;  %251 = vmatprep.subr.mxu1 %v17_v62 }
  0x21   :  { %139 = vmatpush1.msra.mxu0 %v14_v63  ;;  %252 = vmatpush1.msra.mxu1 %v16_v0 }
  0x22   :  { %173 = vmatmul.mubr.f32.vlgmr.msra.gmra.mxu0 %v78_v1  ;;  %286 = vmatmul.mubr.f32.vlgmr.msra.gmra.mxu1 %v78_v1 }
  0x23   :  { %178 = vmatprep.mubr.f32.mxu0 %v371_v3  ;;  %291 = vmatprep.mubr.f32.mxu1 %v371_v3 }
  0x26   :  { %179 = vmatmul.mubr.f32.gmra.mxu0 %v79_v2  ;;  %292 = vmatmul.mubr.f32.gmra.mxu1 %v79_v2 }
  0x27   :  { %184 = vmatprep.mubr.f32.mxu0 %v371_v3  ;;  %297 = vmatprep.mubr.f32.mxu1 %v371_v3 }
  0x2a   :  { %185 = vmatmul.mubr.f32.gmra.mxu0 %v80_v4  ;;  %298 = vmatmul.mubr.f32.gmra.mxu1 %v80_v4 }
  0x2b   :  { %190 = vmatprep.mubr.f32.mxu0 %v371_v3  ;;  %303 = vmatprep.mubr.f32.mxu1 %v371_v3 }
  0x2e   :  { %191 = vmatmul.mubr.f32.gmra.mxu0 %v81_v5  ;;  %304 = vmatmul.mubr.f32.gmra.mxu1 %v81_v5 }
  0x2f   :  { %196 = vmatprep.mubr.f32.mxu0 %v371_v3  ;;  %309 = vmatprep.mubr.f32.mxu1 %v371_v3 }
  0x32   :  { %197 = vmatmul.mubr.f32.gmra.mxu0 %v82_v6  ;;  %310 = vmatmul.mubr.f32.gmra.mxu1 %v82_v6 }
  0x33   :  { %202 = vmatprep.mubr.f32.mxu0 %v371_v3  ;;  %315 = vmatprep.mubr.f32.mxu1 %v371_v3 }
  0x36   :  { %203 = vmatmul.mubr.f32.gmra.mxu0 %v83_v7  ;;  %316 = vmatmul.mubr.f32.gmra.mxu1 %v83_v7 }
  0x37   :  { %208 = vmatprep.mubr.f32.mxu0 %v371_v3  ;;  %321 = vmatprep.mubr.f32.mxu1 %v371_v3 }
  0x3a   :  { %209 = vmatmul.mubr.f32.gmra.mxu0 %v84_v8  ;;  %322 = vmatmul.mubr.f32.gmra.mxu1 %v84_v8 }
  0x3b   :  { %214 = vmatprep.mubr.f32.mxu0 %v371_v3  ;;  %327 = vmatprep.mubr.f32.mxu1 %v371_v3  ;;  %v631_v3 = vrot.slane %v86_v14, %v94_v15 }
  0x3e   :  { %215 = vmatmul.mubr.f32.gmra.mxu0 %v85_v9  ;;  %328 = vmatmul.mubr.f32.gmra.mxu1 %v85_v9 }
  0xe2   :  { %v174_v20 = vpop.f32.mrf.mxu0  ;;  %v287_v21 = vpop.f32.mrf.mxu1 }
  0xe3   :  { %v175_v22 = vadd.f32 %v174_v20, %v627_v17  ;;  %v288_v23 = vadd.f32 %v287_v21, %v629_v18 }
  0xe4   :  { %v176_v24 = vpop.f32.mrf.mxu0  ;;  %v289_v25 = vpop.f32.mrf.mxu1 }
  0xe5   :  { %334 = vst [vmem:[%s766_s3] sm:$0xff] %v175_v22  ;;  %336 = vst [vmem:[%s766_s3 + $0x10] sm:$0xff] %v288_v23  ;;  %v177_v26 = vadd.f32 %v176_v24, %v631_v3  ;;  %v290_v27 = vadd.f32 %v289_v25, %v633_v19 }
  0xe6   :  { %v180_v28 = vpop.f32.mrf.mxu0  ;;  %v293_v29 = vpop.f32.mrf.mxu1 }
  0xe7   :  { %335 = vst [vmem:[%s766_s3 + $0x8] sm:$0xff] %v177_v26  ;;  %337 = vst [vmem:[%s766_s3 + $0x18] sm:$0xff] %v290_v27  ;;  %v181_v30 = vadd.f32 %v180_v28, %v627_v17  ;;  %v294_v31 = vadd.f32 %v293_v29, %v629_v18 }
  0xe8   :  { %v182_v32 = vpop.f32.mrf.mxu0  ;;  %v295_v33 = vpop.f32.mrf.mxu1 }
  0xe9   :  { %338 = vst [vmem:[%s766_s3 + $0x20] sm:$0xff] %v181_v30  ;;  %340 = vst [vmem:[%s766_s3 + $0x30] sm:$0xff] %v294_v31  ;;  %v183_v34 = vadd.f32 %v182_v32, %v631_v3  ;;  %v296_v35 = vadd.f32 %v295_v33, %v633_v19 }
  0xea   :  { %v186_v36 = vpop.f32.mrf.mxu0  ;;  %v299_v37 = vpop.f32.mrf.mxu1 }
  0xeb   :  { %339 = vst [vmem:[%s766_s3 + $0x28] sm:$0xff] %v183_v34  ;;  %341 = vst [vmem:[%s766_s3 + $0x38] sm:$0xff] %v296_v35  ;;  %v187_v38 = vadd.f32 %v186_v36, %v627_v17  ;;  %v300_v39 = vadd.f32 %v299_v37, %v629_v18 }
  0xec   :  { %v188_v40 = vpop.f32.mrf.mxu0  ;;  %v301_v41 = vpop.f32.mrf.mxu1 }
  0xed   :  { %342 = vst [vmem:[%s766_s3 + $0x40] sm:$0xff] %v187_v38  ;;  %344 = vst [vmem:[%s766_s3 + $0x50] sm:$0xff] %v300_v39  ;;  %v189_v42 = vadd.f32 %v188_v40, %v631_v3  ;;  %v302_v43 = vadd.f32 %v301_v41, %v633_v19 }
  0xee   :  { %v192_v44 = vpop.f32.mrf.mxu0  ;;  %v305_v45 = vpop.f32.mrf.mxu1 }
  0xef   :  { %343 = vst [vmem:[%s766_s3 + $0x48] sm:$0xff] %v189_v42  ;;  %345 = vst [vmem:[%s766_s3 + $0x58] sm:$0xff] %v302_v43  ;;  %v193_v46 = vadd.f32 %v192_v44, %v627_v17  ;;  %v306_v47 = vadd.f32 %v305_v45, %v629_v18 }
  0xf0   :  { %v194_v48 = vpop.f32.mrf.mxu0  ;;  %v307_v49 = vpop.f32.mrf.mxu1 }
  0xf1   :  { %346 = vst [vmem:[%s766_s3 + $0x60] sm:$0xff] %v193_v46  ;;  %348 = vst [vmem:[%s766_s3 + $0x70] sm:$0xff] %v306_v47  ;;  %v195_v50 = vadd.f32 %v194_v48, %v631_v3  ;;  %v308_v51 = vadd.f32 %v307_v49, %v633_v19 }
  0xf2   :  { %v198_v52 = vpop.f32.mrf.mxu0  ;;  %v311_v53 = vpop.f32.mrf.mxu1 }
  0xf3   :  { %347 = vst [vmem:[%s766_s3 + $0x68] sm:$0xff] %v195_v50  ;;  %349 = vst [vmem:[%s766_s3 + $0x78] sm:$0xff] %v308_v51  ;;  %v199_v54 = vadd.f32 %v198_v52, %v627_v17  ;;  %v312_v55 = vadd.f32 %v311_v53, %v629_v18 }
  0xf4   :  { %v200_v56 = vpop.f32.mrf.mxu0  ;;  %v313_v57 = vpop.f32.mrf.mxu1 }
  0xf5   :  { %350 = vst [vmem:[%s766_s3 + $0x80] sm:$0xff] %v199_v54  ;;  %352 = vst [vmem:[%s766_s3 + $0x90] sm:$0xff] %v312_v55  ;;  %v201_v58 = vadd.f32 %v200_v56, %v631_v3  ;;  %v314_v59 = vadd.f32 %v313_v57, %v633_v19 }
  0xf6   :  { %v204_v60 = vpop.f32.mrf.mxu0  ;;  %v317_v61 = vpop.f32.mrf.mxu1 }
  0xf7   :  { %351 = vst [vmem:[%s766_s3 + $0x88] sm:$0xff] %v201_v58  ;;  %353 = vst [vmem:[%s766_s3 + $0x98] sm:$0xff] %v314_v59  ;;  %v205_v62 = vadd.f32 %v204_v60, %v627_v17  ;;  %v318_v63 = vadd.f32 %v317_v61, %v629_v18 }
  0xf8   :  { %v206_v0 = vpop.f32.mrf.mxu0  ;;  %v319_v1 = vpop.f32.mrf.mxu1 }
  0xf9   :  { %354 = vst [vmem:[%s766_s3 + $0xa0] sm:$0xff] %v205_v62  ;;  %356 = vst [vmem:[%s766_s3 + $0xb0] sm:$0xff] %v318_v63  ;;  %v207_v2 = vadd.f32 %v206_v0, %v631_v3  ;;  %v320_v4 = vadd.f32 %v319_v1, %v633_v19 }
  0xfa   :  { %v210_v5 = vpop.f32.mrf.mxu0  ;;  %v323_v6 = vpop.f32.mrf.mxu1 }
  0xfb   :  { %355 = vst [vmem:[%s766_s3 + $0xa8] sm:$0xff] %v207_v2  ;;  %357 = vst [vmem:[%s766_s3 + $0xb8] sm:$0xff] %v320_v4  ;;  %v211_v7 = vadd.f32 %v210_v5, %v627_v17  ;;  %v324_v8 = vadd.f32 %v323_v6, %v629_v18 }
  0xfc   :  { %v212_v9 = vpop.f32.mrf.mxu0  ;;  %v325_v10 = vpop.f32.mrf.mxu1 }
  0xfd   :  { %358 = vst [vmem:[%s766_s3 + $0xc0] sm:$0xff] %v211_v7  ;;  %360 = vst [vmem:[%s766_s3 + $0xd0] sm:$0xff] %v324_v8  ;;  %v213_v11 = vadd.f32 %v212_v9, %v631_v3  ;;  %v326_v12 = vadd.f32 %v325_v10, %v633_v19 }
  0xfe   :  { %v216_v13 = vpop.f32.mrf.mxu0  ;;  %v329_v14 = vpop.f32.mrf.mxu1 }
  0xff   :  { %359 = vst [vmem:[%s766_s3 + $0xc8] sm:$0xff] %v213_v11  ;;  %361 = vst [vmem:[%s766_s3 + $0xd8] sm:$0xff] %v326_v12  ;;  %v217_v15 = vadd.f32 %v216_v13, %v627_v17  ;;  %v330_v16 = vadd.f32 %v329_v14, %v629_v18 }
 0x100   :  { %v218_v20 = vpop.f32.mrf.mxu0  ;;  %v331_v21 = vpop.f32.mrf.mxu1 }
 0x101   :  { %362 = vst [vmem:[%s766_s3 + $0xe0] sm:$0xff] %v217_v15  ;;  %364 = vst [vmem:[%s766_s3 + $0xf0] sm:$0xff] %v330_v16  ;;  %v219_v22 = vadd.f32 %v218_v20, %v631_v3  ;;  %v332_v23 = vadd.f32 %v331_v21, %v633_v19 }
 0x103   :  { %363 = vst [vmem:[%s766_s3 + $0xe8] sm:$0xff] %v219_v22  ;;  %365 = vst [vmem:[%s766_s3 + $0xf8] sm:$0xff] %v332_v23 }

// kernel: lstm_model_forward.5
= control target key start
LH: loop header
LB: loop body
LE: loop exit
PB: predicated region body
PF: predicated region fallthrough
CT: control target
= control target key end

     0   :  { %v3090_v3 = vmov 0.0   ;;  %s3085_s1 = inlined_call_operand.vmem [shape: f32[128,512], index: 1, kind: input, shape index: {}]   ;;  %s3086_s0 = inlined_call_operand.vmem [shape: f32[8,8,512], index: 0, kind: input, shape index: {}]   ;;  %s3087_s2 = inlined_call_operand.vmem [shape: f32[8,8,128], index: 2, kind: output, shape index: {}]  }
   0x1   :  { %v1774_v0 = vld [vmem:[%s3085_s1 + $0x1e8] sm:$0xff]  ;;  %v1779_v1 = vld [vmem:[%s3085_s1 + $0x1e0] sm:$0xff]  ;;  %151 = vmatprep.mubr.f32.mxu0 %v3090_v3  ;;  %222 = vmatprep.mubr.f32.mxu1 %v3090_v3  ;;  %v1821_v9 = vld [vmem:[%s3085_s1 + $0x1f8] sm:$0xff] }
   0x2   :  { %3157 = vst [vmem:[#allocation4_spill] sm:$0xff] %v1774_v0  ;;  %v1784_v2 = vld [vmem:[%s3085_s1 + $0x1c8] sm:$0xff]  ;;  %87 = vmatprep.subr.mxu0 %v1774_v0  ;;  %v1792_v4 = vld [vmem:[%s3085_s1 + $0x1c0] sm:$0xff]  ;;  %3158 = vst [vmem:[#allocation5_spill] sm:$0xff] %v1821_v9  ;;  %158 = vmatprep.subr.mxu1 %v1821_v9 }
   0x3   :  { %88 = vmatpush1.msra.mxu0 %v1779_v1  ;;  %v1798_v5 = vld [vmem:[%s3085_s1 + $0x1a8] sm:$0xff]  ;;  %v1804_v6 = vld [vmem:[%s3085_s1 + $0x1a0] sm:$0xff]  ;;  %v1833_v11 = vld [vmem:[%s3085_s1 + $0x1f0] sm:$0xff] }
   0x4   :  { %89 = vmatprep.subr.mxu0 %v1784_v2  ;;  %v1810_v7 = vld [vmem:[%s3085_s1 + $0x188] sm:$0xff]  ;;  %v1816_v8 = vld [vmem:[%s3085_s1 + $0x180] sm:$0xff]  ;;  %159 = vmatpush1.msra.mxu1 %v1833_v11  ;;  %v1845_v13 = vld [vmem:[%s3085_s1 + $0x1d8] sm:$0xff] }
   0x5   :  { %90 = vmatpush1.msra.mxu0 %v1792_v4  ;;  %v1827_v10 = vld [vmem:[%s3085_s1 + $0x168] sm:$0xff]  ;;  %v1839_v12 = vld [vmem:[%s3085_s1 + $0x160] sm:$0xff]  ;;  %v1850_v14 = vld [vmem:[%s3085_s1 + $0x1d0] sm:$0xff]  ;;  %160 = vmatprep.subr.mxu1 %v1845_v13 }
   0x6   :  { %91 = vmatprep.subr.mxu0 %v1798_v5  ;;  %v1856_v15 = vld [vmem:[%s3085_s1 + $0x148] sm:$0xff]  ;;  %v1862_v16 = vld [vmem:[%s3085_s1 + $0x1b8] sm:$0xff]  ;;  %v1868_v17 = vld [vmem:[%s3085_s1 + $0x140] sm:$0xff]  ;;  %161 = vmatpush1.msra.mxu1 %v1850_v14 }
   0x7   :  { %92 = vmatpush1.msra.mxu0 %v1804_v6  ;;  %v1874_v18 = vld [vmem:[%s3085_s1 + $0x1b0] sm:$0xff]  ;;  %v1879_v19 = vld [vmem:[%s3085_s1 + $0x198] sm:$0xff]  ;;  %v1885_v20 = vld [vmem:[%s3085_s1 + $0x128] sm:$0xff]  ;;  %162 = vmatprep.subr.mxu1 %v1862_v16 }
   0x8   :  { %93 = vmatprep.subr.mxu0 %v1810_v7  ;;  %v1891_v21 = vld [vmem:[%s3085_s1 + $0x190] sm:$0xff]  ;;  %v1897_v22 = vld [vmem:[%s3085_s1 + $0x120] sm:$0xff]  ;;  %163 = vmatpush1.msra.mxu1 %v1874_v18  ;;  %v1903_v23 = vld [vmem:[%s3085_s1 + $0x178] sm:$0xff] }
   0x9   :  { %94 = vmatpush1.msra.mxu0 %v1816_v8  ;;  %v1909_v24 = vld [vmem:[%s3085_s1 + $0x108] sm:$0xff]  ;;  %164 = vmatprep.subr.mxu1 %v1879_v19  ;;  %v1915_v25 = vld [vmem:[%s3085_s1 + $0x170] sm:$0xff]  ;;  %v1921_v26 = vld [vmem:[%s3085_s1 + $0x100] sm:$0xff] }
   0xa   :  { %95 = vmatprep.subr.mxu0 %v1827_v10  ;;  %165 = vmatpush1.msra.mxu1 %v1891_v21  ;;  %v1927_v27 = vld [vmem:[%s3085_s1 + $0x158] sm:$0xff]  ;;  %v1933_v28 = vld [vmem:[%s3085_s1 + $0xe8] sm:$0xff]  ;;  %v1939_v29 = vld [vmem:[%s3085_s1 + $0x150] sm:$0xff] }
   0xb   :  { %96 = vmatpush1.msra.mxu0 %v1839_v12  ;;  %166 = vmatprep.subr.mxu1 %v1903_v23  ;;  %v1945_v30 = vld [vmem:[%s3085_s1 + $0xe0] sm:$0xff]  ;;  %v1951_v31 = vld [vmem:[%s3085_s1 + $0x138] sm:$0xff]  ;;  %v1957_v32 = vld [vmem:[%s3085_s1 + $0xc8] sm:$0xff] }
   0xc   :  { %97 = vmatprep.subr.mxu0 %v1856_v15  ;;  %167 = vmatpush1.msra.mxu1 %v1915_v25  ;;  %v1963_v33 = vld [vmem:[%s3085_s1 + $0x130] sm:$0xff]  ;;  %v1969_v34 = vld [vmem:[%s3085_s1 + $0xc0] sm:$0xff]  ;;  %v1975_v35 = vld [vmem:[%s3085_s1 + $0x118] sm:$0xff] }
   0xd   :  { %98 = vmatpush1.msra.mxu0 %v1868_v17  ;;  %168 = vmatprep.subr.mxu1 %v1927_v27  ;;  %v1981_v36 = vld [vmem:[%s3085_s1 + $0xa8] sm:$0xff]  ;;  %v1987_v37 = vld [vmem:[%s3085_s1 + $0x110] sm:$0xff]  ;;  %v1993_v38 = vld [vmem:[%s3085_s1 + $0xa0] sm:$0xff] }
   0xe   :  { %99 = vmatprep.subr.mxu0 %v1885_v20  ;;  %169 = vmatpush1.msra.mxu1 %v1939_v29  ;;  %v1999_v39 = vld [vmem:[%s3085_s1 + $0xf8] sm:$0xff]  ;;  %v2005_v40 = vld [vmem:[%s3085_s1 + $0x88] sm:$0xff]  ;;  %v2011_v41 = vld [vmem:[%s3085_s1 + $0xf0] sm:$0xff] }
   0xf   :  { %100 = vmatpush1.msra.mxu0 %v1897_v22  ;;  %170 = vmatprep.subr.mxu1 %v1951_v31  ;;  %v2017_v42 = vld [vmem:[%s3085_s1 + $0x80] sm:$0xff]  ;;  %v2023_v43 = vld [vmem:[%s3085_s1 + $0xd8] sm:$0xff]  ;;  %v2029_v44 = vld [vmem:[%s3085_s1 + $0x68] sm:$0xff] }
  0x10   :  { %101 = vmatprep.subr.mxu0 %v1909_v24  ;;  %171 = vmatpush1.msra.mxu1 %v1963_v33  ;;  %3159 = vst [vmem:[#allocation6_spill] sm:$0xff] %v2029_v44  ;;  %v2035_v45 = vld [vmem:[%s3085_s1 + $0xd0] sm:$0xff]  ;;  %v2041_v46 = vld [vmem:[%s3085_s1 + $0x60] sm:$0xff]  ;;  %v2047_v47 = vld [vmem:[%s3085_s1 + $0xb8] sm:$0xff] }
  0x11   :  { %102 = vmatpush1.msra.mxu0 %v1921_v26  ;;  %172 = vmatprep.subr.mxu1 %v1975_v35  ;;  %3160 = vst [vmem:[#allocation7_spill] sm:$0xff] %v2041_v46  ;;  %v2053_v48 = vld [vmem:[%s3085_s1 + $0x48] sm:$0xff]  ;;  %v2059_v49 = vld [vmem:[%s3085_s1 + $0xb0] sm:$0xff]  ;;  %v2065_v50 = vld [vmem:[%s3085_s1 + $0x40] sm:$0xff] }
  0x12   :  { %103 = vmatprep.subr.mxu0 %v1933_v28  ;;  %173 = vmatpush1.msra.mxu1 %v1987_v37  ;;  %3161 = vst [vmem:[#allocation8_spill] sm:$0xff] %v2053_v48  ;;  %3162 = vst [vmem:[#allocation9_spill] sm:$0xff] %v2065_v50  ;;  %v2071_v51 = vld [vmem:[%s3085_s1 + $0x98] sm:$0xff]  ;;  %v2077_v52 = vld [vmem:[%s3085_s1 + $0x28] sm:$0xff] }
  0x13   :  { %104 = vmatpush1.msra.mxu0 %v1945_v30  ;;  %174 = vmatprep.subr.mxu1 %v1999_v39  ;;  %3163 = vst [vmem:[#allocation10_spill] sm:$0xff] %v2077_v52  ;;  %v2083_v53 = vld [vmem:[%s3085_s1 + $0x90] sm:$0xff]  ;;  %v2089_v54 = vld [vmem:[%s3085_s1 + $0x20] sm:$0xff]  ;;  %v2095_v55 = vld [vmem:[%s3085_s1 + $0x78] sm:$0xff] }
  0x14   :  { %105 = vmatprep.subr.mxu0 %v1957_v32  ;;  %175 = vmatpush1.msra.mxu1 %v2011_v41  ;;  %3164 = vst [vmem:[#allocation11_spill] sm:$0xff] %v2083_v53  ;;  %3165 = vst [vmem:[#allocation12_spill] sm:$0xff] %v2089_v54  ;;  %v2101_v56 = vld [vmem:[%s3085_s1 + $0x8] sm:$0xff]  ;;  %v2107_v57 = vld [vmem:[%s3085_s1 + $0x70] sm:$0xff] }
  0x15   :  { %106 = vmatpush1.msra.mxu0 %v1969_v34  ;;  %176 = vmatprep.subr.mxu1 %v2023_v43  ;;  %3166 = vst [vmem:[#allocation13_spill] sm:$0xff] %v2095_v55  ;;  %3167 = vst [vmem:[#allocation14_spill] sm:$0xff] %v2101_v56  ;;  %v2113_v58 = vld [vmem:[%s3085_s1] sm:$0xff]  ;;  %v2119_v59 = vld [vmem:[%s3085_s1 + $0x58] sm:$0xff] }
  0x16   :  { %107 = vmatprep.subr.mxu0 %v1981_v36  ;;  %177 = vmatpush1.msra.mxu1 %v2035_v45  ;;  %3168 = vst [vmem:[#allocation15_spill] sm:$0xff] %v2107_v57  ;;  %3169 = vst [vmem:[#allocation16_spill] sm:$0xff] %v2113_v58  ;;  %v2126_v60 = vld [vmem:[%s3085_s1 + $0x50] sm:$0xff]  ;;  %v2133_v61 = vld [vmem:[%s3085_s1 + $0x38] sm:$0xff] }
  0x17   :  { %108 = vmatpush1.msra.mxu0 %v1993_v38  ;;  %178 = vmatprep.subr.mxu1 %v2047_v47  ;;  %3170 = vst [vmem:[#allocation17_spill] sm:$0xff] %v2119_v59  ;;  %3171 = vst [vmem:[#allocation18_spill] sm:$0xff] %v2126_v60  ;;  %v2140_v62 = vld [vmem:[%s3085_s1 + $0x30] sm:$0xff]  ;;  %v2147_v63 = vld [vmem:[%s3085_s1 + $0x18] sm:$0xff] }
  0x18   :  { %109 = vmatprep.subr.mxu0 %v2005_v40  ;;  %179 = vmatpush1.msra.mxu1 %v2059_v49  ;;  %3172 = vst [vmem:[#allocation19_spill] sm:$0xff] %v2133_v61  ;;  %3173 = vst [vmem:[#allocation20_spill] sm:$0xff] %v2140_v62 }
  0x19   :  { %110 = vmatpush1.msra.mxu0 %v2017_v42  ;;  %180 = vmatprep.subr.mxu1 %v2071_v51  ;;  %3174 = vst [vmem:[#allocation21_spill] sm:$0xff] %v2147_v63 }
  0x1a   :  { %111 = vmatprep.subr.mxu0 %v2029_v44  ;;  %181 = vmatpush1.msra.mxu1 %v2083_v53 }
  0x1b   :  { %112 = vmatpush1.msra.mxu0 %v2041_v46  ;;  %182 = vmatprep.subr.mxu1 %v2095_v55 }
  0x1c   :  { %113 = vmatprep.subr.mxu0 %v2053_v48  ;;  %183 = vmatpush1.msra.mxu1 %v2107_v57 }
  0x1d   :  { %114 = vmatpush1.msra.mxu0 %v2065_v50  ;;  %184 = vmatprep.subr.mxu1 %v2119_v59 }
  0x1e   :  { %115 = vmatprep.subr.mxu0 %v2077_v52  ;;  %185 = vmatpush1.msra.mxu1 %v2126_v60 }
  0x1f   :  { %116 = vmatpush1.msra.mxu0 %v2089_v54  ;;  %186 = vmatprep.subr.mxu1 %v2133_v61 }
  0x20   :  { %117 = vmatprep.subr.mxu0 %v2101_v56  ;;  %187 = vmatpush1.msra.mxu1 %v2140_v62 }
  0x21   :  { %118 = vmatpush1.msra.mxu0 %v2113_v58  ;;  %v2153_v58 = vld [vmem:[%s3085_s1 + $0x10] sm:$0xff]  ;;  %188 = vmatprep.subr.mxu1 %v2147_v63 }
  0x22   :  { %152 = vmatmul.mubr.f32.vlgmr.msra.gmra.mxu0 %v3090_v3  ;;  %3175 = vst [vmem:[#allocation22_spill] sm:$0xff] %v2153_v58  ;;  %263 = vmatprep.subr.mxu0 %v1774_v0 }
  0x23   :  { %264 = vmatpush1.msra.mxu0 %v1779_v1  ;;  %189 = vmatpush1.msra.mxu1 %v2153_v58 }
  0x24   :  { %265 = vmatprep.subr.mxu0 %v1784_v2  ;;  %223 = vmatmul.mubr.f32.vlgmr.msra.gmra.mxu1 %v3090_v3  ;;  %v3176_v3 = vld [vmem:[#allocation16_spill] sm:$0xff] }
  0x25   :  { %266 = vmatpush1.msra.mxu0 %v1792_v4  ;;  %334 = vmatprep.subr.mxu1 %v1821_v9 }
  0x26   :  { %335 = vmatpush1.msra.mxu1 %v1833_v11  ;;  %267 = vmatprep.subr.mxu0 %v1798_v5 }
  0x27   :  { %336 = vmatprep.subr.mxu1 %v1845_v13  ;;  %268 = vmatpush1.msra.mxu0 %v1804_v6 }
  0x28   :  { %337 = vmatpush1.msra.mxu1 %v1850_v14  ;;  %269 = vmatprep.subr.mxu0 %v1810_v7 }
  0x29   :  { %338 = vmatprep.subr.mxu1 %v1862_v16  ;;  %270 = vmatpush1.msra.mxu0 %v1816_v8 }
  0x2a   :  { %339 = vmatpush1.msra.mxu1 %v1874_v18  ;;  %271 = vmatprep.subr.mxu0 %v1827_v10 }
  0x2b   :  { %340 = vmatprep.subr.mxu1 %v1879_v19  ;;  %272 = vmatpush1.msra.mxu0 %v1839_v12 }
  0x2c   :  { %341 = vmatpush1.msra.mxu1 %v1891_v21  ;;  %273 = vmatprep.subr.mxu0 %v1856_v15 }
  0x2d   :  { %342 = vmatprep.subr.mxu1 %v1903_v23  ;;  %274 = vmatpush1.msra.mxu0 %v1868_v17 }
  0x2e   :  { %343 = vmatpush1.msra.mxu1 %v1915_v25  ;;  %275 = vmatprep.subr.mxu0 %v1885_v20 }
  0x2f   :  { %344 = vmatprep.subr.mxu1 %v1927_v27  ;;  %276 = vmatpush1.msra.mxu0 %v1897_v22 }
  0x30   :  { %345 = vmatpush1.msra.mxu1 %v1939_v29  ;;  %277 = vmatprep.subr.mxu0 %v1909_v24 }
  0x31   :  { %346 = vmatprep.subr.mxu1 %v1951_v31  ;;  %278 = vmatpush1.msra.mxu0 %v1921_v26 }
  0x32   :  { %347 = vmatpush1.msra.mxu1 %v1963_v33  ;;  %279 = vmatprep.subr.mxu0 %v1933_v28 }
  0x33   :  { %348 = vmatprep.subr.mxu1 %v1975_v35  ;;  %280 = vmatpush1.msra.mxu0 %v1945_v30 }
  0x34   :  { %349 = vmatpush1.msra.mxu1 %v1987_v37  ;;  %281 = vmatprep.subr.mxu0 %v1957_v32 }
  0x35   :  { %350 = vmatprep.subr.mxu1 %v1999_v39  ;;  %282 = vmatpush1.msra.mxu0 %v1969_v34 }
  0x36   :  { %351 = vmatpush1.msra.mxu1 %v2011_v41  ;;  %283 = vmatprep.subr.mxu0 %v1981_v36 }
  0x37   :  { %352 = vmatprep.subr.mxu1 %v2023_v43  ;;  %284 = vmatpush1.msra.mxu0 %v1993_v38 }
  0x38   :  { %353 = vmatpush1.msra.mxu1 %v2035_v45  ;;  %285 = vmatprep.subr.mxu0 %v2005_v40 }
  0x39   :  { %354 = vmatprep.subr.mxu1 %v2047_v47  ;;  %286 = vmatpush1.msra.mxu0 %v2017_v42 }
  0x3a   :  { %355 = vmatpush1.msra.mxu1 %v2059_v49  ;;  %287 = vmatprep.subr.mxu0 %v2029_v44 }
  0x3b   :  { %356 = vmatprep.subr.mxu1 %v2071_v51  ;;  %288 = vmatpush1.msra.mxu0 %v2041_v46 }
  0x3c   :  { %357 = vmatpush1.msra.mxu1 %v2083_v53  ;;  %289 = vmatprep.subr.mxu0 %v2053_v48  ;;  %v3177_v48 = vmov 0.0  }
  0x3d   :  { %358 = vmatprep.subr.mxu1 %v2095_v55  ;;  %290 = vmatpush1.msra.mxu0 %v2065_v50 }
  0x3e   :  { %359 = vmatpush1.msra.mxu1 %v2107_v57  ;;  %291 = vmatprep.subr.mxu0 %v2077_v52 }
  0x3f   :  { %360 = vmatprep.subr.mxu1 %v2119_v59  ;;  %292 = vmatpush1.msra.mxu0 %v2089_v54 }
  0x40   :  { %361 = vmatpush1.msra.mxu1 %v2126_v60  ;;  %293 = vmatprep.subr.mxu0 %v2101_v56  ;;  %v83_v56 = vld [vmem:[%s3086_s0] sm:$0xff]  ;;  %v85_v60 = vld [vmem:[%s3086_s0 + $0x10] sm:$0xff] }
  0x41   :  { %362 = vmatprep.subr.mxu1 %v2133_v61  ;;  %294 = vmatpush1.msra.mxu0 %v3176_v3  ;;  %v84_v3 = vld [vmem:[%s3086_s0 + $0x8] sm:$0xff] }
  0x42   :  { %363 = vmatpush1.msra.mxu1 %v2140_v62  ;;  %327 = vmatprep.mubr.f32.mxu0 %v3177_v48 }
  0x43   :  { %364 = vmatprep.subr.mxu1 %v2147_v63  ;;  %398 = vmatprep.mubr.f32.mxu1 %v3177_v48 }
  0x44   :  { %365 = vmatpush1.msra.mxu1 %v2153_v58  ;;  %440 = vmatprep.subr.mxu0 %v1774_v0 }
  0x45   :  { %511 = vmatprep.subr.mxu1 %v1821_v9  ;;  %v86_v9 = vld [vmem:[%s3086_s0 + $0x18] sm:$0xff] }
  0xe2   :  { %v153_v54 = vpop.f32.mrf.mxu0 }
  0xe3   :  { %v229_v62 = vadd.f32 %v153_v54, %v83_v56 }
  0xe4   :  { %v155_v61 = vpop.f32.mrf.mxu0  ;;  %v224_v58 = vpop.f32.mrf.mxu1 }
  0xe5   :  { %v1503_v63 = vmul.f32 -1.442695, %v229_v62  ;;  %v230_v52 = vadd.f32 %v155_v61, %v84_v3  ;;  %v231_v59 = vadd.f32 %v224_v58, %v85_v60  ;;  %v3182_v58 = vld [vmem:[#allocation15_spill] sm:$0xff]  ;;  %v3184_v60 = vld [vmem:[#allocation17_spill] sm:$0xff] }
  0xe6   :  { %v226_v0 = vpop.f32.mrf.mxu1 }
  0xe7   :  { %1563 = vpow2.f32 %v1503_v63  ;;  %v1504_v48 = vmul.f32 -1.442695, %v230_v52  ;;  %v232_v50 = vadd.f32 %v226_v0, %v86_v9 }
  0xe9   :  { %1565 = vpow2.f32 %v1504_v48  ;;  %v1505_v57 = vmul.f32 -1.442695, %v232_v50 }
  0xea   :  { %1567 = vtanh.f32 %v231_v59  ;;  %v3183_v59 = vld [vmem:[#allocation8_spill] sm:$0xff] }
  0xeb   :  { %1569 = vpow2.f32 %v1505_v57  ;;  %v3181_v57 = vld [vmem:[#allocation7_spill] sm:$0xff] }
  0xf4   :  { %v1564_v54 = vpop.eup %1563 }
  0xf5   :  { %v236_v56 = vadd.f32 1.0, %v1564_v54  ;;  %v3185_v54 = vld [vmem:[#allocation9_spill] sm:$0xff] }
  0xf6   :  { %v1566_v3 = vpop.eup %1565 }
  0xf7   :  { %1571 = vrcp.f32 %v236_v56  ;;  %v242_v52 = vadd.f32 1.0, %v1566_v3  ;;  %v1568_v48 = vpop.eup %1567  ;;  %v3186_v56 = vld [vmem:[#allocation18_spill] sm:$0xff] }
  0xf8   :  { %v1570_v61 = vpop.eup %1569  ;;  %v3187_v3 = vld [vmem:[#allocation10_spill] sm:$0xff] }
  0xf9   :  { %1573 = vrcp.f32 %v242_v52  ;;  %v249_v46 = vadd.f32 1.0, %v1570_v61  ;;  %v3188_v52 = vld [vmem:[#allocation19_spill] sm:$0xff]  ;;  %v3190_v61 = vld [vmem:[#allocation20_spill] sm:$0xff] }
  0xfb   :  { %1575 = vrcp.f32 %v249_v46  ;;  %v3179_v46 = vld [vmem:[#allocation6_spill] sm:$0xff] }
 0x104   :  { %v1572_v62 = vpop.eup %1571 }
 0x105   :  { %v253_v44 = vmul.f32 %v1572_v62, %v1568_v48  ;;  %v3189_v48 = vld [vmem:[#allocation12_spill] sm:$0xff]  ;;  %v3191_v62 = vld [vmem:[#allocation14_spill] sm:$0xff] }
 0x106   :  { %v1574_v63 = vpop.eup %1573 }
 0x107   :  { %v252_v55 = vmul.f32 0.0, %v1574_v63  ;;  %v3192_v63 = vld [vmem:[#allocation21_spill] sm:$0xff] }
 0x108   :  { %v1576_v0 = vpop.eup %1575 }
 0x109   :  { %v2239_v53 = vadd.f32 %v253_v44, %v252_v55  ;;  %v3178_v44 = vld [vmem:[#allocation11_spill] sm:$0xff]  ;;  %v3180_v55 = vld [vmem:[#allocation13_spill] sm:$0xff] }
 0x10b   :  { %1577 = vtanh.f32 %v2239_v53 }
 0x118   :  { %v1578_v9 = vpop.eup %1577 }
 0x119   :  { %v256_v50 = vmul.f32 %v1578_v9, %v1576_v0  ;;  %v3193_v0 = vld [vmem:[#allocation16_spill] sm:$0xff]  ;;  %v3194_v9 = vmov 0.0  }
 0x11b   :  { %257 = vst [vmem:[%s3087_s2] sm:$0xff] %v256_v50  ;;  %328 = vmatmul.mubr.f32.vlgmr.msra.gmra.mxu0 %v256_v50  ;;  %399 = vmatmul.mubr.f32.vlgmr.msra.gmra.mxu1 %v256_v50  ;;  %v3195_v50 = vld [vmem:[#allocation22_spill] sm:$0xff] }
 0x11c   :  { %441 = vmatpush1.msra.mxu0 %v1779_v1  ;;  %512 = vmatpush1.msra.mxu1 %v1833_v11 }
 0x11d   :  { %442 = vmatprep.subr.mxu0 %v1784_v2  ;;  %513 = vmatprep.subr.mxu1 %v1845_v13 }
 0x11e   :  { %443 = vmatpush1.msra.mxu0 %v1792_v4  ;;  %514 = vmatpush1.msra.mxu1 %v1850_v14 }
 0x11f   :  { %444 = vmatprep.subr.mxu0 %v1798_v5  ;;  %515 = vmatprep.subr.mxu1 %v1862_v16 }
 0x120   :  { %445 = vmatpush1.msra.mxu0 %v1804_v6  ;;  %516 = vmatpush1.msra.mxu1 %v1874_v18 }
 0x121   :  { %446 = vmatprep.subr.mxu0 %v1810_v7  ;;  %517 = vmatprep.subr.mxu1 %v1879_v19 }
 0x122   :  { %447 = vmatpush1.msra.mxu0 %v1816_v8  ;;  %518 = vmatpush1.msra.mxu1 %v1891_v21 }
 0x123   :  { %448 = vmatprep.subr.mxu0 %v1827_v10  ;;  %519 = vmatprep.subr.mxu1 %v1903_v23 }
 0x124   :  { %449 = vmatpush1.msra.mxu0 %v1839_v12  ;;  %520 = vmatpush1.msra.mxu1 %v1915_v25 }
 0x125   :  { %450 = vmatprep.subr.mxu0 %v1856_v15  ;;  %521 = vmatprep.subr.mxu1 %v1927_v27 }
 0x126   :  { %451 = vmatpush1.msra.mxu0 %v1868_v17  ;;  %522 = vmatpush1.msra.mxu1 %v1939_v29 }
 0x127   :  { %452 = vmatprep.subr.mxu0 %v1885_v20  ;;  %523 = vmatprep.subr.mxu1 %v1951_v31 }
 0x128   :  { %453 = vmatpush1.msra.mxu0 %v1897_v22  ;;  %524 = vmatpush1.msra.mxu1 %v1963_v33 }
 0x129   :  { %454 = vmatprep.subr.mxu0 %v1909_v24  ;;  %525 = vmatprep.subr.mxu1 %v1975_v35 }
 0x12a   :  { %455 = vmatpush1.msra.mxu0 %v1921_v26  ;;  %526 = vmatpush1.msra.mxu1 %v1987_v37 }
 0x12b   :  { %456 = vmatprep.subr.mxu0 %v1933_v28  ;;  %527 = vmatprep.subr.mxu1 %v1999_v39 }
 0x12c   :  { %457 = vmatpush1.msra.mxu0 %v1945_v30  ;;  %528 = vmatpush1.msra.mxu1 %v2011_v41 }
 0x12d   :  { %458 = vmatprep.subr.mxu0 %v1957_v32  ;;  %529 = vmatprep.subr.mxu1 %v2023_v43 }
 0x12e   :  { %459 = vmatpush1.msra.mxu0 %v1969_v34  ;;  %530 = vmatpush1.msra.mxu1 %v2035_v45 }
 0x12f   :  { %460 = vmatprep.subr.mxu0 %v1981_v36  ;;  %531 = vmatprep.subr.mxu1 %v2047_v47 }
 0x130   :  { %461 = vmatpush1.msra.mxu0 %v1993_v38  ;;  %532 = vmatpush1.msra.mxu1 %v2059_v49 }
 0x131   :  { %462 = vmatprep.subr.mxu0 %v2005_v40  ;;  %533 = vmatprep.subr.mxu1 %v2071_v51 }
 0x132   :  { %463 = vmatpush1.msra.mxu0 %v2017_v42  ;;  %534 = vmatpush1.msra.mxu1 %v3178_v44 }
 0x133   :  { %464 = vmatprep.subr.mxu0 %v3179_v46  ;;  %535 = vmatprep.subr.mxu1 %v3180_v55 }
 0x134   :  { %465 = vmatpush1.msra.mxu0 %v3181_v57  ;;  %536 = vmatpush1.msra.mxu1 %v3182_v58 }
 0x135   :  { %466 = vmatprep.subr.mxu0 %v3183_v59  ;;  %537 = vmatprep.subr.mxu1 %v3184_v60  ;;  %v1508_v59 = vld [vmem:[%s3086_s0 + $0x30] sm:$0xff] }
 0x136   :  { %467 = vmatpush1.msra.mxu0 %v3185_v54  ;;  %538 = vmatpush1.msra.mxu1 %v3186_v56  ;;  %v3196_v56 = vld [vmem:[#allocation4_spill] sm:$0xff] }
 0x137   :  { %468 = vmatprep.subr.mxu0 %v3187_v3  ;;  %539 = vmatprep.subr.mxu1 %v3188_v52  ;;  %v3197_v3 = vld [vmem:[#allocation5_spill] sm:$0xff] }
 0x138   :  { %469 = vmatpush1.msra.mxu0 %v3189_v48  ;;  %540 = vmatpush1.msra.mxu1 %v3190_v61  ;;  %v1506_v61 = vld [vmem:[%s3086_s0 + $0x20] sm:$0xff] }
 0x139   :  { %470 = vmatprep.subr.mxu0 %v3191_v62  ;;  %541 = vmatprep.subr.mxu1 %v3192_v63  ;;  %v1507_v63 = vld [vmem:[%s3086_s0 + $0x28] sm:$0xff] }
 0x13a   :  { %471 = vmatpush1.msra.mxu0 %v3193_v0  ;;  %504 = vmatprep.mubr.f32.mxu0 %v3194_v9 }
 0x13b   :  { %542 = vmatpush1.msra.mxu1 %v3195_v50  ;;  %575 = vmatprep.mubr.f32.mxu1 %v3194_v9 }
 0x13c   :  { %617 = vmatprep.subr.mxu0 %v3196_v56  ;;  %688 = vmatprep.subr.mxu1 %v3197_v3  ;;  %v1509_v3 = vld [vmem:[%s3086_s0 + $0x38] sm:$0xff] }
 0x1db   :  { %v329_v48 = vpop.f32.mrf.mxu0  ;;  %v400_v50 = vpop.f32.mrf.mxu1 }
 0x1dc   :  { %v405_v0 = vadd.f32 %v1506_v61, %v329_v48  ;;  %v407_v48 = vadd.f32 %v1508_v59, %v400_v50  ;;  %v3201_v50 = vld [vmem:[#allocation15_spill] sm:$0xff] }
 0x1dd   :  { %v331_v62 = vpop.f32.mrf.mxu0  ;;  %v402_v56 = vpop.f32.mrf.mxu1 }
 0x1de   :  { %v1510_v52 = vmul.f32 -1.442695, %v405_v0  ;;  %v406_v54 = vadd.f32 %v1507_v63, %v331_v62  ;;  %v408_v60 = vadd.f32 %v1509_v3, %v402_v56 }
 0x1e0   :  { %1579 = vpow2.f32 %v1510_v52  ;;  %v1511_v9 = vmul.f32 -1.442695, %v406_v54  ;;  %v1512_v58 = vmul.f32 -1.442695, %v408_v60  ;;  %v3200_v60 = vld [vmem:[#allocation7_spill] sm:$0xff] }
 0x1e2   :  { %1581 = vpow2.f32 %v1511_v9 }
 0x1e3   :  { %1583 = vpow2.f32 %v1512_v58 }
 0x1ed   :  { %v1580_v57 = vpop.eup %1579 }
 0x1ee   :  { %v412_v61 = vadd.f32 1.0, %v1580_v57 }
 0x1ef   :  { %v1582_v0 = vpop.eup %1581 }
 0x1f0   :  { %1585 = vrcp.f32 %v412_v61  ;;  %v418_v52 = vadd.f32 1.0, %v1582_v0  ;;  %v1584_v54 = vpop.eup %1583  ;;  %v3203_v61 = vld [vmem:[#allocation17_spill] sm:$0xff] }
 0x1f1   :  { %1587 = vtanh.f32 %v407_v48  ;;  %v425_v55 = vadd.f32 1.0, %v1584_v54  ;;  %v3202_v48 = vld [vmem:[#allocation8_spill] sm:$0xff]  ;;  %v3204_v0 = vld [vmem:[#allocation9_spill] sm:$0xff]  ;;  %v3206_v54 = vld [vmem:[#allocation10_spill] sm:$0xff] }
 0x1f2   :  { %1589 = vrcp.f32 %v418_v52  ;;  %v3205_v52 = vld [vmem:[#allocation18_spill] sm:$0xff] }
 0x1f3   :  { %1591 = vrcp.f32 %v425_v55  ;;  %v3199_v55 = vld [vmem:[#allocation13_spill] sm:$0xff] }
 0x1fd   :  { %v1586_v62 = vpop.eup %1585 }
 0x1fe   :  { %v1588_v63 = vpop.eup %1587 }
 0x1ff   :  { %v1590_v9 = vpop.eup %1589  ;;  %v429_v56 = vmul.f32 %v1588_v63, %v1586_v62  ;;  %v3207_v62 = vld [vmem:[#allocation19_spill] sm:$0xff]  ;;  %v3208_v63 = vld [vmem:[#allocation12_spill] sm:$0xff] }
 0x200   :  { %v428_v3 = vmul.f32 %v1590_v9, %v2239_v53  ;;  %v1592_v57 = vpop.eup %1591  ;;  %v3198_v53 = vld [vmem:[#allocation6_spill] sm:$0xff]  ;;  %v3209_v9 = vld [vmem:[#allocation20_spill] sm:$0xff] }
 0x202   :  { %v2324_v46 = vadd.f32 %v429_v56, %v428_v3  ;;  %v3210_v56 = vld [vmem:[#allocation14_spill] sm:$0xff]  ;;  %v3211_v3 = vld [vmem:[#allocation21_spill] sm:$0xff] }
 0x204   :  { %1593 = vtanh.f32 %v2324_v46 }
 0x211   :  { %v1594_v59 = vpop.eup %1593 }
 0x212   :  { %v432_v58 = vmul.f32 %v1594_v59, %v1592_v57  ;;  %v3212_v57 = vld [vmem:[#allocation16_spill] sm:$0xff]  ;;  %v3213_v59 = vmov 0.0  }
 0x214   :  { %1513 = vst [vmem:[%s3087_s2 + $0x8] sm:$0xff] %v432_v58  ;;  %505 = vmatmul.mubr.f32.vlgmr.msra.gmra.mxu0 %v432_v58  ;;  %576 = vmatmul.mubr.f32.vlgmr.msra.gmra.mxu1 %v432_v58  ;;  %v3214_v58 = vld [vmem:[#allocation22_spill] sm:$0xff] }
 0x215   :  { %618 = vmatpush1.msra.mxu0 %v1779_v1  ;;  %689 = vmatpush1.msra.mxu1 %v1833_v11 }
 0x216   :  { %619 = vmatprep.subr.mxu0 %v1784_v2  ;;  %690 = vmatprep.subr.mxu1 %v1845_v13 }
 0x217   :  { %620 = vmatpush1.msra.mxu0 %v1792_v4  ;;  %691 = vmatpush1.msra.mxu1 %v1850_v14 }
 0x218   :  { %621 = vmatprep.subr.mxu0 %v1798_v5  ;;  %692 = vmatprep.subr.mxu1 %v1862_v16 }
 0x219   :  { %622 = vmatpush1.msra.mxu0 %v1804_v6  ;;  %693 = vmatpush1.msra.mxu1 %v1874_v18 }
 0x21a   :  { %623 = vmatprep.subr.mxu0 %v1810_v7  ;;  %694 = vmatprep.subr.mxu1 %v1879_v19 }
 0x21b   :  { %624 = vmatpush1.msra.mxu0 %v1816_v8  ;;  %695 = vmatpush1.msra.mxu1 %v1891_v21 }
 0x21c   :  { %625 = vmatprep.subr.mxu0 %v1827_v10  ;;  %696 = vmatprep.subr.mxu1 %v1903_v23 }
 0x21d   :  { %626 = vmatpush1.msra.mxu0 %v1839_v12  ;;  %697 = vmatpush1.msra.mxu1 %v1915_v25 }
 0x21e   :  { %627 = vmatprep.subr.mxu0 %v1856_v15  ;;  %698 = vmatprep.subr.mxu1 %v1927_v27 }
 0x21f   :  { %628 = vmatpush1.msra.mxu0 %v1868_v17  ;;  %699 = vmatpush1.msra.mxu1 %v1939_v29 }
 0x220   :  { %629 = vmatprep.subr.mxu0 %v1885_v20  ;;  %700 = vmatprep.subr.mxu1 %v1951_v31 }
 0x221   :  { %630 = vmatpush1.msra.mxu0 %v1897_v22  ;;  %701 = vmatpush1.msra.mxu1 %v1963_v33 }
 0x222   :  { %631 = vmatprep.subr.mxu0 %v1909_v24  ;;  %702 = vmatprep.subr.mxu1 %v1975_v35 }
 0x223   :  { %632 = vmatpush1.msra.mxu0 %v1921_v26  ;;  %703 = vmatpush1.msra.mxu1 %v1987_v37 }
 0x224   :  { %633 = vmatprep.subr.mxu0 %v1933_v28  ;;  %704 = vmatprep.subr.mxu1 %v1999_v39 }
 0x225   :  { %634 = vmatpush1.msra.mxu0 %v1945_v30  ;;  %705 = vmatpush1.msra.mxu1 %v2011_v41 }
 0x226   :  { %635 = vmatprep.subr.mxu0 %v1957_v32  ;;  %706 = vmatprep.subr.mxu1 %v2023_v43 }
 0x227   :  { %636 = vmatpush1.msra.mxu0 %v1969_v34  ;;  %707 = vmatpush1.msra.mxu1 %v2035_v45 }
 0x228   :  { %637 = vmatprep.subr.mxu0 %v1981_v36  ;;  %708 = vmatprep.subr.mxu1 %v2047_v47 }
 0x229   :  { %638 = vmatpush1.msra.mxu0 %v1993_v38  ;;  %709 = vmatpush1.msra.mxu1 %v2059_v49 }
 0x22a   :  { %639 = vmatprep.subr.mxu0 %v2005_v40  ;;  %710 = vmatprep.subr.mxu1 %v2071_v51 }
 0x22b   :  { %640 = vmatpush1.msra.mxu0 %v2017_v42  ;;  %711 = vmatpush1.msra.mxu1 %v3178_v44 }
 0x22c   :  { %641 = vmatprep.subr.mxu0 %v3198_v53  ;;  %712 = vmatprep.subr.mxu1 %v3199_v55 }
 0x22d   :  { %642 = vmatpush1.msra.mxu0 %v3200_v60  ;;  %713 = vmatpush1.msra.mxu1 %v3201_v50 }
 0x22e   :  { %643 = vmatprep.subr.mxu0 %v3202_v48  ;;  %714 = vmatprep.subr.mxu1 %v3203_v61  ;;  %v1516_v48 = vld [vmem:[%s3086_s0 + $0x50] sm:$0xff] }
 0x22f   :  { %644 = vmatpush1.msra.mxu0 %v3204_v0  ;;  %715 = vmatpush1.msra.mxu1 %v3205_v52  ;;  %v3215_v52 = vld [vmem:[#allocation4_spill] sm:$0xff] }
 0x230   :  { %645 = vmatprep.subr.mxu0 %v3206_v54  ;;  %716 = vmatprep.subr.mxu1 %v3207_v62  ;;  %v3216_v54 = vld [vmem:[#allocation5_spill] sm:$0xff] }
 0x231   :  { %646 = vmatpush1.msra.mxu0 %v3208_v63  ;;  %717 = vmatpush1.msra.mxu1 %v3209_v9  ;;  %v1514_v9 = vld [vmem:[%s3086_s0 + $0x40] sm:$0xff] }
 0x232   :  { %647 = vmatprep.subr.mxu0 %v3210_v56  ;;  %718 = vmatprep.subr.mxu1 %v3211_v3  ;;  %v1515_v3 = vld [vmem:[%s3086_s0 + $0x48] sm:$0xff] }
 0x233   :  { %648 = vmatpush1.msra.mxu0 %v3212_v57  ;;  %681 = vmatprep.mubr.f32.mxu0 %v3213_v59 }
 0x234   :  { %719 = vmatpush1.msra.mxu1 %v3214_v58  ;;  %752 = vmatprep.mubr.f32.mxu1 %v3213_v59 }
 0x235   :  { %794 = vmatprep.subr.mxu0 %v3215_v52  ;;  %865 = vmatprep.subr.mxu1 %v3216_v54  ;;  %v1517_v52 = vld [vmem:[%s3086_s0 + $0x58] sm:$0xff] }
 0x2d4   :  { %v506_v63 = vpop.f32.mrf.mxu0  ;;  %v577_v58 = vpop.f32.mrf.mxu1 }
 0x2d5   :  { %v582_v57 = vadd.f32 %v1514_v9, %v506_v63  ;;  %v584_v63 = vadd.f32 %v1516_v48, %v577_v58 }
 0x2d6   :  { %v508_v56 = vpop.f32.mrf.mxu0  ;;  %v579_v54 = vpop.f32.mrf.mxu1 }
 0x2d7   :  { %v1518_v62 = vmul.f32 -1.442695, %v582_v57  ;;  %v583_v0 = vadd.f32 %v1515_v3, %v508_v56  ;;  %v585_v61 = vadd.f32 %v1517_v52, %v579_v54 }
 0x2d9   :  { %1595 = vpow2.f32 %v1518_v62  ;;  %v1519_v59 = vmul.f32 -1.442695, %v583_v0  ;;  %v1520_v50 = vmul.f32 -1.442695, %v585_v61 }
 0x2db   :  { %1597 = vpow2.f32 %v1519_v59 }
 0x2dc   :  { %1599 = vpow2.f32 %v1520_v50 }
 0x2e6   :  { %v1596_v60 = vpop.eup %1595 }
 0x2e7   :  { %v589_v9 = vadd.f32 1.0, %v1596_v60 }
 0x2e8   :  { %v1598_v57 = vpop.eup %1597 }
 0x2e9   :  { %1601 = vrcp.f32 %v589_v9  ;;  %v595_v62 = vadd.f32 1.0, %v1598_v57  ;;  %v1600_v0 = vpop.eup %1599  ;;  %v2508_v9 = vld [vmem:[%s3085_s1 + $0x1e0] sm:$0xff]  ;;  %v2520_v57 = vld [vmem:[%s3085_s1 + $0x1c8] sm:$0xff] }
 0x2ea   :  { %1603 = vtanh.f32 %v584_v63  ;;  %v602_v55 = vadd.f32 1.0, %v1600_v0  ;;  %v2532_v0 = vld [vmem:[%s3085_s1 + $0x1c0] sm:$0xff] }
 0x2eb   :  { %1605 = vrcp.f32 %v595_v62  ;;  %v2526_v62 = vld [vmem:[%s3085_s1 + $0x1d8] sm:$0xff] }
 0x2ec   :  { %1607 = vrcp.f32 %v602_v55 }
 0x2f6   :  { %v1602_v56 = vpop.eup %1601 }
 0x2f7   :  { %v1604_v3 = vpop.eup %1603 }
 0x2f8   :  { %v1606_v59 = vpop.eup %1605  ;;  %v606_v54 = vmul.f32 %v1604_v3, %v1602_v56  ;;  %v2538_v56 = vld [vmem:[%s3085_s1 + $0x1d0] sm:$0xff]  ;;  %v2544_v3 = vld [vmem:[%s3085_s1 + $0x1a8] sm:$0xff] }
 0x2f9   :  { %v605_v52 = vmul.f32 %v1606_v59, %v2324_v46  ;;  %v1608_v60 = vpop.eup %1607  ;;  %v2550_v59 = vld [vmem:[%s3085_s1 + $0x1b8] sm:$0xff] }
 0x2fb   :  { %v2409_v53 = vadd.f32 %v606_v54, %v605_v52  ;;  %v2556_v54 = vld [vmem:[%s3085_s1 + $0x1a0] sm:$0xff]  ;;  %v2562_v52 = vld [vmem:[%s3085_s1 + $0x1b0] sm:$0xff] }
 0x2fd   :  { %1609 = vtanh.f32 %v2409_v53 }
 0x30a   :  { %v1610_v48 = vpop.eup %1609 }
 0x30b   :  { %v609_v50 = vmul.f32 %v1610_v48, %v1608_v60  ;;  %v2568_v60 = vld [vmem:[%s3085_s1 + $0x188] sm:$0xff]  ;;  %v2574_v48 = vld [vmem:[%s3085_s1 + $0x198] sm:$0xff] }
 0x30d   :  { %1521 = vst [vmem:[%s3087_s2 + $0x10] sm:$0xff] %v609_v50  ;;  %682 = vmatmul.mubr.f32.vlgmr.msra.gmra.mxu0 %v609_v50  ;;  %753 = vmatmul.mubr.f32.vlgmr.msra.gmra.mxu1 %v609_v50  ;;  %v2580_v50 = vld [vmem:[%s3085_s1 + $0x180] sm:$0xff] }
 0x30e   :  { %795 = vmatpush1.msra.mxu0 %v1779_v1  ;;  %866 = vmatpush1.msra.mxu1 %v1833_v11  ;;  %v3217_v1 = vld [vmem:[#allocation6_spill] sm:$0xff] }
 0x30f   :  { %796 = vmatprep.subr.mxu0 %v1784_v2  ;;  %867 = vmatprep.subr.mxu1 %v1845_v13  ;;  %v3218_v2 = vld [vmem:[#allocation13_spill] sm:$0xff]  ;;  %v3225_v11 = vld [vmem:[#allocation10_spill] sm:$0xff]  ;;  %v3227_v13 = vld [vmem:[#allocation12_spill] sm:$0xff] }
 0x310   :  { %797 = vmatpush1.msra.mxu0 %v1792_v4  ;;  %868 = vmatpush1.msra.mxu1 %v1850_v14  ;;  %v3219_v4 = vld [vmem:[#allocation7_spill] sm:$0xff]  ;;  %v3228_v14 = vld [vmem:[#allocation20_spill] sm:$0xff] }
 0x311   :  { %798 = vmatprep.subr.mxu0 %v1798_v5  ;;  %869 = vmatprep.subr.mxu1 %v1862_v16  ;;  %v3220_v5 = vld [vmem:[#allocation15_spill] sm:$0xff]  ;;  %v3230_v16 = vld [vmem:[#allocation21_spill] sm:$0xff] }
 0x312   :  { %799 = vmatpush1.msra.mxu0 %v1804_v6  ;;  %870 = vmatpush1.msra.mxu1 %v1874_v18  ;;  %v3221_v6 = vld [vmem:[#allocation8_spill] sm:$0xff]  ;;  %v3232_v18 = vmov 0.0  }
 0x313   :  { %800 = vmatprep.subr.mxu0 %v1810_v7  ;;  %871 = vmatprep.subr.mxu1 %v1879_v19  ;;  %v3222_v7 = vld [vmem:[#allocation17_spill] sm:$0xff]  ;;  %v3233_v19 = vld [vmem:[#allocation22_spill] sm:$0xff] }
 0x314   :  { %801 = vmatpush1.msra.mxu0 %v1816_v8  ;;  %872 = vmatpush1.msra.mxu1 %v1891_v21  ;;  %v3223_v8 = vld [vmem:[#allocation9_spill] sm:$0xff] }
 0x315   :  { %802 = vmatprep.subr.mxu0 %v1827_v10  ;;  %873 = vmatprep.subr.mxu1 %v1903_v23  ;;  %v3224_v10 = vld [vmem:[#allocation18_spill] sm:$0xff]  ;;  %v3235_v21 = vld [vmem:[#allocation5_spill] sm:$0xff] }
 0x316   :  { %803 = vmatpush1.msra.mxu0 %v1839_v12  ;;  %874 = vmatpush1.msra.mxu1 %v1915_v25  ;;  %v3226_v12 = vld [vmem:[#allocation19_spill] sm:$0xff] }
 0x317   :  { %804 = vmatprep.subr.mxu0 %v1856_v15  ;;  %875 = vmatprep.subr.mxu1 %v1927_v27  ;;  %v3229_v15 = vld [vmem:[#allocation14_spill] sm:$0xff] }
 0x318   :  { %805 = vmatpush1.msra.mxu0 %v1868_v17  ;;  %876 = vmatpush1.msra.mxu1 %v1939_v29  ;;  %v3231_v17 = vld [vmem:[#allocation16_spill] sm:$0xff] }
 0x319   :  { %806 = vmatprep.subr.mxu0 %v1885_v20  ;;  %877 = vmatprep.subr.mxu1 %v1951_v31  ;;  %v2482_v20 = vld [vmem:[%s3085_s1 + $0x1e8] sm:$0xff]  ;;  %v1525_v31 = vld [vmem:[%s3086_s0 + $0x78] sm:$0xff] }
 0x31a   :  { %807 = vmatpush1.msra.mxu0 %v1897_v22  ;;  %878 = vmatpush1.msra.mxu1 %v1963_v33  ;;  %3234 = vst [vmem:[#allocation11_spill] sm:$0xff] %v2482_v20  ;;  %v1522_v22 = vld [vmem:[%s3086_s0 + $0x60] sm:$0xff] }
 0x31b   :  { %808 = vmatprep.subr.mxu0 %v1909_v24  ;;  %879 = vmatprep.subr.mxu1 %v1975_v35  ;;  %v1523_v24 = vld [vmem:[%s3086_s0 + $0x68] sm:$0xff] }
 0x31c   :  { %809 = vmatpush1.msra.mxu0 %v1921_v26  ;;  %880 = vmatpush1.msra.mxu1 %v1987_v37 }
 0x31d   :  { %810 = vmatprep.subr.mxu0 %v1933_v28  ;;  %881 = vmatprep.subr.mxu1 %v1999_v39 }
 0x31e   :  { %811 = vmatpush1.msra.mxu0 %v1945_v30  ;;  %882 = vmatpush1.msra.mxu1 %v2011_v41 }
 0x31f   :  { %812 = vmatprep.subr.mxu0 %v1957_v32  ;;  %883 = vmatprep.subr.mxu1 %v2023_v43 }
 0x320   :  { %813 = vmatpush1.msra.mxu0 %v1969_v34  ;;  %884 = vmatpush1.msra.mxu1 %v2035_v45  ;;  %v1524_v34 = vld [vmem:[%s3086_s0 + $0x70] sm:$0xff] }
 0x321   :  { %814 = vmatprep.subr.mxu0 %v1981_v36  ;;  %885 = vmatprep.subr.mxu1 %v2047_v47 }
 0x322   :  { %815 = vmatpush1.msra.mxu0 %v1993_v38  ;;  %886 = vmatpush1.msra.mxu1 %v2059_v49 }
 0x323   :  { %816 = vmatprep.subr.mxu0 %v2005_v40  ;;  %887 = vmatprep.subr.mxu1 %v2071_v51 }
 0x324   :  { %817 = vmatpush1.msra.mxu0 %v2017_v42  ;;  %888 = vmatpush1.msra.mxu1 %v3178_v44 }
 0x325   :  { %818 = vmatprep.subr.mxu0 %v3217_v1  ;;  %889 = vmatprep.subr.mxu1 %v3218_v2  ;;  %v2586_v1 = vld [vmem:[%s3085_s1 + $0x190] sm:$0xff] }
 0x326   :  { %819 = vmatpush1.msra.mxu0 %v3219_v4  ;;  %890 = vmatpush1.msra.mxu1 %v3220_v5  ;;  %v2592_v4 = vld [vmem:[%s3085_s1 + $0x168] sm:$0xff] }
 0x327   :  { %820 = vmatprep.subr.mxu0 %v3221_v6  ;;  %891 = vmatprep.subr.mxu1 %v3222_v7  ;;  %v2598_v6 = vld [vmem:[%s3085_s1 + $0x178] sm:$0xff] }
 0x328   :  { %821 = vmatpush1.msra.mxu0 %v3223_v8  ;;  %892 = vmatpush1.msra.mxu1 %v3224_v10  ;;  %v2604_v8 = vld [vmem:[%s3085_s1 + $0x160] sm:$0xff] }
 0x329   :  { %822 = vmatprep.subr.mxu0 %v3225_v11  ;;  %893 = vmatprep.subr.mxu1 %v3226_v12  ;;  %v2610_v11 = vld [vmem:[%s3085_s1 + $0x170] sm:$0xff] }
 0x32a   :  { %823 = vmatpush1.msra.mxu0 %v3227_v13  ;;  %894 = vmatpush1.msra.mxu1 %v3228_v14  ;;  %v2616_v13 = vld [vmem:[%s3085_s1 + $0x148] sm:$0xff] }
 0x32b   :  { %824 = vmatprep.subr.mxu0 %v3229_v15  ;;  %895 = vmatprep.subr.mxu1 %v3230_v16  ;;  %v2622_v15 = vld [vmem:[%s3085_s1 + $0x158] sm:$0xff] }
 0x32c   :  { %825 = vmatpush1.msra.mxu0 %v3231_v17  ;;  %858 = vmatprep.mubr.f32.mxu0 %v3232_v18  ;;  %v2628_v17 = vld [vmem:[%s3085_s1 + $0x140] sm:$0xff] }
 0x32d   :  { %896 = vmatpush1.msra.mxu1 %v3233_v19  ;;  %929 = vmatprep.mubr.f32.mxu1 %v3232_v18 }
 0x32e   :  { %971 = vmatprep.subr.mxu0 %v2482_v20  ;;  %1042 = vmatprep.subr.mxu1 %v3235_v21  ;;  %v2634_v21 = vld [vmem:[%s3085_s1 + $0x150] sm:$0xff] }
 0x3cd   :  { %v683_v23 = vpop.f32.mrf.mxu0  ;;  %v754_v29 = vpop.f32.mrf.mxu1 }
 0x3ce   :  { %v759_v25 = vadd.f32 %v1522_v22, %v683_v23  ;;  %v761_v37 = vadd.f32 %v1524_v34, %v754_v29  ;;  %v2640_v22 = vld [vmem:[%s3085_s1 + $0x128] sm:$0xff]  ;;  %v2646_v23 = vld [vmem:[%s3085_s1 + $0x138] sm:$0xff]  ;;  %v2682_v29 = vld [vmem:[%s3085_s1 + $0x110] sm:$0xff] }
 0x3cf   :  { %v685_v26 = vpop.f32.mrf.mxu0  ;;  %v756_v32 = vpop.f32.mrf.mxu1  ;;  %v2712_v34 = vld [vmem:[%s3085_s1 + $0xc8] sm:$0xff] }
 0x3d0   :  { %v1526_v27 = vmul.f32 -1.442695, %v759_v25  ;;  %v760_v28 = vadd.f32 %v1523_v24, %v685_v26  ;;  %v762_v33 = vadd.f32 %v1525_v31, %v756_v32  ;;  %v2652_v24 = vld [vmem:[%s3085_s1 + $0x120] sm:$0xff]  ;;  %v2658_v25 = vld [vmem:[%s3085_s1 + $0x130] sm:$0xff]  ;;  %v2664_v26 = vld [vmem:[%s3085_s1 + $0x108] sm:$0xff] }
 0x3d1   :  { %v2694_v31 = vld [vmem:[%s3085_s1 + $0xf8] sm:$0xff]  ;;  %v2700_v32 = vld [vmem:[%s3085_s1 + $0xe0] sm:$0xff] }
 0x3d2   :  { %1611 = vpow2.f32 %v1526_v27  ;;  %v1527_v30 = vmul.f32 -1.442695, %v760_v28  ;;  %v1528_v35 = vmul.f32 -1.442695, %v762_v33  ;;  %v2670_v27 = vld [vmem:[%s3085_s1 + $0x118] sm:$0xff]  ;;  %v2676_v28 = vld [vmem:[%s3085_s1 + $0x100] sm:$0xff] }
 0x3d3   :  { %v2706_v33 = vld [vmem:[%s3085_s1 + $0xf0] sm:$0xff] }
 0x3d4   :  { %1613 = vpow2.f32 %v1527_v30  ;;  %v2688_v30 = vld [vmem:[%s3085_s1 + $0xe8] sm:$0xff] }
 0x3d5   :  { %1615 = vpow2.f32 %v1528_v35  ;;  %v2718_v35 = vld [vmem:[%s3085_s1 + $0xd8] sm:$0xff] }
 0x3df   :  { %v1612_v36 = vpop.eup %1611 }
 0x3e0   :  { %v766_v38 = vadd.f32 1.0, %v1612_v36  ;;  %v2724_v36 = vld [vmem:[%s3085_s1 + $0xc0] sm:$0xff] }
 0x3e1   :  { %v1614_v39 = vpop.eup %1613 }
 0x3e2   :  { %1617 = vrcp.f32 %v766_v38  ;;  %v772_v40 = vadd.f32 1.0, %v1614_v39  ;;  %v1616_v41 = vpop.eup %1615  ;;  %v2736_v38 = vld [vmem:[%s3085_s1 + $0xa8] sm:$0xff]  ;;  %v2742_v39 = vld [vmem:[%s3085_s1 + $0xb8] sm:$0xff] }
 0x3e3   :  { %1619 = vtanh.f32 %v761_v37  ;;  %v779_v47 = vadd.f32 1.0, %v1616_v41  ;;  %v2730_v37 = vld [vmem:[%s3085_s1 + $0xd0] sm:$0xff] }
 0x3e4   :  { %1621 = vrcp.f32 %v772_v40  ;;  %v2748_v40 = vld [vmem:[%s3085_s1 + $0xa0] sm:$0xff]  ;;  %v2754_v41 = vld [vmem:[%s3085_s1 + $0xb0] sm:$0xff] }
 0x3e5   :  { %1623 = vrcp.f32 %v779_v47 }
 0x3ef   :  { %v1618_v42 = vpop.eup %1617 }
 0x3f0   :  { %v1620_v43 = vpop.eup %1619 }
 0x3f1   :  { %v1622_v45 = vpop.eup %1621  ;;  %v783_v49 = vmul.f32 %v1620_v43, %v1618_v42  ;;  %v2760_v42 = vld [vmem:[%s3085_s1 + $0x88] sm:$0xff]  ;;  %v2767_v43 = vld [vmem:[%s3085_s1 + $0x80] sm:$0xff] }
 0x3f2   :  { %v782_v46 = vmul.f32 %v1622_v45, %v2409_v53  ;;  %v1624_v61 = vpop.eup %1623  ;;  %v2514_v53 = vld [vmem:[%s3085_s1 + $0x1f0] sm:$0xff]  ;;  %v2774_v45 = vld [vmem:[%s3085_s1 + $0x68] sm:$0xff] }
 0x3f3   :  { %3236 = vst [vmem:[#allocation4_spill] sm:$0xff] %v2774_v45 }
 0x3f4   :  { %v2499_v55 = vadd.f32 %v783_v49, %v782_v46 }
 0x3f6   :  { %1625 = vtanh.f32 %v2499_v55 }
 0x403   :  { %v1626_v58 = vpop.eup %1625 }
 0x404   :  { %v786_v63 = vmul.f32 %v1626_v58, %v1624_v61 }
 0x406   :  { %1529 = vst [vmem:[%s3087_s2 + $0x18] sm:$0xff] %v786_v63  ;;  %859 = vmatmul.mubr.f32.vlgmr.msra.gmra.mxu0 %v786_v63  ;;  %930 = vmatmul.mubr.f32.vlgmr.msra.gmra.mxu1 %v786_v63 }
 0x407   :  { %972 = vmatpush1.msra.mxu0 %v2508_v9  ;;  %1043 = vmatpush1.msra.mxu1 %v2514_v53 }
 0x408   :  { %973 = vmatprep.subr.mxu0 %v2520_v57  ;;  %1044 = vmatprep.subr.mxu1 %v2526_v62 }
 0x409   :  { %974 = vmatpush1.msra.mxu0 %v2532_v0  ;;  %1045 = vmatpush1.msra.mxu1 %v2538_v56 }
 0x40a   :  { %975 = vmatprep.subr.mxu0 %v2544_v3  ;;  %1046 = vmatprep.subr.mxu1 %v2550_v59 }
 0x40b   :  { %976 = vmatpush1.msra.mxu0 %v2556_v54  ;;  %1047 = vmatpush1.msra.mxu1 %v2562_v52 }
 0x40c   :  { %977 = vmatprep.subr.mxu0 %v2568_v60  ;;  %1048 = vmatprep.subr.mxu1 %v2574_v48 }
 0x40d   :  { %978 = vmatpush1.msra.mxu0 %v2580_v50  ;;  %1049 = vmatpush1.msra.mxu1 %v2586_v1 }
 0x40e   :  { %979 = vmatprep.subr.mxu0 %v2592_v4  ;;  %1050 = vmatprep.subr.mxu1 %v2598_v6 }
 0x40f   :  { %980 = vmatpush1.msra.mxu0 %v2604_v8  ;;  %1051 = vmatpush1.msra.mxu1 %v2610_v11 }
 0x410   :  { %981 = vmatprep.subr.mxu0 %v2616_v13  ;;  %1052 = vmatprep.subr.mxu1 %v2622_v15 }
 0x411   :  { %982 = vmatpush1.msra.mxu0 %v2628_v17  ;;  %1053 = vmatpush1.msra.mxu1 %v2634_v21 }
 0x412   :  { %983 = vmatprep.subr.mxu0 %v2640_v22  ;;  %1054 = vmatprep.subr.mxu1 %v2646_v23 }
 0x413   :  { %984 = vmatpush1.msra.mxu0 %v2652_v24  ;;  %1055 = vmatpush1.msra.mxu1 %v2658_v25 }
 0x414   :  { %985 = vmatprep.subr.mxu0 %v2664_v26  ;;  %1056 = vmatprep.subr.mxu1 %v2670_v27 }
 0x415   :  { %986 = vmatpush1.msra.mxu0 %v2676_v28  ;;  %1057 = vmatpush1.msra.mxu1 %v2682_v29 }
 0x416   :  { %987 = vmatprep.subr.mxu0 %v2688_v30  ;;  %1058 = vmatprep.subr.mxu1 %v2694_v31 }
 0x417   :  { %988 = vmatpush1.msra.mxu0 %v2700_v32  ;;  %1059 = vmatpush1.msra.mxu1 %v2706_v33 }
 0x418   :  { %989 = vmatprep.subr.mxu0 %v2712_v34  ;;  %1060 = vmatprep.subr.mxu1 %v2718_v35 }
 0x419   :  { %990 = vmatpush1.msra.mxu0 %v2724_v36  ;;  %1061 = vmatpush1.msra.mxu1 %v2730_v37 }
 0x41a   :  { %991 = vmatprep.subr.mxu0 %v2736_v38  ;;  %1062 = vmatprep.subr.mxu1 %v2742_v39 }
 0x41b   :  { %992 = vmatpush1.msra.mxu0 %v2748_v40  ;;  %1063 = vmatpush1.msra.mxu1 %v2754_v41 }
 0x41c   :  { %993 = vmatprep.subr.mxu0 %v2760_v42  ;;  %1064 = vmatprep.subr.mxu1 %v2071_v51  ;;  %v2781_v51 = vld [vmem:[%s3085_s1 + $0x60] sm:$0xff] }
 0x41d   :  { %994 = vmatpush1.msra.mxu0 %v2767_v43  ;;  %1065 = vmatpush1.msra.mxu1 %v3178_v44  ;;  %3237 = vst [vmem:[#allocation6_spill] sm:$0xff] %v2781_v51  ;;  %v2788_v44 = vld [vmem:[%s3085_s1 + $0x48] sm:$0xff] }
 0x41e   :  { %995 = vmatprep.subr.mxu0 %v2774_v45  ;;  %1066 = vmatprep.subr.mxu1 %v3218_v2  ;;  %3238 = vst [vmem:[#allocation13_spill] sm:$0xff] %v2788_v44  ;;  %v2795_v2 = vld [vmem:[%s3085_s1 + $0x40] sm:$0xff] }
 0x41f   :  { %996 = vmatpush1.msra.mxu0 %v2781_v51  ;;  %1067 = vmatpush1.msra.mxu1 %v3220_v5  ;;  %3239 = vst [vmem:[#allocation7_spill] sm:$0xff] %v2795_v2  ;;  %v2802_v5 = vld [vmem:[%s3085_s1 + $0x28] sm:$0xff] }
 0x420   :  { %997 = vmatprep.subr.mxu0 %v2788_v44  ;;  %1068 = vmatprep.subr.mxu1 %v3222_v7  ;;  %3240 = vst [vmem:[#allocation15_spill] sm:$0xff] %v2802_v5  ;;  %v2809_v7 = vld [vmem:[%s3085_s1 + $0x20] sm:$0xff] }
 0x421   :  { %998 = vmatpush1.msra.mxu0 %v2795_v2  ;;  %1069 = vmatpush1.msra.mxu1 %v3224_v10  ;;  %3241 = vst [vmem:[#allocation8_spill] sm:$0xff] %v2809_v7  ;;  %v2816_v10 = vld [vmem:[%s3085_s1 + $0x8] sm:$0xff] }
 0x422   :  { %999 = vmatprep.subr.mxu0 %v2802_v5  ;;  %1070 = vmatprep.subr.mxu1 %v3226_v12  ;;  %3242 = vst [vmem:[#allocation17_spill] sm:$0xff] %v2816_v10  ;;  %v2823_v12 = vld [vmem:[%s3085_s1] sm:$0xff] }
 0x423   :  { %1000 = vmatpush1.msra.mxu0 %v2809_v7  ;;  %1071 = vmatpush1.msra.mxu1 %v3228_v14  ;;  %3243 = vst [vmem:[#allocation9_spill] sm:$0xff] %v2823_v12  ;;  %v2833_v14 = vld [vmem:[%s3085_s1 + $0x1f8] sm:$0xff] }
 0x424   :  { %1001 = vmatprep.subr.mxu0 %v2816_v10  ;;  %1072 = vmatprep.subr.mxu1 %v3230_v16  ;;  %3244 = vst [vmem:[#allocation18_spill] sm:$0xff] %v2833_v14  ;;  %v1530_v16 = vld [vmem:[%s3086_s0 + $0x80] sm:$0xff]  ;;  %v1532_v10 = vld [vmem:[%s3086_s0 + $0x90] sm:$0xff] }
 0x425   :  { %1002 = vmatpush1.msra.mxu0 %v2823_v12  ;;  %1035 = vmatprep.mubr.f32.mxu0 %v3232_v18 }
 0x426   :  { %1073 = vmatpush1.msra.mxu1 %v3233_v19  ;;  %1106 = vmatprep.mubr.f32.mxu1 %v3232_v18  ;;  %v1531_v19 = vld [vmem:[%s3086_s0 + $0x88] sm:$0xff] }
 0x427   :  { %1148 = vmatprep.subr.mxu0 %v2482_v20  ;;  %1219 = vmatprep.subr.mxu1 %v2833_v14  ;;  %v1533_v14 = vld [vmem:[%s3086_s0 + $0x98] sm:$0xff] }
 0x4c6   :  { %v860_v47 = vpop.f32.mrf.mxu0  ;;  %v931_v63 = vpop.f32.mrf.mxu1 }
 0x4c7   :  { %v936_v49 = vadd.f32 %v1530_v16, %v860_v47  ;;  %v938_v16 = vadd.f32 %v1532_v10, %v931_v63  ;;  %v2922_v63 = vld [vmem:[%s3085_s1 + $0x70] sm:$0xff] }
 0x4c8   :  { %v862_v46 = vpop.f32.mrf.mxu0  ;;  %v933_v18 = vpop.f32.mrf.mxu1  ;;  %3246 = vst [vmem:[#allocation19_spill] sm:$0xff] %v2922_v63 }
 0x4c9   :  { %v1534_v61 = vmul.f32 -1.442695, %v936_v49  ;;  %v937_v58 = vadd.f32 %v1531_v19, %v862_v46  ;;  %v939_v12 = vadd.f32 %v1533_v14, %v933_v18 }
 0x4cb   :  { %1627 = vpow2.f32 %v1534_v61  ;;  %v1535_v20 = vmul.f32 -1.442695, %v937_v58  ;;  %v1536_v7 = vmul.f32 -1.442695, %v939_v12  ;;  %v2915_v12 = vld [vmem:[%s3085_s1 + $0x78] sm:$0xff] }
 0x4cc   :  { %3245 = vst [vmem:[#allocation10_spill] sm:$0xff] %v2915_v12 }
 0x4cd   :  { %1629 = vpow2.f32 %v1535_v20 }
 0x4ce   :  { %1631 = vpow2.f32 %v1536_v7 }
 0x4d8   :  { %v1628_v5 = vpop.eup %1627 }
 0x4d9   :  { %v943_v47 = vadd.f32 1.0, %v1628_v5 }
 0x4da   :  { %v1630_v49 = vpop.eup %1629 }
 0x4db   :  { %1633 = vrcp.f32 %v943_v47  ;;  %v949_v19 = vadd.f32 1.0, %v1630_v49  ;;  %v1632_v20 = vpop.eup %1631  ;;  %v2929_v47 = vld [vmem:[%s3085_s1 + $0x58] sm:$0xff] }
 0x4dc   :  { %1635 = vtanh.f32 %v938_v16  ;;  %v956_v2 = vadd.f32 1.0, %v1632_v20  ;;  %v3247_v16 = vld [vmem:[#allocation13_spill] sm:$0xff]  ;;  %3248 = vst [vmem:[#allocation12_spill] sm:$0xff] %v2929_v47  ;;  %v3249_v49 = vld [vmem:[#allocation7_spill] sm:$0xff] }
 0x4dd   :  { %1637 = vrcp.f32 %v949_v19  ;;  %v2936_v19 = vld [vmem:[%s3085_s1 + $0x50] sm:$0xff]  ;;  %v3251_v20 = vld [vmem:[#allocation15_spill] sm:$0xff] }
 0x4de   :  { %1639 = vrcp.f32 %v956_v2  ;;  %v2908_v2 = vld [vmem:[%s3085_s1 + $0x90] sm:$0xff]  ;;  %3250 = vst [vmem:[#allocation20_spill] sm:$0xff] %v2936_v19 }
 0x4e8   :  { %v1634_v46 = vpop.eup %1633 }
 0x4e9   :  { %v1636_v61 = vpop.eup %1635 }
 0x4ea   :  { %v1638_v58 = vpop.eup %1637  ;;  %v960_v18 = vmul.f32 %v1636_v61, %v1634_v46  ;;  %v2943_v46 = vld [vmem:[%s3085_s1 + $0x38] sm:$0xff]  ;;  %v3253_v61 = vld [vmem:[#allocation8_spill] sm:$0xff] }
 0x4eb   :  { %v959_v14 = vmul.f32 %v1638_v58, %v2499_v55  ;;  %v1640_v5 = vpop.eup %1639  ;;  %v2901_v55 = vld [vmem:[%s3085_s1 + $0x98] sm:$0xff]  ;;  %3252 = vst [vmem:[#allocation14_spill] sm:$0xff] %v2943_v46  ;;  %v2950_v58 = vld [vmem:[%s3085_s1 + $0x30] sm:$0xff] }
 0x4ec   :  { %3254 = vst [vmem:[#allocation21_spill] sm:$0xff] %v2950_v58 }
 0x4ed   :  { %v2849_v44 = vadd.f32 %v960_v18, %v959_v14  ;;  %v3255_v18 = vld [vmem:[#allocation17_spill] sm:$0xff]  ;;  %v2957_v14 = vld [vmem:[%s3085_s1 + $0x18] sm:$0xff] }
 0x4ee   :  { %3256 = vst [vmem:[#allocation16_spill] sm:$0xff] %v2957_v14 }
 0x4ef   :  { %1641 = vtanh.f32 %v2849_v44 }
 0x4fc   :  { %v1642_v10 = vpop.eup %1641 }
 0x4fd   :  { %v963_v7 = vmul.f32 %v1642_v10, %v1640_v5  ;;  %v3257_v5 = vld [vmem:[#allocation9_spill] sm:$0xff]  ;;  %v3258_v10 = vmov 0.0  }
 0x4ff   :  { %1537 = vst [vmem:[%s3087_s2 + $0x20] sm:$0xff] %v963_v7  ;;  %1036 = vmatmul.mubr.f32.vlgmr.msra.gmra.mxu0 %v963_v7  ;;  %1107 = vmatmul.mubr.f32.vlgmr.msra.gmra.mxu1 %v963_v7  ;;  %v2965_v7 = vld [vmem:[%s3085_s1 + $0x10] sm:$0xff] }
 0x500   :  { %1149 = vmatpush1.msra.mxu0 %v2508_v9  ;;  %1220 = vmatpush1.msra.mxu1 %v2514_v53  ;;  %3259 = vst [vmem:[#allocation22_spill] sm:$0xff] %v2965_v7 }
 0x501   :  { %1150 = vmatprep.subr.mxu0 %v2520_v57  ;;  %1221 = vmatprep.subr.mxu1 %v2526_v62 }
 0x502   :  { %1151 = vmatpush1.msra.mxu0 %v2532_v0  ;;  %1222 = vmatpush1.msra.mxu1 %v2538_v56 }
 0x503   :  { %1152 = vmatprep.subr.mxu0 %v2544_v3  ;;  %1223 = vmatprep.subr.mxu1 %v2550_v59 }
 0x504   :  { %1153 = vmatpush1.msra.mxu0 %v2556_v54  ;;  %1224 = vmatpush1.msra.mxu1 %v2562_v52 }
 0x505   :  { %1154 = vmatprep.subr.mxu0 %v2568_v60  ;;  %1225 = vmatprep.subr.mxu1 %v2574_v48 }
 0x506   :  { %1155 = vmatpush1.msra.mxu0 %v2580_v50  ;;  %1226 = vmatpush1.msra.mxu1 %v2586_v1 }
 0x507   :  { %1156 = vmatprep.subr.mxu0 %v2592_v4  ;;  %1227 = vmatprep.subr.mxu1 %v2598_v6 }
 0x508   :  { %1157 = vmatpush1.msra.mxu0 %v2604_v8  ;;  %1228 = vmatpush1.msra.mxu1 %v2610_v11 }
 0x509   :  { %1158 = vmatprep.subr.mxu0 %v2616_v13  ;;  %1229 = vmatprep.subr.mxu1 %v2622_v15 }
 0x50a   :  { %1159 = vmatpush1.msra.mxu0 %v2628_v17  ;;  %1230 = vmatpush1.msra.mxu1 %v2634_v21 }
 0x50b   :  { %1160 = vmatprep.subr.mxu0 %v2640_v22  ;;  %1231 = vmatprep.subr.mxu1 %v2646_v23 }
 0x50c   :  { %1161 = vmatpush1.msra.mxu0 %v2652_v24  ;;  %1232 = vmatpush1.msra.mxu1 %v2658_v25 }
 0x50d   :  { %1162 = vmatprep.subr.mxu0 %v2664_v26  ;;  %1233 = vmatprep.subr.mxu1 %v2670_v27 }
 0x50e   :  { %1163 = vmatpush1.msra.mxu0 %v2676_v28  ;;  %1234 = vmatpush1.msra.mxu1 %v2682_v29 }
 0x50f   :  { %1164 = vmatprep.subr.mxu0 %v2688_v30  ;;  %1235 = vmatprep.subr.mxu1 %v2694_v31 }
 0x510   :  { %1165 = vmatpush1.msra.mxu0 %v2700_v32  ;;  %1236 = vmatpush1.msra.mxu1 %v2706_v33 }
 0x511   :  { %1166 = vmatprep.subr.mxu0 %v2712_v34  ;;  %1237 = vmatprep.subr.mxu1 %v2718_v35 }
 0x512   :  { %1167 = vmatpush1.msra.mxu0 %v2724_v36  ;;  %1238 = vmatpush1.msra.mxu1 %v2730_v37 }
 0x513   :  { %1168 = vmatprep.subr.mxu0 %v2736_v38  ;;  %1239 = vmatprep.subr.mxu1 %v2742_v39 }
 0x514   :  { %1169 = vmatpush1.msra.mxu0 %v2748_v40  ;;  %1240 = vmatpush1.msra.mxu1 %v2754_v41 }
 0x515   :  { %1170 = vmatprep.subr.mxu0 %v2760_v42  ;;  %1241 = vmatprep.subr.mxu1 %v2901_v55 }
 0x516   :  { %1171 = vmatpush1.msra.mxu0 %v2767_v43  ;;  %1242 = vmatpush1.msra.mxu1 %v2908_v2 }
 0x517   :  { %1172 = vmatprep.subr.mxu0 %v2774_v45  ;;  %1243 = vmatprep.subr.mxu1 %v2915_v12 }
 0x518   :  { %1173 = vmatpush1.msra.mxu0 %v2781_v51  ;;  %1244 = vmatpush1.msra.mxu1 %v2922_v63 }
 0x519   :  { %1174 = vmatprep.subr.mxu0 %v3247_v16  ;;  %1245 = vmatprep.subr.mxu1 %v2929_v47  ;;  %v1540_v16 = vld [vmem:[%s3086_s0 + $0xb0] sm:$0xff] }
 0x51a   :  { %1175 = vmatpush1.msra.mxu0 %v3249_v49  ;;  %1246 = vmatpush1.msra.mxu1 %v2936_v19 }
 0x51b   :  { %1176 = vmatprep.subr.mxu0 %v3251_v20  ;;  %1247 = vmatprep.subr.mxu1 %v2943_v46 }
 0x51c   :  { %1177 = vmatpush1.msra.mxu0 %v3253_v61  ;;  %1248 = vmatpush1.msra.mxu1 %v2950_v58  ;;  %v3261_v58 = vld [vmem:[#allocation18_spill] sm:$0xff]  ;;  %v1539_v61 = vld [vmem:[%s3086_s0 + $0xa8] sm:$0xff] }
 0x51d   :  { %1178 = vmatprep.subr.mxu0 %v3255_v18  ;;  %1249 = vmatprep.subr.mxu1 %v2957_v14  ;;  %v3260_v18 = vld [vmem:[#allocation11_spill] sm:$0xff]  ;;  %v1538_v14 = vld [vmem:[%s3086_s0 + $0xa0] sm:$0xff] }
 0x51e   :  { %1179 = vmatpush1.msra.mxu0 %v3257_v5  ;;  %1212 = vmatprep.mubr.f32.mxu0 %v3258_v10 }
 0x51f   :  { %1250 = vmatpush1.msra.mxu1 %v2965_v7  ;;  %1283 = vmatprep.mubr.f32.mxu1 %v3258_v10 }
 0x520   :  { %1325 = vmatprep.subr.mxu0 %v3260_v18  ;;  %1396 = vmatprep.subr.mxu1 %v3261_v58  ;;  %v1541_v58 = vld [vmem:[%s3086_s0 + $0xb8] sm:$0xff] }
 0x5bf   :  { %v1037_v5 = vpop.f32.mrf.mxu0  ;;  %v1108_v7 = vpop.f32.mrf.mxu1 }
 0x5c0   :  { %v1113_v46 = vadd.f32 %v1538_v14, %v1037_v5  ;;  %v1115_v14 = vadd.f32 %v1540_v16, %v1108_v7 }
 0x5c1   :  { %v1039_v20 = vpop.f32.mrf.mxu0  ;;  %v1110_v18 = vpop.f32.mrf.mxu1 }
 0x5c2   :  { %v1542_v19 = vmul.f32 -1.442695, %v1113_v46  ;;  %v1114_v49 = vadd.f32 %v1539_v61, %v1039_v20  ;;  %v1116_v47 = vadd.f32 %v1541_v58, %v1110_v18 }
 0x5c4   :  { %1643 = vpow2.f32 %v1542_v19  ;;  %v1543_v10 = vmul.f32 -1.442695, %v1114_v49  ;;  %v1544_v63 = vmul.f32 -1.442695, %v1116_v47 }
 0x5c6   :  { %1645 = vpow2.f32 %v1543_v10 }
 0x5c7   :  { %1647 = vpow2.f32 %v1544_v63 }
 0x5d1   :  { %v1644_v51 = vpop.eup %1643 }
 0x5d2   :  { %v1120_v5 = vadd.f32 1.0, %v1644_v51 }
 0x5d3   :  { %v1646_v46 = vpop.eup %1645 }
 0x5d4   :  { %1649 = vrcp.f32 %v1120_v5  ;;  %v1126_v19 = vadd.f32 1.0, %v1646_v46  ;;  %v1648_v49 = vpop.eup %1647 }
 0x5d5   :  { %1651 = vtanh.f32 %v1115_v14  ;;  %v1133_v12 = vadd.f32 1.0, %v1648_v49 }
 0x5d6   :  { %1653 = vrcp.f32 %v1126_v19 }
 0x5d7   :  { %1655 = vrcp.f32 %v1133_v12  ;;  %v1554_v12 = vld [vmem:[%s3086_s0 + $0xe0] sm:$0xff] }
 0x5e1   :  { %v1650_v20 = vpop.eup %1649 }
 0x5e2   :  { %v1652_v61 = vpop.eup %1651 }
 0x5e3   :  { %v1654_v10 = vpop.eup %1653  ;;  %v1137_v58 = vmul.f32 %v1652_v61, %v1650_v20  ;;  %v1557_v20 = vld [vmem:[%s3086_s0 + $0xf8] sm:$0xff] }
 0x5e4   :  { %v1136_v18 = vmul.f32 %v1654_v10, %v2849_v44  ;;  %v1656_v51 = vpop.eup %1655 }
 0x5e6   :  { %v2984_v45 = vadd.f32 %v1137_v58, %v1136_v18  ;;  %v1556_v58 = vld [vmem:[%s3086_s0 + $0xf0] sm:$0xff] }
 0x5e8   :  { %1657 = vtanh.f32 %v2984_v45 }
 0x5f5   :  { %v1658_v16 = vpop.eup %1657 }
 0x5f6   :  { %v1140_v63 = vmul.f32 %v1658_v16, %v1656_v51 }
 0x5f8   :  { %1545 = vst [vmem:[%s3087_s2 + $0x28] sm:$0xff] %v1140_v63  ;;  %1213 = vmatmul.mubr.f32.vlgmr.msra.gmra.mxu0 %v1140_v63  ;;  %1284 = vmatmul.mubr.f32.vlgmr.msra.gmra.mxu1 %v1140_v63 }
 0x5f9   :  { %1326 = vmatpush1.msra.mxu0 %v2508_v9  ;;  %1397 = vmatpush1.msra.mxu1 %v2514_v53  ;;  %v3262_v9 = vld [vmem:[#allocation4_spill] sm:$0xff]  ;;  %v3263_v53 = vld [vmem:[#allocation10_spill] sm:$0xff] }
 0x5fa   :  { %1327 = vmatprep.subr.mxu0 %v2520_v57  ;;  %1398 = vmatprep.subr.mxu1 %v2526_v62  ;;  %v3264_v57 = vld [vmem:[#allocation6_spill] sm:$0xff]  ;;  %v3265_v62 = vld [vmem:[#allocation19_spill] sm:$0xff] }
 0x5fb   :  { %1328 = vmatpush1.msra.mxu0 %v2532_v0  ;;  %1399 = vmatpush1.msra.mxu1 %v2538_v56  ;;  %v3266_v0 = vld [vmem:[#allocation13_spill] sm:$0xff]  ;;  %v3267_v56 = vld [vmem:[#allocation12_spill] sm:$0xff] }
 0x5fc   :  { %1329 = vmatprep.subr.mxu0 %v2544_v3  ;;  %1400 = vmatprep.subr.mxu1 %v2550_v59  ;;  %v3268_v3 = vld [vmem:[#allocation7_spill] sm:$0xff]  ;;  %v3269_v59 = vld [vmem:[#allocation20_spill] sm:$0xff] }
 0x5fd   :  { %1330 = vmatpush1.msra.mxu0 %v2556_v54  ;;  %1401 = vmatpush1.msra.mxu1 %v2562_v52  ;;  %v3270_v54 = vld [vmem:[#allocation15_spill] sm:$0xff]  ;;  %v3271_v52 = vld [vmem:[#allocation14_spill] sm:$0xff] }
 0x5fe   :  { %1331 = vmatprep.subr.mxu0 %v2568_v60  ;;  %1402 = vmatprep.subr.mxu1 %v2574_v48  ;;  %v3272_v60 = vld [vmem:[#allocation8_spill] sm:$0xff]  ;;  %v3273_v48 = vld [vmem:[#allocation21_spill] sm:$0xff] }
 0x5ff   :  { %1332 = vmatpush1.msra.mxu0 %v2580_v50  ;;  %1403 = vmatpush1.msra.mxu1 %v2586_v1  ;;  %v3274_v50 = vld [vmem:[#allocation17_spill] sm:$0xff]  ;;  %v3275_v1 = vld [vmem:[#allocation16_spill] sm:$0xff] }
 0x600   :  { %1333 = vmatprep.subr.mxu0 %v2592_v4  ;;  %1404 = vmatprep.subr.mxu1 %v2598_v6  ;;  %v3276_v4 = vld [vmem:[#allocation9_spill] sm:$0xff]  ;;  %v3277_v6 = vmov 0.0  }
 0x601   :  { %1334 = vmatpush1.msra.mxu0 %v2604_v8  ;;  %1405 = vmatpush1.msra.mxu1 %v2610_v11  ;;  %v3278_v8 = vld [vmem:[#allocation22_spill] sm:$0xff]  ;;  %v1546_v11 = vld [vmem:[%s3086_s0 + $0xc0] sm:$0xff] }
 0x602   :  { %1335 = vmatprep.subr.mxu0 %v2616_v13  ;;  %1406 = vmatprep.subr.mxu1 %v2622_v15  ;;  %v1547_v15 = vld [vmem:[%s3086_s0 + $0xc8] sm:$0xff] }
 0x603   :  { %1336 = vmatpush1.msra.mxu0 %v2628_v17  ;;  %1407 = vmatpush1.msra.mxu1 %v2634_v21 }
 0x604   :  { %1337 = vmatprep.subr.mxu0 %v2640_v22  ;;  %1408 = vmatprep.subr.mxu1 %v2646_v23 }
 0x605   :  { %1338 = vmatpush1.msra.mxu0 %v2652_v24  ;;  %1409 = vmatpush1.msra.mxu1 %v2658_v25 }
 0x606   :  { %1339 = vmatprep.subr.mxu0 %v2664_v26  ;;  %1410 = vmatprep.subr.mxu1 %v2670_v27  ;;  %v1549_v26 = vld [vmem:[%s3086_s0 + $0xd8] sm:$0xff] }
 0x607   :  { %1340 = vmatpush1.msra.mxu0 %v2676_v28  ;;  %1411 = vmatpush1.msra.mxu1 %v2682_v29  ;;  %v1548_v29 = vld [vmem:[%s3086_s0 + $0xd0] sm:$0xff] }
 0x608   :  { %1341 = vmatprep.subr.mxu0 %v2688_v30  ;;  %1412 = vmatprep.subr.mxu1 %v2694_v31 }
 0x609   :  { %1342 = vmatpush1.msra.mxu0 %v2700_v32  ;;  %1413 = vmatpush1.msra.mxu1 %v2706_v33 }
 0x60a   :  { %1343 = vmatprep.subr.mxu0 %v2712_v34  ;;  %1414 = vmatprep.subr.mxu1 %v2718_v35 }
 0x60b   :  { %1344 = vmatpush1.msra.mxu0 %v2724_v36  ;;  %1415 = vmatpush1.msra.mxu1 %v2730_v37 }
 0x60c   :  { %1345 = vmatprep.subr.mxu0 %v2736_v38  ;;  %1416 = vmatprep.subr.mxu1 %v2742_v39 }
 0x60d   :  { %1346 = vmatpush1.msra.mxu0 %v2748_v40  ;;  %1417 = vmatpush1.msra.mxu1 %v2754_v41 }
 0x60e   :  { %1347 = vmatprep.subr.mxu0 %v2760_v42  ;;  %1418 = vmatprep.subr.mxu1 %v2901_v55 }
 0x60f   :  { %1348 = vmatpush1.msra.mxu0 %v2767_v43  ;;  %1419 = vmatpush1.msra.mxu1 %v2908_v2 }
 0x610   :  { %1349 = vmatprep.subr.mxu0 %v3262_v9  ;;  %1420 = vmatprep.subr.mxu1 %v3263_v53 }
 0x611   :  { %1350 = vmatpush1.msra.mxu0 %v3264_v57  ;;  %1421 = vmatpush1.msra.mxu1 %v3265_v62 }
 0x612   :  { %1351 = vmatprep.subr.mxu0 %v3266_v0  ;;  %1422 = vmatprep.subr.mxu1 %v3267_v56 }
 0x613   :  { %1352 = vmatpush1.msra.mxu0 %v3268_v3  ;;  %1423 = vmatpush1.msra.mxu1 %v3269_v59 }
 0x614   :  { %1353 = vmatprep.subr.mxu0 %v3270_v54  ;;  %1424 = vmatprep.subr.mxu1 %v3271_v52 }
 0x615   :  { %1354 = vmatpush1.msra.mxu0 %v3272_v60  ;;  %1425 = vmatpush1.msra.mxu1 %v3273_v48 }
 0x616   :  { %1355 = vmatprep.subr.mxu0 %v3274_v50  ;;  %1426 = vmatprep.subr.mxu1 %v3275_v1 }
 0x617   :  { %1356 = vmatpush1.msra.mxu0 %v3276_v4  ;;  %1389 = vmatprep.mubr.f32.mxu0 %v3277_v6 }
 0x618   :  { %1427 = vmatpush1.msra.mxu1 %v3278_v8  ;;  %1460 = vmatprep.mubr.f32.mxu1 %v3277_v6 }
 0x6b8   :  { %v1214_v13 = vpop.f32.mrf.mxu0  ;;  %v1285_v24 = vpop.f32.mrf.mxu1 }
 0x6b9   :  { %v1290_v17 = vadd.f32 %v1546_v11, %v1214_v13  ;;  %v1292_v32 = vadd.f32 %v1548_v29, %v1285_v24 }
 0x6ba   :  { %v1216_v21 = vpop.f32.mrf.mxu0  ;;  %v1287_v27 = vpop.f32.mrf.mxu1 }
 0x6bb   :  { %v1550_v22 = vmul.f32 -1.442695, %v1290_v17  ;;  %v1291_v23 = vadd.f32 %v1547_v15, %v1216_v21  ;;  %v1293_v28 = vadd.f32 %v1549_v26, %v1287_v27 }
 0x6bd   :  { %1659 = vpow2.f32 %v1550_v22  ;;  %v1551_v25 = vmul.f32 -1.442695, %v1291_v23  ;;  %v1552_v30 = vmul.f32 -1.442695, %v1293_v28 }
 0x6bf   :  { %1661 = vpow2.f32 %v1551_v25 }
 0x6c0   :  { %1663 = vpow2.f32 %v1552_v30 }
 0x6ca   :  { %v1660_v31 = vpop.eup %1659 }
 0x6cb   :  { %v1297_v33 = vadd.f32 1.0, %v1660_v31 }
 0x6cc   :  { %v1662_v34 = vpop.eup %1661 }
 0x6cd   :  { %1665 = vrcp.f32 %v1297_v33  ;;  %v1303_v35 = vadd.f32 1.0, %v1662_v34  ;;  %v1664_v36 = vpop.eup %1663 }
 0x6ce   :  { %1667 = vtanh.f32 %v1292_v32  ;;  %v1310_v40 = vadd.f32 1.0, %v1664_v36 }
 0x6cf   :  { %1669 = vrcp.f32 %v1303_v35 }
 0x6d0   :  { %1671 = vrcp.f32 %v1310_v40 }
 0x6da   :  { %v1666_v37 = vpop.eup %1665 }
 0x6db   :  { %v1668_v38 = vpop.eup %1667 }
 0x6dc   :  { %v1670_v39 = vpop.eup %1669  ;;  %v1314_v41 = vmul.f32 %v1668_v38, %v1666_v37 }
 0x6dd   :  { %v1313_v42 = vmul.f32 %v1670_v39, %v2984_v45  ;;  %v1672_v44 = vpop.eup %1671  ;;  %v1555_v45 = vld [vmem:[%s3086_s0 + $0xe8] sm:$0xff] }
 0x6df   :  { %v1315_v43 = vadd.f32 %v1314_v41, %v1313_v42 }
 0x6e1   :  { %1673 = vtanh.f32 %v1315_v43 }
 0x6ee   :  { %v1674_v55 = vpop.eup %1673 }
 0x6ef   :  { %v1317_v2 = vmul.f32 %v1674_v55, %v1672_v44 }
 0x6f1   :  { %1553 = vst [vmem:[%s3087_s2 + $0x30] sm:$0xff] %v1317_v2  ;;  %1390 = vmatmul.mubr.f32.vlgmr.msra.gmra.mxu0 %v1317_v2  ;;  %1461 = vmatmul.mubr.f32.vlgmr.msra.gmra.mxu1 %v1317_v2 }
 0x7b1   :  { %v1391_v47 = vpop.f32.mrf.mxu0  ;;  %v1462_v19 = vpop.f32.mrf.mxu1 }
 0x7b2   :  { %v1467_v7 = vadd.f32 %v1554_v12, %v1391_v47  ;;  %v1469_v16 = vadd.f32 %v1556_v58, %v1462_v19 }
 0x7b3   :  { %v1393_v14 = vpop.f32.mrf.mxu0  ;;  %v1464_v61 = vpop.f32.mrf.mxu1 }
 0x7b4   :  { %v1558_v5 = vmul.f32 -1.442695, %v1467_v7  ;;  %v1468_v46 = vadd.f32 %v1555_v45, %v1393_v14  ;;  %v1470_v10 = vadd.f32 %v1557_v20, %v1464_v61 }
 0x7b6   :  { %1675 = vpow2.f32 %v1558_v5  ;;  %v1559_v49 = vmul.f32 -1.442695, %v1468_v46  ;;  %v1560_v18 = vmul.f32 -1.442695, %v1470_v10 }
 0x7b8   :  { %1677 = vpow2.f32 %v1559_v49 }
 0x7b9   :  { %1679 = vpow2.f32 %v1560_v18 }
 0x7c3   :  { %v1676_v51 = vpop.eup %1675 }
 0x7c4   :  { %v1474_v63 = vadd.f32 1.0, %v1676_v51 }
 0x7c5   :  { %v1678_v9 = vpop.eup %1677 }
 0x7c6   :  { %1681 = vrcp.f32 %v1474_v63  ;;  %v1480_v53 = vadd.f32 1.0, %v1678_v9  ;;  %v1680_v57 = vpop.eup %1679 }
 0x7c7   :  { %1683 = vtanh.f32 %v1469_v16  ;;  %v1487_v3 = vadd.f32 1.0, %v1680_v57 }
 0x7c8   :  { %1685 = vrcp.f32 %v1480_v53 }
 0x7c9   :  { %1687 = vrcp.f32 %v1487_v3 }
 0x7d3   :  { %v1682_v62 = vpop.eup %1681 }
 0x7d4   :  { %v1684_v0 = vpop.eup %1683 }
 0x7d5   :  { %v1686_v56 = vpop.eup %1685  ;;  %v1491_v59 = vmul.f32 %v1684_v0, %v1682_v62 }
 0x7d6   :  { %v1490_v54 = vmul.f32 %v1686_v56, %v1315_v43  ;;  %v1688_v60 = vpop.eup %1687 }
 0x7d8   :  { %v1492_v52 = vadd.f32 %v1491_v59, %v1490_v54 }
 0x7da   :  { %1689 = vtanh.f32 %v1492_v52 }
 0x7e7   :  { %v1690_v48 = vpop.eup %1689 }
 0x7e8   :  { %v1494_v50 = vmul.f32 %v1690_v48, %v1688_v60 }
 0x7ea   :  { %1561 = vst [vmem:[%s3087_s2 + $0x38] sm:$0xff] %v1494_v50 }

// kernel: lstm_model_forward.7
= control target key start
LH: loop header
LB: loop body
LE: loop exit
PB: predicated region body
PF: predicated region fallthrough
CT: control target
= control target key end

     0   :  { %v3289_v3 = vmov 0.0   ;;  %vm1891_vm0 = vmmov 0   ;;  %s3282_s1 = inlined_call_operand.vmem [shape: f32[128,512], index: 1, kind: input, shape index: {}]   ;;  %s3283_s0 = inlined_call_operand.vmem [shape: f32[8,8,512], index: 0, kind: input, shape index: {}]   ;;  %s3284_s2 = inlined_call_operand.vmem [shape: f32[128,128], index: 2, kind: input, shape index: {}]   ;;  %s3285_s3 = inlined_call_operand.vmem [shape: f32[1,128], index: 3, kind: input, shape index: {}]   ;;  %s3286_s4 = inlined_call_operand.vmem [shape: f32[8,128], index: 4, kind: output, shape index: {}]  }
   0x1   :  { %v1920_v0 = vld [vmem:[%s3282_s1 + $0x1e8] sm:$0xff]  ;;  %v1925_v1 = vld [vmem:[%s3282_s1 + $0x1e0] sm:$0xff]  ;;  %157 = vmatprep.mubr.f32.mxu0 %v3289_v3  ;;  %228 = vmatprep.mubr.f32.mxu1 %v3289_v3  ;;  %v1967_v9 = vld [vmem:[%s3282_s1 + $0x1f8] sm:$0xff] }
   0x2   :  { %3351 = vst [vmem:[#allocation4_spill] sm:$0xff] %v1920_v0  ;;  %v1930_v2 = vld [vmem:[%s3282_s1 + $0x1c8] sm:$0xff]  ;;  %93 = vmatprep.subr.mxu0 %v1920_v0  ;;  %v1938_v4 = vld [vmem:[%s3282_s1 + $0x1c0] sm:$0xff]  ;;  %3352 = vst [vmem:[#allocation5_spill] sm:$0xff] %v1967_v9  ;;  %164 = vmatprep.subr.mxu1 %v1967_v9 }
   0x3   :  { %94 = vmatpush1.msra.mxu0 %v1925_v1  ;;  %v1944_v5 = vld [vmem:[%s3282_s1 + $0x1a8] sm:$0xff]  ;;  %v1950_v6 = vld [vmem:[%s3282_s1 + $0x1a0] sm:$0xff]  ;;  %v1979_v11 = vld [vmem:[%s3282_s1 + $0x1f0] sm:$0xff] }
   0x4   :  { %95 = vmatprep.subr.mxu0 %v1930_v2  ;;  %v1956_v7 = vld [vmem:[%s3282_s1 + $0x188] sm:$0xff]  ;;  %v1962_v8 = vld [vmem:[%s3282_s1 + $0x180] sm:$0xff]  ;;  %165 = vmatpush1.msra.mxu1 %v1979_v11  ;;  %v1991_v13 = vld [vmem:[%s3282_s1 + $0x1d8] sm:$0xff] }
   0x5   :  { %96 = vmatpush1.msra.mxu0 %v1938_v4  ;;  %v1973_v10 = vld [vmem:[%s3282_s1 + $0x168] sm:$0xff]  ;;  %v1985_v12 = vld [vmem:[%s3282_s1 + $0x160] sm:$0xff]  ;;  %v1996_v14 = vld [vmem:[%s3282_s1 + $0x1d0] sm:$0xff]  ;;  %166 = vmatprep.subr.mxu1 %v1991_v13 }
   0x6   :  { %97 = vmatprep.subr.mxu0 %v1944_v5  ;;  %v2002_v15 = vld [vmem:[%s3282_s1 + $0x148] sm:$0xff]  ;;  %v2008_v16 = vld [vmem:[%s3282_s1 + $0x1b8] sm:$0xff]  ;;  %v2014_v17 = vld [vmem:[%s3282_s1 + $0x140] sm:$0xff]  ;;  %167 = vmatpush1.msra.mxu1 %v1996_v14 }
   0x7   :  { %98 = vmatpush1.msra.mxu0 %v1950_v6  ;;  %v2020_v18 = vld [vmem:[%s3282_s1 + $0x1b0] sm:$0xff]  ;;  %v2025_v19 = vld [vmem:[%s3282_s1 + $0x198] sm:$0xff]  ;;  %v2031_v20 = vld [vmem:[%s3282_s1 + $0x128] sm:$0xff]  ;;  %168 = vmatprep.subr.mxu1 %v2008_v16 }
   0x8   :  { %99 = vmatprep.subr.mxu0 %v1956_v7  ;;  %v2037_v21 = vld [vmem:[%s3282_s1 + $0x190] sm:$0xff]  ;;  %v2043_v22 = vld [vmem:[%s3282_s1 + $0x120] sm:$0xff]  ;;  %169 = vmatpush1.msra.mxu1 %v2020_v18  ;;  %v2049_v23 = vld [vmem:[%s3282_s1 + $0x178] sm:$0xff] }
   0x9   :  { %100 = vmatpush1.msra.mxu0 %v1962_v8  ;;  %v2055_v24 = vld [vmem:[%s3282_s1 + $0x108] sm:$0xff]  ;;  %170 = vmatprep.subr.mxu1 %v2025_v19  ;;  %v2061_v25 = vld [vmem:[%s3282_s1 + $0x170] sm:$0xff]  ;;  %v2067_v26 = vld [vmem:[%s3282_s1 + $0x100] sm:$0xff] }
   0xa   :  { %101 = vmatprep.subr.mxu0 %v1973_v10  ;;  %171 = vmatpush1.msra.mxu1 %v2037_v21  ;;  %v2073_v27 = vld [vmem:[%s3282_s1 + $0x158] sm:$0xff]  ;;  %v2079_v28 = vld [vmem:[%s3282_s1 + $0xe8] sm:$0xff]  ;;  %v2085_v29 = vld [vmem:[%s3282_s1 + $0x150] sm:$0xff] }
   0xb   :  { %102 = vmatpush1.msra.mxu0 %v1985_v12  ;;  %172 = vmatprep.subr.mxu1 %v2049_v23  ;;  %v2091_v30 = vld [vmem:[%s3282_s1 + $0xe0] sm:$0xff]  ;;  %v2097_v31 = vld [vmem:[%s3282_s1 + $0x138] sm:$0xff]  ;;  %v2103_v32 = vld [vmem:[%s3282_s1 + $0xc8] sm:$0xff] }
   0xc   :  { %103 = vmatprep.subr.mxu0 %v2002_v15  ;;  %173 = vmatpush1.msra.mxu1 %v2061_v25  ;;  %v2109_v33 = vld [vmem:[%s3282_s1 + $0x130] sm:$0xff]  ;;  %v2115_v34 = vld [vmem:[%s3282_s1 + $0xc0] sm:$0xff]  ;;  %v2121_v35 = vld [vmem:[%s3282_s1 + $0x118] sm:$0xff] }
   0xd   :  { %104 = vmatpush1.msra.mxu0 %v2014_v17  ;;  %174 = vmatprep.subr.mxu1 %v2073_v27  ;;  %v2127_v36 = vld [vmem:[%s3282_s1 + $0xa8] sm:$0xff]  ;;  %v2133_v37 = vld [vmem:[%s3282_s1 + $0x110] sm:$0xff]  ;;  %v2139_v38 = vld [vmem:[%s3282_s1 + $0xa0] sm:$0xff] }
   0xe   :  { %105 = vmatprep.subr.mxu0 %v2031_v20  ;;  %175 = vmatpush1.msra.mxu1 %v2085_v29  ;;  %v2145_v39 = vld [vmem:[%s3282_s1 + $0xf8] sm:$0xff]  ;;  %v2151_v40 = vld [vmem:[%s3282_s1 + $0x88] sm:$0xff]  ;;  %v2157_v41 = vld [vmem:[%s3282_s1 + $0xf0] sm:$0xff] }
   0xf   :  { %106 = vmatpush1.msra.mxu0 %v2043_v22  ;;  %176 = vmatprep.subr.mxu1 %v2097_v31  ;;  %v2163_v42 = vld [vmem:[%s3282_s1 + $0x80] sm:$0xff]  ;;  %v2169_v43 = vld [vmem:[%s3282_s1 + $0xd8] sm:$0xff]  ;;  %v2175_v44 = vld [vmem:[%s3282_s1 + $0x68] sm:$0xff] }
  0x10   :  { %107 = vmatprep.subr.mxu0 %v2055_v24  ;;  %177 = vmatpush1.msra.mxu1 %v2109_v33  ;;  %3353 = vst [vmem:[#allocation6_spill] sm:$0xff] %v2175_v44  ;;  %v2181_v45 = vld [vmem:[%s3282_s1 + $0xd0] sm:$0xff]  ;;  %v2187_v46 = vld [vmem:[%s3282_s1 + $0x60] sm:$0xff]  ;;  %v2193_v47 = vld [vmem:[%s3282_s1 + $0xb8] sm:$0xff] }
  0x11   :  { %108 = vmatpush1.msra.mxu0 %v2067_v26  ;;  %178 = vmatprep.subr.mxu1 %v2121_v35  ;;  %3354 = vst [vmem:[#allocation7_spill] sm:$0xff] %v2187_v46  ;;  %v2199_v48 = vld [vmem:[%s3282_s1 + $0x48] sm:$0xff]  ;;  %v2205_v49 = vld [vmem:[%s3282_s1 + $0xb0] sm:$0xff]  ;;  %v2211_v50 = vld [vmem:[%s3282_s1 + $0x40] sm:$0xff] }
  0x12   :  { %109 = vmatprep.subr.mxu0 %v2079_v28  ;;  %179 = vmatpush1.msra.mxu1 %v2133_v37  ;;  %3355 = vst [vmem:[#allocation8_spill] sm:$0xff] %v2199_v48  ;;  %3356 = vst [vmem:[#allocation9_spill] sm:$0xff] %v2211_v50  ;;  %v2217_v51 = vld [vmem:[%s3282_s1 + $0x98] sm:$0xff]  ;;  %v2223_v52 = vld [vmem:[%s3282_s1 + $0x28] sm:$0xff] }
  0x13   :  { %110 = vmatpush1.msra.mxu0 %v2091_v30  ;;  %180 = vmatprep.subr.mxu1 %v2145_v39  ;;  %3357 = vst [vmem:[#allocation10_spill] sm:$0xff] %v2223_v52  ;;  %v2229_v53 = vld [vmem:[%s3282_s1 + $0x90] sm:$0xff]  ;;  %v2235_v54 = vld [vmem:[%s3282_s1 + $0x20] sm:$0xff]  ;;  %v2241_v55 = vld [vmem:[%s3282_s1 + $0x78] sm:$0xff] }
  0x14   :  { %111 = vmatprep.subr.mxu0 %v2103_v32  ;;  %181 = vmatpush1.msra.mxu1 %v2157_v41  ;;  %3358 = vst [vmem:[#allocation11_spill] sm:$0xff] %v2229_v53  ;;  %3359 = vst [vmem:[#allocation12_spill] sm:$0xff] %v2235_v54  ;;  %v2247_v56 = vld [vmem:[%s3282_s1 + $0x8] sm:$0xff]  ;;  %v2253_v57 = vld [vmem:[%s3282_s1 + $0x70] sm:$0xff] }
  0x15   :  { %112 = vmatpush1.msra.mxu0 %v2115_v34  ;;  %182 = vmatprep.subr.mxu1 %v2169_v43  ;;  %3360 = vst [vmem:[#allocation13_spill] sm:$0xff] %v2241_v55  ;;  %3361 = vst [vmem:[#allocation14_spill] sm:$0xff] %v2247_v56  ;;  %v2259_v58 = vld [vmem:[%s3282_s1] sm:$0xff]  ;;  %v2265_v59 = vld [vmem:[%s3282_s1 + $0x58] sm:$0xff] }
  0x16   :  { %113 = vmatprep.subr.mxu0 %v2127_v36  ;;  %183 = vmatpush1.msra.mxu1 %v2181_v45  ;;  %3362 = vst [vmem:[#allocation15_spill] sm:$0xff] %v2253_v57  ;;  %3363 = vst [vmem:[#allocation16_spill] sm:$0xff] %v2259_v58  ;;  %v2272_v60 = vld [vmem:[%s3282_s1 + $0x50] sm:$0xff]  ;;  %v2279_v61 = vld [vmem:[%s3282_s1 + $0x38] sm:$0xff] }
  0x17   :  { %114 = vmatpush1.msra.mxu0 %v2139_v38  ;;  %184 = vmatprep.subr.mxu1 %v2193_v47  ;;  %3364 = vst [vmem:[#allocation17_spill] sm:$0xff] %v2265_v59  ;;  %3365 = vst [vmem:[#allocation18_spill] sm:$0xff] %v2272_v60  ;;  %v2286_v62 = vld [vmem:[%s3282_s1 + $0x30] sm:$0xff]  ;;  %v2293_v63 = vld [vmem:[%s3282_s1 + $0x18] sm:$0xff] }
  0x18   :  { %115 = vmatprep.subr.mxu0 %v2151_v40  ;;  %185 = vmatpush1.msra.mxu1 %v2205_v49  ;;  %3366 = vst [vmem:[#allocation19_spill] sm:$0xff] %v2279_v61  ;;  %3367 = vst [vmem:[#allocation20_spill] sm:$0xff] %v2286_v62 }
  0x19   :  { %116 = vmatpush1.msra.mxu0 %v2163_v42  ;;  %186 = vmatprep.subr.mxu1 %v2217_v51  ;;  %3368 = vst [vmem:[#allocation21_spill] sm:$0xff] %v2293_v63 }
  0x1a   :  { %117 = vmatprep.subr.mxu0 %v2175_v44  ;;  %187 = vmatpush1.msra.mxu1 %v2229_v53 }
  0x1b   :  { %118 = vmatpush1.msra.mxu0 %v2187_v46  ;;  %188 = vmatprep.subr.mxu1 %v2241_v55 }
  0x1c   :  { %119 = vmatprep.subr.mxu0 %v2199_v48  ;;  %189 = vmatpush1.msra.mxu1 %v2253_v57 }
  0x1d   :  { %120 = vmatpush1.msra.mxu0 %v2211_v50  ;;  %190 = vmatprep.subr.mxu1 %v2265_v59 }
  0x1e   :  { %121 = vmatprep.subr.mxu0 %v2223_v52  ;;  %191 = vmatpush1.msra.mxu1 %v2272_v60 }
  0x1f   :  { %122 = vmatpush1.msra.mxu0 %v2235_v54  ;;  %192 = vmatprep.subr.mxu1 %v2279_v61 }
  0x20   :  { %123 = vmatprep.subr.mxu0 %v2247_v56  ;;  %193 = vmatpush1.msra.mxu1 %v2286_v62 }
  0x21   :  { %124 = vmatpush1.msra.mxu0 %v2259_v58  ;;  %v2299_v58 = vld [vmem:[%s3282_s1 + $0x10] sm:$0xff]  ;;  %194 = vmatprep.subr.mxu1 %v2293_v63 }
  0x22   :  { %158 = vmatmul.mubr.f32.vlgmr.msra.gmra.mxu0 %v3289_v3  ;;  %3369 = vst [vmem:[#allocation22_spill] sm:$0xff] %v2299_v58  ;;  %268 = vmatprep.subr.mxu0 %v1920_v0 }
  0x23   :  { %269 = vmatpush1.msra.mxu0 %v1925_v1  ;;  %195 = vmatpush1.msra.mxu1 %v2299_v58 }
  0x24   :  { %270 = vmatprep.subr.mxu0 %v1930_v2  ;;  %229 = vmatmul.mubr.f32.vlgmr.msra.gmra.mxu1 %v3289_v3  ;;  %v3370_v3 = vld [vmem:[#allocation16_spill] sm:$0xff] }
  0x25   :  { %271 = vmatpush1.msra.mxu0 %v1938_v4  ;;  %339 = vmatprep.subr.mxu1 %v1967_v9 }
  0x26   :  { %340 = vmatpush1.msra.mxu1 %v1979_v11  ;;  %272 = vmatprep.subr.mxu0 %v1944_v5 }
  0x27   :  { %341 = vmatprep.subr.mxu1 %v1991_v13  ;;  %273 = vmatpush1.msra.mxu0 %v1950_v6 }
  0x28   :  { %342 = vmatpush1.msra.mxu1 %v1996_v14  ;;  %274 = vmatprep.subr.mxu0 %v1956_v7 }
  0x29   :  { %343 = vmatprep.subr.mxu1 %v2008_v16  ;;  %275 = vmatpush1.msra.mxu0 %v1962_v8 }
  0x2a   :  { %344 = vmatpush1.msra.mxu1 %v2020_v18  ;;  %276 = vmatprep.subr.mxu0 %v1973_v10 }
  0x2b   :  { %345 = vmatprep.subr.mxu1 %v2025_v19  ;;  %277 = vmatpush1.msra.mxu0 %v1985_v12 }
  0x2c   :  { %346 = vmatpush1.msra.mxu1 %v2037_v21  ;;  %278 = vmatprep.subr.mxu0 %v2002_v15 }
  0x2d   :  { %347 = vmatprep.subr.mxu1 %v2049_v23  ;;  %279 = vmatpush1.msra.mxu0 %v2014_v17 }
  0x2e   :  { %348 = vmatpush1.msra.mxu1 %v2061_v25  ;;  %280 = vmatprep.subr.mxu0 %v2031_v20 }
  0x2f   :  { %349 = vmatprep.subr.mxu1 %v2073_v27  ;;  %281 = vmatpush1.msra.mxu0 %v2043_v22 }
  0x30   :  { %350 = vmatpush1.msra.mxu1 %v2085_v29  ;;  %282 = vmatprep.subr.mxu0 %v2055_v24 }
  0x31   :  { %351 = vmatprep.subr.mxu1 %v2097_v31  ;;  %283 = vmatpush1.msra.mxu0 %v2067_v26 }
  0x32   :  { %352 = vmatpush1.msra.mxu1 %v2109_v33  ;;  %284 = vmatprep.subr.mxu0 %v2079_v28 }
  0x33   :  { %353 = vmatprep.subr.mxu1 %v2121_v35  ;;  %285 = vmatpush1.msra.mxu0 %v2091_v30 }
  0x34   :  { %354 = vmatpush1.msra.mxu1 %v2133_v37  ;;  %286 = vmatprep.subr.mxu0 %v2103_v32 }
  0x35   :  { %355 = vmatprep.subr.mxu1 %v2145_v39  ;;  %287 = vmatpush1.msra.mxu0 %v2115_v34 }
  0x36   :  { %356 = vmatpush1.msra.mxu1 %v2157_v41  ;;  %288 = vmatprep.subr.mxu0 %v2127_v36 }
  0x37   :  { %357 = vmatprep.subr.mxu1 %v2169_v43  ;;  %289 = vmatpush1.msra.mxu0 %v2139_v38 }
  0x38   :  { %358 = vmatpush1.msra.mxu1 %v2181_v45  ;;  %290 = vmatprep.subr.mxu0 %v2151_v40 }
  0x39   :  { %359 = vmatprep.subr.mxu1 %v2193_v47  ;;  %291 = vmatpush1.msra.mxu0 %v2163_v42 }
  0x3a   :  { %360 = vmatpush1.msra.mxu1 %v2205_v49  ;;  %292 = vmatprep.subr.mxu0 %v2175_v44 }
  0x3b   :  { %361 = vmatprep.subr.mxu1 %v2217_v51  ;;  %293 = vmatpush1.msra.mxu0 %v2187_v46 }
  0x3c   :  { %362 = vmatpush1.msra.mxu1 %v2229_v53  ;;  %294 = vmatprep.subr.mxu0 %v2199_v48  ;;  %v3371_v48 = vmov 0.0  }
  0x3d   :  { %363 = vmatprep.subr.mxu1 %v2241_v55  ;;  %295 = vmatpush1.msra.mxu0 %v2211_v50 }
  0x3e   :  { %364 = vmatpush1.msra.mxu1 %v2253_v57  ;;  %296 = vmatprep.subr.mxu0 %v2223_v52 }
  0x3f   :  { %365 = vmatprep.subr.mxu1 %v2265_v59  ;;  %297 = vmatpush1.msra.mxu0 %v2235_v54 }
  0x40   :  { %366 = vmatpush1.msra.mxu1 %v2272_v60  ;;  %298 = vmatprep.subr.mxu0 %v2247_v56  ;;  %v89_v56 = vld [vmem:[%s3283_s0] sm:$0xff]  ;;  %v91_v60 = vld [vmem:[%s3283_s0 + $0x10] sm:$0xff] }
  0x41   :  { %367 = vmatprep.subr.mxu1 %v2279_v61  ;;  %299 = vmatpush1.msra.mxu0 %v3370_v3  ;;  %v90_v3 = vld [vmem:[%s3283_s0 + $0x8] sm:$0xff] }
  0x42   :  { %368 = vmatpush1.msra.mxu1 %v2286_v62  ;;  %332 = vmatprep.mubr.f32.mxu0 %v3371_v48 }
  0x43   :  { %369 = vmatprep.subr.mxu1 %v2293_v63  ;;  %403 = vmatprep.mubr.f32.mxu1 %v3371_v48 }
  0x44   :  { %370 = vmatpush1.msra.mxu1 %v2299_v58  ;;  %443 = vmatprep.subr.mxu0 %v1920_v0 }
  0x45   :  { %514 = vmatprep.subr.mxu1 %v1967_v9  ;;  %v92_v9 = vld [vmem:[%s3283_s0 + $0x18] sm:$0xff] }
  0xe2   :  { %v159_v54 = vpop.f32.mrf.mxu0 }
  0xe3   :  { %v235_v62 = vadd.f32 %v159_v54, %v89_v56 }
  0xe4   :  { %v161_v61 = vpop.f32.mrf.mxu0  ;;  %v230_v58 = vpop.f32.mrf.mxu1 }
  0xe5   :  { %v1591_v63 = vmul.f32 -1.442695, %v235_v62  ;;  %v236_v52 = vadd.f32 %v161_v61, %v90_v3  ;;  %v237_v59 = vadd.f32 %v230_v58, %v91_v60  ;;  %v3376_v58 = vld [vmem:[#allocation15_spill] sm:$0xff]  ;;  %v3378_v60 = vld [vmem:[#allocation17_spill] sm:$0xff] }
  0xe6   :  { %v232_v0 = vpop.f32.mrf.mxu1 }
  0xe7   :  { %1698 = vpow2.f32 %v1591_v63  ;;  %v1592_v48 = vmul.f32 -1.442695, %v236_v52  ;;  %v238_v50 = vadd.f32 %v232_v0, %v92_v9 }
  0xe9   :  { %1700 = vpow2.f32 %v1592_v48  ;;  %v1593_v57 = vmul.f32 -1.442695, %v238_v50 }
  0xea   :  { %1702 = vtanh.f32 %v237_v59  ;;  %v3377_v59 = vld [vmem:[#allocation8_spill] sm:$0xff] }
  0xeb   :  { %1704 = vpow2.f32 %v1593_v57  ;;  %v3375_v57 = vld [vmem:[#allocation7_spill] sm:$0xff] }
  0xf4   :  { %v1699_v54 = vpop.eup %1698 }
  0xf5   :  { %v242_v56 = vadd.f32 1.0, %v1699_v54  ;;  %v3379_v54 = vld [vmem:[#allocation9_spill] sm:$0xff] }
  0xf6   :  { %v1701_v3 = vpop.eup %1700 }
  0xf7   :  { %1706 = vrcp.f32 %v242_v56  ;;  %v248_v52 = vadd.f32 1.0, %v1701_v3  ;;  %v1703_v48 = vpop.eup %1702  ;;  %v3380_v56 = vld [vmem:[#allocation18_spill] sm:$0xff] }
  0xf8   :  { %v1705_v61 = vpop.eup %1704  ;;  %v3381_v3 = vld [vmem:[#allocation10_spill] sm:$0xff] }
  0xf9   :  { %1708 = vrcp.f32 %v248_v52  ;;  %v255_v46 = vadd.f32 1.0, %v1705_v61  ;;  %v3382_v52 = vld [vmem:[#allocation19_spill] sm:$0xff]  ;;  %v3384_v61 = vld [vmem:[#allocation20_spill] sm:$0xff] }
  0xfb   :  { %1710 = vrcp.f32 %v255_v46  ;;  %v3373_v46 = vld [vmem:[#allocation6_spill] sm:$0xff] }
 0x104   :  { %v1707_v62 = vpop.eup %1706 }
 0x105   :  { %v259_v44 = vmul.f32 %v1707_v62, %v1703_v48  ;;  %v3383_v48 = vld [vmem:[#allocation12_spill] sm:$0xff]  ;;  %v3385_v62 = vld [vmem:[#allocation14_spill] sm:$0xff] }
 0x106   :  { %v1709_v63 = vpop.eup %1708 }
 0x107   :  { %v258_v55 = vmul.f32 0.0, %v1709_v63  ;;  %v3386_v63 = vld [vmem:[#allocation21_spill] sm:$0xff] }
 0x108   :  { %v1711_v0 = vpop.eup %1710 }
 0x109   :  { %v2385_v53 = vadd.f32 %v259_v44, %v258_v55  ;;  %v3372_v44 = vld [vmem:[#allocation11_spill] sm:$0xff]  ;;  %v3374_v55 = vld [vmem:[#allocation13_spill] sm:$0xff] }
 0x10b   :  { %1712 = vtanh.f32 %v2385_v53 }
 0x118   :  { %v1713_v9 = vpop.eup %1712 }
 0x119   :  { %v262_v50 = vmul.f32 %v1713_v9, %v1711_v0  ;;  %v3387_v0 = vld [vmem:[#allocation16_spill] sm:$0xff]  ;;  %v3388_v9 = vmov 0.0  }
 0x11b   :  { %333 = vmatmul.mubr.f32.vlgmr.msra.gmra.mxu0 %v262_v50  ;;  %404 = vmatmul.mubr.f32.vlgmr.msra.gmra.mxu1 %v262_v50  ;;  %v3389_v50 = vld [vmem:[#allocation22_spill] sm:$0xff] }
 0x11c   :  { %444 = vmatpush1.msra.mxu0 %v1925_v1  ;;  %515 = vmatpush1.msra.mxu1 %v1979_v11 }
 0x11d   :  { %445 = vmatprep.subr.mxu0 %v1930_v2  ;;  %516 = vmatprep.subr.mxu1 %v1991_v13 }
 0x11e   :  { %446 = vmatpush1.msra.mxu0 %v1938_v4  ;;  %517 = vmatpush1.msra.mxu1 %v1996_v14 }
 0x11f   :  { %447 = vmatprep.subr.mxu0 %v1944_v5  ;;  %518 = vmatprep.subr.mxu1 %v2008_v16 }
 0x120   :  { %448 = vmatpush1.msra.mxu0 %v1950_v6  ;;  %519 = vmatpush1.msra.mxu1 %v2020_v18 }
 0x121   :  { %449 = vmatprep.subr.mxu0 %v1956_v7  ;;  %520 = vmatprep.subr.mxu1 %v2025_v19 }
 0x122   :  { %450 = vmatpush1.msra.mxu0 %v1962_v8  ;;  %521 = vmatpush1.msra.mxu1 %v2037_v21 }
 0x123   :  { %451 = vmatprep.subr.mxu0 %v1973_v10  ;;  %522 = vmatprep.subr.mxu1 %v2049_v23 }
 0x124   :  { %452 = vmatpush1.msra.mxu0 %v1985_v12  ;;  %523 = vmatpush1.msra.mxu1 %v2061_v25 }
 0x125   :  { %453 = vmatprep.subr.mxu0 %v2002_v15  ;;  %524 = vmatprep.subr.mxu1 %v2073_v27 }
 0x126   :  { %454 = vmatpush1.msra.mxu0 %v2014_v17  ;;  %525 = vmatpush1.msra.mxu1 %v2085_v29 }
 0x127   :  { %455 = vmatprep.subr.mxu0 %v2031_v20  ;;  %526 = vmatprep.subr.mxu1 %v2097_v31 }
 0x128   :  { %456 = vmatpush1.msra.mxu0 %v2043_v22  ;;  %527 = vmatpush1.msra.mxu1 %v2109_v33 }
 0x129   :  { %457 = vmatprep.subr.mxu0 %v2055_v24  ;;  %528 = vmatprep.subr.mxu1 %v2121_v35 }
 0x12a   :  { %458 = vmatpush1.msra.mxu0 %v2067_v26  ;;  %529 = vmatpush1.msra.mxu1 %v2133_v37 }
 0x12b   :  { %459 = vmatprep.subr.mxu0 %v2079_v28  ;;  %530 = vmatprep.subr.mxu1 %v2145_v39 }
 0x12c   :  { %460 = vmatpush1.msra.mxu0 %v2091_v30  ;;  %531 = vmatpush1.msra.mxu1 %v2157_v41 }
 0x12d   :  { %461 = vmatprep.subr.mxu0 %v2103_v32  ;;  %532 = vmatprep.subr.mxu1 %v2169_v43 }
 0x12e   :  { %462 = vmatpush1.msra.mxu0 %v2115_v34  ;;  %533 = vmatpush1.msra.mxu1 %v2181_v45 }
 0x12f   :  { %463 = vmatprep.subr.mxu0 %v2127_v36  ;;  %534 = vmatprep.subr.mxu1 %v2193_v47 }
 0x130   :  { %464 = vmatpush1.msra.mxu0 %v2139_v38  ;;  %535 = vmatpush1.msra.mxu1 %v2205_v49 }
 0x131   :  { %465 = vmatprep.subr.mxu0 %v2151_v40  ;;  %536 = vmatprep.subr.mxu1 %v2217_v51 }
 0x132   :  { %466 = vmatpush1.msra.mxu0 %v2163_v42  ;;  %537 = vmatpush1.msra.mxu1 %v3372_v44 }
 0x133   :  { %467 = vmatprep.subr.mxu0 %v3373_v46  ;;  %538 = vmatprep.subr.mxu1 %v3374_v55 }
 0x134   :  { %468 = vmatpush1.msra.mxu0 %v3375_v57  ;;  %539 = vmatpush1.msra.mxu1 %v3376_v58 }
 0x135   :  { %469 = vmatprep.subr.mxu0 %v3377_v59  ;;  %540 = vmatprep.subr.mxu1 %v3378_v60  ;;  %v1596_v59 = vld [vmem:[%s3283_s0 + $0x30] sm:$0xff] }
 0x136   :  { %470 = vmatpush1.msra.mxu0 %v3379_v54  ;;  %541 = vmatpush1.msra.mxu1 %v3380_v56  ;;  %v3390_v56 = vld [vmem:[#allocation4_spill] sm:$0xff] }
 0x137   :  { %471 = vmatprep.subr.mxu0 %v3381_v3  ;;  %542 = vmatprep.subr.mxu1 %v3382_v52  ;;  %v3391_v3 = vld [vmem:[#allocation5_spill] sm:$0xff] }
 0x138   :  { %472 = vmatpush1.msra.mxu0 %v3383_v48  ;;  %543 = vmatpush1.msra.mxu1 %v3384_v61  ;;  %v1594_v61 = vld [vmem:[%s3283_s0 + $0x20] sm:$0xff] }
 0x139   :  { %473 = vmatprep.subr.mxu0 %v3385_v62  ;;  %544 = vmatprep.subr.mxu1 %v3386_v63  ;;  %v1595_v63 = vld [vmem:[%s3283_s0 + $0x28] sm:$0xff] }
 0x13a   :  { %474 = vmatpush1.msra.mxu0 %v3387_v0  ;;  %507 = vmatprep.mubr.f32.mxu0 %v3388_v9 }
 0x13b   :  { %545 = vmatpush1.msra.mxu1 %v3389_v50  ;;  %578 = vmatprep.mubr.f32.mxu1 %v3388_v9 }
 0x13c   :  { %618 = vmatprep.subr.mxu0 %v3390_v56  ;;  %689 = vmatprep.subr.mxu1 %v3391_v3  ;;  %v1597_v3 = vld [vmem:[%s3283_s0 + $0x38] sm:$0xff] }
 0x1db   :  { %v334_v48 = vpop.f32.mrf.mxu0  ;;  %v405_v50 = vpop.f32.mrf.mxu1 }
 0x1dc   :  { %v410_v0 = vadd.f32 %v1594_v61, %v334_v48  ;;  %v412_v48 = vadd.f32 %v1596_v59, %v405_v50  ;;  %v3395_v50 = vld [vmem:[#allocation15_spill] sm:$0xff] }
 0x1dd   :  { %v336_v62 = vpop.f32.mrf.mxu0  ;;  %v407_v56 = vpop.f32.mrf.mxu1 }
 0x1de   :  { %v1598_v52 = vmul.f32 -1.442695, %v410_v0  ;;  %v411_v54 = vadd.f32 %v1595_v63, %v336_v62  ;;  %v413_v60 = vadd.f32 %v1597_v3, %v407_v56 }
 0x1e0   :  { %1714 = vpow2.f32 %v1598_v52  ;;  %v1599_v9 = vmul.f32 -1.442695, %v411_v54  ;;  %v1600_v58 = vmul.f32 -1.442695, %v413_v60  ;;  %v3394_v60 = vld [vmem:[#allocation7_spill] sm:$0xff] }
 0x1e2   :  { %1716 = vpow2.f32 %v1599_v9 }
 0x1e3   :  { %1718 = vpow2.f32 %v1600_v58 }
 0x1ed   :  { %v1715_v57 = vpop.eup %1714 }
 0x1ee   :  { %v417_v61 = vadd.f32 1.0, %v1715_v57 }
 0x1ef   :  { %v1717_v0 = vpop.eup %1716 }
 0x1f0   :  { %1720 = vrcp.f32 %v417_v61  ;;  %v423_v52 = vadd.f32 1.0, %v1717_v0  ;;  %v1719_v54 = vpop.eup %1718  ;;  %v3397_v61 = vld [vmem:[#allocation17_spill] sm:$0xff] }
 0x1f1   :  { %1722 = vtanh.f32 %v412_v48  ;;  %v430_v55 = vadd.f32 1.0, %v1719_v54  ;;  %v3396_v48 = vld [vmem:[#allocation8_spill] sm:$0xff]  ;;  %v3398_v0 = vld [vmem:[#allocation9_spill] sm:$0xff]  ;;  %v3400_v54 = vld [vmem:[#allocation10_spill] sm:$0xff] }
 0x1f2   :  { %1724 = vrcp.f32 %v423_v52  ;;  %v3399_v52 = vld [vmem:[#allocation18_spill] sm:$0xff] }
 0x1f3   :  { %1726 = vrcp.f32 %v430_v55  ;;  %v3393_v55 = vld [vmem:[#allocation13_spill] sm:$0xff] }
 0x1fd   :  { %v1721_v62 = vpop.eup %1720 }
 0x1fe   :  { %v1723_v63 = vpop.eup %1722 }
 0x1ff   :  { %v1725_v9 = vpop.eup %1724  ;;  %v434_v56 = vmul.f32 %v1723_v63, %v1721_v62  ;;  %v3401_v62 = vld [vmem:[#allocation19_spill] sm:$0xff]  ;;  %v3402_v63 = vld [vmem:[#allocation12_spill] sm:$0xff] }
 0x200   :  { %v433_v3 = vmul.f32 %v1725_v9, %v2385_v53  ;;  %v1727_v57 = vpop.eup %1726  ;;  %v3392_v53 = vld [vmem:[#allocation6_spill] sm:$0xff]  ;;  %v3403_v9 = vld [vmem:[#allocation20_spill] sm:$0xff] }
 0x202   :  { %v2467_v46 = vadd.f32 %v434_v56, %v433_v3  ;;  %v3404_v56 = vld [vmem:[#allocation14_spill] sm:$0xff]  ;;  %v3405_v3 = vld [vmem:[#allocation21_spill] sm:$0xff] }
 0x204   :  { %1728 = vtanh.f32 %v2467_v46 }
 0x211   :  { %v1729_v59 = vpop.eup %1728 }
 0x212   :  { %v437_v58 = vmul.f32 %v1729_v59, %v1727_v57  ;;  %v3406_v57 = vld [vmem:[#allocation16_spill] sm:$0xff]  ;;  %v3407_v59 = vmov 0.0  }
 0x214   :  { %508 = vmatmul.mubr.f32.vlgmr.msra.gmra.mxu0 %v437_v58  ;;  %579 = vmatmul.mubr.f32.vlgmr.msra.gmra.mxu1 %v437_v58  ;;  %v3408_v58 = vld [vmem:[#allocation22_spill] sm:$0xff] }
 0x215   :  { %619 = vmatpush1.msra.mxu0 %v1925_v1  ;;  %690 = vmatpush1.msra.mxu1 %v1979_v11 }
 0x216   :  { %620 = vmatprep.subr.mxu0 %v1930_v2  ;;  %691 = vmatprep.subr.mxu1 %v1991_v13 }
 0x217   :  { %621 = vmatpush1.msra.mxu0 %v1938_v4  ;;  %692 = vmatpush1.msra.mxu1 %v1996_v14 }
 0x218   :  { %622 = vmatprep.subr.mxu0 %v1944_v5  ;;  %693 = vmatprep.subr.mxu1 %v2008_v16 }
 0x219   :  { %623 = vmatpush1.msra.mxu0 %v1950_v6  ;;  %694 = vmatpush1.msra.mxu1 %v2020_v18 }
 0x21a   :  { %624 = vmatprep.subr.mxu0 %v1956_v7  ;;  %695 = vmatprep.subr.mxu1 %v2025_v19 }
 0x21b   :  { %625 = vmatpush1.msra.mxu0 %v1962_v8  ;;  %696 = vmatpush1.msra.mxu1 %v2037_v21 }
 0x21c   :  { %626 = vmatprep.subr.mxu0 %v1973_v10  ;;  %697 = vmatprep.subr.mxu1 %v2049_v23 }
 0x21d   :  { %627 = vmatpush1.msra.mxu0 %v1985_v12  ;;  %698 = vmatpush1.msra.mxu1 %v2061_v25 }
 0x21e   :  { %628 = vmatprep.subr.mxu0 %v2002_v15  ;;  %699 = vmatprep.subr.mxu1 %v2073_v27 }
 0x21f   :  { %629 = vmatpush1.msra.mxu0 %v2014_v17  ;;  %700 = vmatpush1.msra.mxu1 %v2085_v29 }
 0x220   :  { %630 = vmatprep.subr.mxu0 %v2031_v20  ;;  %701 = vmatprep.subr.mxu1 %v2097_v31 }
 0x221   :  { %631 = vmatpush1.msra.mxu0 %v2043_v22  ;;  %702 = vmatpush1.msra.mxu1 %v2109_v33 }
 0x222   :  { %632 = vmatprep.subr.mxu0 %v2055_v24  ;;  %703 = vmatprep.subr.mxu1 %v2121_v35 }
 0x223   :  { %633 = vmatpush1.msra.mxu0 %v2067_v26  ;;  %704 = vmatpush1.msra.mxu1 %v2133_v37 }
 0x224   :  { %634 = vmatprep.subr.mxu0 %v2079_v28  ;;  %705 = vmatprep.subr.mxu1 %v2145_v39 }
 0x225   :  { %635 = vmatpush1.msra.mxu0 %v2091_v30  ;;  %706 = vmatpush1.msra.mxu1 %v2157_v41 }
 0x226   :  { %636 = vmatprep.subr.mxu0 %v2103_v32  ;;  %707 = vmatprep.subr.mxu1 %v2169_v43 }
 0x227   :  { %637 = vmatpush1.msra.mxu0 %v2115_v34  ;;  %708 = vmatpush1.msra.mxu1 %v2181_v45 }
 0x228   :  { %638 = vmatprep.subr.mxu0 %v2127_v36  ;;  %709 = vmatprep.subr.mxu1 %v2193_v47 }
 0x229   :  { %639 = vmatpush1.msra.mxu0 %v2139_v38  ;;  %710 = vmatpush1.msra.mxu1 %v2205_v49 }
 0x22a   :  { %640 = vmatprep.subr.mxu0 %v2151_v40  ;;  %711 = vmatprep.subr.mxu1 %v2217_v51 }
 0x22b   :  { %641 = vmatpush1.msra.mxu0 %v2163_v42  ;;  %712 = vmatpush1.msra.mxu1 %v3372_v44 }
 0x22c   :  { %642 = vmatprep.subr.mxu0 %v3392_v53  ;;  %713 = vmatprep.subr.mxu1 %v3393_v55 }
 0x22d   :  { %643 = vmatpush1.msra.mxu0 %v3394_v60  ;;  %714 = vmatpush1.msra.mxu1 %v3395_v50 }
 0x22e   :  { %644 = vmatprep.subr.mxu0 %v3396_v48  ;;  %715 = vmatprep.subr.mxu1 %v3397_v61  ;;  %v1603_v48 = vld [vmem:[%s3283_s0 + $0x50] sm:$0xff] }
 0x22f   :  { %645 = vmatpush1.msra.mxu0 %v3398_v0  ;;  %716 = vmatpush1.msra.mxu1 %v3399_v52  ;;  %v3409_v52 = vld [vmem:[#allocation4_spill] sm:$0xff] }
 0x230   :  { %646 = vmatprep.subr.mxu0 %v3400_v54  ;;  %717 = vmatprep.subr.mxu1 %v3401_v62  ;;  %v3410_v54 = vld [vmem:[#allocation5_spill] sm:$0xff] }
 0x231   :  { %647 = vmatpush1.msra.mxu0 %v3402_v63  ;;  %718 = vmatpush1.msra.mxu1 %v3403_v9  ;;  %v1601_v9 = vld [vmem:[%s3283_s0 + $0x40] sm:$0xff] }
 0x232   :  { %648 = vmatprep.subr.mxu0 %v3404_v56  ;;  %719 = vmatprep.subr.mxu1 %v3405_v3  ;;  %v1602_v3 = vld [vmem:[%s3283_s0 + $0x48] sm:$0xff] }
 0x233   :  { %649 = vmatpush1.msra.mxu0 %v3406_v57  ;;  %682 = vmatprep.mubr.f32.mxu0 %v3407_v59 }
 0x234   :  { %720 = vmatpush1.msra.mxu1 %v3408_v58  ;;  %753 = vmatprep.mubr.f32.mxu1 %v3407_v59 }
 0x235   :  { %793 = vmatprep.subr.mxu0 %v3409_v52  ;;  %864 = vmatprep.subr.mxu1 %v3410_v54  ;;  %v1604_v52 = vld [vmem:[%s3283_s0 + $0x58] sm:$0xff] }
 0x2d4   :  { %v509_v63 = vpop.f32.mrf.mxu0  ;;  %v580_v58 = vpop.f32.mrf.mxu1 }
 0x2d5   :  { %v585_v57 = vadd.f32 %v1601_v9, %v509_v63  ;;  %v587_v63 = vadd.f32 %v1603_v48, %v580_v58 }
 0x2d6   :  { %v511_v56 = vpop.f32.mrf.mxu0  ;;  %v582_v54 = vpop.f32.mrf.mxu1 }
 0x2d7   :  { %v1605_v62 = vmul.f32 -1.442695, %v585_v57  ;;  %v586_v0 = vadd.f32 %v1602_v3, %v511_v56  ;;  %v588_v61 = vadd.f32 %v1604_v52, %v582_v54 }
 0x2d9   :  { %1730 = vpow2.f32 %v1605_v62  ;;  %v1606_v59 = vmul.f32 -1.442695, %v586_v0  ;;  %v1607_v50 = vmul.f32 -1.442695, %v588_v61 }
 0x2db   :  { %1732 = vpow2.f32 %v1606_v59 }
 0x2dc   :  { %1734 = vpow2.f32 %v1607_v50 }
 0x2e6   :  { %v1731_v60 = vpop.eup %1730 }
 0x2e7   :  { %v592_v9 = vadd.f32 1.0, %v1731_v60 }
 0x2e8   :  { %v1733_v57 = vpop.eup %1732 }
 0x2e9   :  { %1736 = vrcp.f32 %v592_v9  ;;  %v598_v62 = vadd.f32 1.0, %v1733_v57  ;;  %v1735_v0 = vpop.eup %1734 }
 0x2ea   :  { %1738 = vtanh.f32 %v587_v63  ;;  %v605_v55 = vadd.f32 1.0, %v1735_v0  ;;  %v2642_v0 = vld [vmem:[%s3282_s1 + $0x1e0] sm:$0xff] }
 0x2eb   :  { %1740 = vrcp.f32 %v598_v62 }
 0x2ec   :  { %1742 = vrcp.f32 %v605_v55 }
 0x2f6   :  { %v1737_v56 = vpop.eup %1736 }
 0x2f7   :  { %v1739_v3 = vpop.eup %1738 }
 0x2f8   :  { %v1741_v59 = vpop.eup %1740  ;;  %v609_v54 = vmul.f32 %v1739_v3, %v1737_v56  ;;  %v2654_v56 = vld [vmem:[%s3282_s1 + $0x1c8] sm:$0xff]  ;;  %v2660_v3 = vld [vmem:[%s3282_s1 + $0x1d8] sm:$0xff] }
 0x2f9   :  { %v608_v52 = vmul.f32 %v1741_v59, %v2467_v46  ;;  %v1743_v60 = vpop.eup %1742  ;;  %v2666_v59 = vld [vmem:[%s3282_s1 + $0x1c0] sm:$0xff] }
 0x2fb   :  { %v2549_v53 = vadd.f32 %v609_v54, %v608_v52  ;;  %v2672_v54 = vld [vmem:[%s3282_s1 + $0x1d0] sm:$0xff]  ;;  %v2678_v52 = vld [vmem:[%s3282_s1 + $0x1a8] sm:$0xff] }
 0x2fd   :  { %1744 = vtanh.f32 %v2549_v53 }
 0x30a   :  { %v1745_v48 = vpop.eup %1744 }
 0x30b   :  { %v612_v50 = vmul.f32 %v1745_v48, %v1743_v60  ;;  %v2684_v60 = vld [vmem:[%s3282_s1 + $0x1b8] sm:$0xff]  ;;  %v2690_v48 = vld [vmem:[%s3282_s1 + $0x1a0] sm:$0xff] }
 0x30d   :  { %683 = vmatmul.mubr.f32.vlgmr.msra.gmra.mxu0 %v612_v50  ;;  %754 = vmatmul.mubr.f32.vlgmr.msra.gmra.mxu1 %v612_v50  ;;  %v2696_v50 = vld [vmem:[%s3282_s1 + $0x1b0] sm:$0xff] }
 0x30e   :  { %794 = vmatpush1.msra.mxu0 %v1925_v1  ;;  %865 = vmatpush1.msra.mxu1 %v1979_v11  ;;  %v3411_v1 = vld [vmem:[#allocation6_spill] sm:$0xff] }
 0x30f   :  { %795 = vmatprep.subr.mxu0 %v1930_v2  ;;  %866 = vmatprep.subr.mxu1 %v1991_v13  ;;  %v3412_v2 = vld [vmem:[#allocation13_spill] sm:$0xff]  ;;  %v3419_v11 = vld [vmem:[#allocation10_spill] sm:$0xff]  ;;  %v3421_v13 = vld [vmem:[#allocation12_spill] sm:$0xff] }
 0x310   :  { %796 = vmatpush1.msra.mxu0 %v1938_v4  ;;  %867 = vmatpush1.msra.mxu1 %v1996_v14  ;;  %v3413_v4 = vld [vmem:[#allocation7_spill] sm:$0xff]  ;;  %v3422_v14 = vld [vmem:[#allocation20_spill] sm:$0xff] }
 0x311   :  { %797 = vmatprep.subr.mxu0 %v1944_v5  ;;  %868 = vmatprep.subr.mxu1 %v2008_v16  ;;  %v3414_v5 = vld [vmem:[#allocation15_spill] sm:$0xff]  ;;  %v3424_v16 = vld [vmem:[#allocation21_spill] sm:$0xff] }
 0x312   :  { %798 = vmatpush1.msra.mxu0 %v1950_v6  ;;  %869 = vmatpush1.msra.mxu1 %v2020_v18  ;;  %v3415_v6 = vld [vmem:[#allocation8_spill] sm:$0xff]  ;;  %v3426_v18 = vmov 0.0  }
 0x313   :  { %799 = vmatprep.subr.mxu0 %v1956_v7  ;;  %870 = vmatprep.subr.mxu1 %v2025_v19  ;;  %v3416_v7 = vld [vmem:[#allocation17_spill] sm:$0xff]  ;;  %v3427_v19 = vld [vmem:[#allocation22_spill] sm:$0xff] }
 0x314   :  { %800 = vmatpush1.msra.mxu0 %v1962_v8  ;;  %871 = vmatpush1.msra.mxu1 %v2037_v21  ;;  %v3417_v8 = vld [vmem:[#allocation9_spill] sm:$0xff] }
 0x315   :  { %801 = vmatprep.subr.mxu0 %v1973_v10  ;;  %872 = vmatprep.subr.mxu1 %v2049_v23  ;;  %v3418_v10 = vld [vmem:[#allocation18_spill] sm:$0xff]  ;;  %v3429_v21 = vld [vmem:[#allocation5_spill] sm:$0xff] }
 0x316   :  { %802 = vmatpush1.msra.mxu0 %v1985_v12  ;;  %873 = vmatpush1.msra.mxu1 %v2061_v25  ;;  %v3420_v12 = vld [vmem:[#allocation19_spill] sm:$0xff] }
 0x317   :  { %803 = vmatprep.subr.mxu0 %v2002_v15  ;;  %874 = vmatprep.subr.mxu1 %v2073_v27  ;;  %v3423_v15 = vld [vmem:[#allocation14_spill] sm:$0xff] }
 0x318   :  { %804 = vmatpush1.msra.mxu0 %v2014_v17  ;;  %875 = vmatpush1.msra.mxu1 %v2085_v29  ;;  %v3425_v17 = vld [vmem:[#allocation16_spill] sm:$0xff] }
 0x319   :  { %805 = vmatprep.subr.mxu0 %v2031_v20  ;;  %876 = vmatprep.subr.mxu1 %v2097_v31  ;;  %v2619_v20 = vld [vmem:[%s3282_s1 + $0x1e8] sm:$0xff]  ;;  %v1611_v31 = vld [vmem:[%s3283_s0 + $0x78] sm:$0xff] }
 0x31a   :  { %806 = vmatpush1.msra.mxu0 %v2043_v22  ;;  %877 = vmatpush1.msra.mxu1 %v2109_v33  ;;  %3428 = vst [vmem:[#allocation11_spill] sm:$0xff] %v2619_v20  ;;  %v1608_v22 = vld [vmem:[%s3283_s0 + $0x60] sm:$0xff] }
 0x31b   :  { %807 = vmatprep.subr.mxu0 %v2055_v24  ;;  %878 = vmatprep.subr.mxu1 %v2121_v35  ;;  %v1609_v24 = vld [vmem:[%s3283_s0 + $0x68] sm:$0xff] }
 0x31c   :  { %808 = vmatpush1.msra.mxu0 %v2067_v26  ;;  %879 = vmatpush1.msra.mxu1 %v2133_v37 }
 0x31d   :  { %809 = vmatprep.subr.mxu0 %v2079_v28  ;;  %880 = vmatprep.subr.mxu1 %v2145_v39 }
 0x31e   :  { %810 = vmatpush1.msra.mxu0 %v2091_v30  ;;  %881 = vmatpush1.msra.mxu1 %v2157_v41 }
 0x31f   :  { %811 = vmatprep.subr.mxu0 %v2103_v32  ;;  %882 = vmatprep.subr.mxu1 %v2169_v43 }
 0x320   :  { %812 = vmatpush1.msra.mxu0 %v2115_v34  ;;  %883 = vmatpush1.msra.mxu1 %v2181_v45  ;;  %v1610_v34 = vld [vmem:[%s3283_s0 + $0x70] sm:$0xff] }
 0x321   :  { %813 = vmatprep.subr.mxu0 %v2127_v36  ;;  %884 = vmatprep.subr.mxu1 %v2193_v47 }
 0x322   :  { %814 = vmatpush1.msra.mxu0 %v2139_v38  ;;  %885 = vmatpush1.msra.mxu1 %v2205_v49 }
 0x323   :  { %815 = vmatprep.subr.mxu0 %v2151_v40  ;;  %886 = vmatprep.subr.mxu1 %v2217_v51 }
 0x324   :  { %816 = vmatpush1.msra.mxu0 %v2163_v42  ;;  %887 = vmatpush1.msra.mxu1 %v3372_v44 }
 0x325   :  { %817 = vmatprep.subr.mxu0 %v3411_v1  ;;  %888 = vmatprep.subr.mxu1 %v3412_v2  ;;  %v2702_v1 = vld [vmem:[%s3282_s1 + $0x188] sm:$0xff] }
 0x326   :  { %818 = vmatpush1.msra.mxu0 %v3413_v4  ;;  %889 = vmatpush1.msra.mxu1 %v3414_v5  ;;  %v2708_v4 = vld [vmem:[%s3282_s1 + $0x198] sm:$0xff] }
 0x327   :  { %819 = vmatprep.subr.mxu0 %v3415_v6  ;;  %890 = vmatprep.subr.mxu1 %v3416_v7  ;;  %v2714_v6 = vld [vmem:[%s3282_s1 + $0x180] sm:$0xff] }
 0x328   :  { %820 = vmatpush1.msra.mxu0 %v3417_v8  ;;  %891 = vmatpush1.msra.mxu1 %v3418_v10  ;;  %v2720_v8 = vld [vmem:[%s3282_s1 + $0x190] sm:$0xff] }
 0x329   :  { %821 = vmatprep.subr.mxu0 %v3419_v11  ;;  %892 = vmatprep.subr.mxu1 %v3420_v12  ;;  %v2726_v11 = vld [vmem:[%s3282_s1 + $0x168] sm:$0xff] }
 0x32a   :  { %822 = vmatpush1.msra.mxu0 %v3421_v13  ;;  %893 = vmatpush1.msra.mxu1 %v3422_v14  ;;  %v2732_v13 = vld [vmem:[%s3282_s1 + $0x178] sm:$0xff] }
 0x32b   :  { %823 = vmatprep.subr.mxu0 %v3423_v15  ;;  %894 = vmatprep.subr.mxu1 %v3424_v16 }
 0x32c   :  { %824 = vmatpush1.msra.mxu0 %v3425_v17  ;;  %857 = vmatprep.mubr.f32.mxu0 %v3426_v18 }
 0x32d   :  { %895 = vmatpush1.msra.mxu1 %v3427_v19  ;;  %928 = vmatprep.mubr.f32.mxu1 %v3426_v18 }
 0x32e   :  { %968 = vmatprep.subr.mxu0 %v2619_v20  ;;  %1039 = vmatprep.subr.mxu1 %v3429_v21  ;;  %v2738_v21 = vld [vmem:[%s3282_s1 + $0x160] sm:$0xff] }
 0x3cd   :  { %v684_v23 = vpop.f32.mrf.mxu0  ;;  %v755_v29 = vpop.f32.mrf.mxu1 }
 0x3ce   :  { %v760_v25 = vadd.f32 %v1608_v22, %v684_v23  ;;  %v762_v37 = vadd.f32 %v1610_v34, %v755_v29  ;;  %v2744_v22 = vld [vmem:[%s3282_s1 + $0x170] sm:$0xff]  ;;  %v2750_v23 = vld [vmem:[%s3282_s1 + $0x148] sm:$0xff]  ;;  %v2786_v29 = vld [vmem:[%s3282_s1 + $0x120] sm:$0xff] }
 0x3cf   :  { %v686_v26 = vpop.f32.mrf.mxu0  ;;  %v757_v32 = vpop.f32.mrf.mxu1  ;;  %v2816_v34 = vld [vmem:[%s3282_s1 + $0x110] sm:$0xff] }
 0x3d0   :  { %v1612_v27 = vmul.f32 -1.442695, %v760_v25  ;;  %v761_v28 = vadd.f32 %v1609_v24, %v686_v26  ;;  %v763_v33 = vadd.f32 %v1611_v31, %v757_v32  ;;  %v2756_v24 = vld [vmem:[%s3282_s1 + $0x158] sm:$0xff]  ;;  %v2762_v25 = vld [vmem:[%s3282_s1 + $0x140] sm:$0xff]  ;;  %v2768_v26 = vld [vmem:[%s3282_s1 + $0x150] sm:$0xff] }
 0x3d1   :  { %v2798_v31 = vld [vmem:[%s3282_s1 + $0x108] sm:$0xff]  ;;  %v2804_v32 = vld [vmem:[%s3282_s1 + $0x118] sm:$0xff] }
 0x3d2   :  { %1746 = vpow2.f32 %v1612_v27  ;;  %v1613_v30 = vmul.f32 -1.442695, %v761_v28  ;;  %v1614_v35 = vmul.f32 -1.442695, %v763_v33  ;;  %v2774_v27 = vld [vmem:[%s3282_s1 + $0x128] sm:$0xff]  ;;  %v2780_v28 = vld [vmem:[%s3282_s1 + $0x138] sm:$0xff] }
 0x3d3   :  { %v2810_v33 = vld [vmem:[%s3282_s1 + $0x100] sm:$0xff] }
 0x3d4   :  { %1748 = vpow2.f32 %v1613_v30  ;;  %v2792_v30 = vld [vmem:[%s3282_s1 + $0x130] sm:$0xff] }
 0x3d5   :  { %1750 = vpow2.f32 %v1614_v35  ;;  %v2822_v35 = vld [vmem:[%s3282_s1 + $0xe8] sm:$0xff] }
 0x3df   :  { %v1747_v36 = vpop.eup %1746 }
 0x3e0   :  { %v767_v38 = vadd.f32 1.0, %v1747_v36  ;;  %v2828_v36 = vld [vmem:[%s3282_s1 + $0xf8] sm:$0xff] }
 0x3e1   :  { %v1749_v39 = vpop.eup %1748 }
 0x3e2   :  { %1752 = vrcp.f32 %v767_v38  ;;  %v773_v40 = vadd.f32 1.0, %v1749_v39  ;;  %v1751_v41 = vpop.eup %1750  ;;  %v2840_v38 = vld [vmem:[%s3282_s1 + $0xf0] sm:$0xff]  ;;  %v2846_v39 = vld [vmem:[%s3282_s1 + $0xc8] sm:$0xff] }
 0x3e3   :  { %1754 = vtanh.f32 %v762_v37  ;;  %v780_v55 = vadd.f32 1.0, %v1751_v41  ;;  %v2834_v37 = vld [vmem:[%s3282_s1 + $0xe0] sm:$0xff] }
 0x3e4   :  { %1756 = vrcp.f32 %v773_v40  ;;  %v2852_v40 = vld [vmem:[%s3282_s1 + $0xd8] sm:$0xff]  ;;  %v2858_v41 = vld [vmem:[%s3282_s1 + $0xc0] sm:$0xff] }
 0x3e5   :  { %1758 = vrcp.f32 %v780_v55 }
 0x3ef   :  { %v1753_v42 = vpop.eup %1752 }
 0x3f0   :  { %v1755_v43 = vpop.eup %1754 }
 0x3f1   :  { %v1757_v46 = vpop.eup %1756  ;;  %v784_v61 = vmul.f32 %v1755_v43, %v1753_v42  ;;  %v2865_v42 = vld [vmem:[%s3282_s1 + $0xa8] sm:$0xff]  ;;  %v2872_v43 = vld [vmem:[%s3282_s1 + $0xa0] sm:$0xff] }
 0x3f2   :  { %v783_v58 = vmul.f32 %v1757_v46, %v2549_v53  ;;  %v1759_v9 = vpop.eup %1758  ;;  %v2648_v53 = vld [vmem:[%s3282_s1 + $0x1f0] sm:$0xff] }
 0x3f4   :  { %v2636_v63 = vadd.f32 %v784_v61, %v783_v58  ;;  %v1618_v58 = vld [vmem:[%s3283_s0 + $0x98] sm:$0xff] }
 0x3f6   :  { %1760 = vtanh.f32 %v2636_v63 }
 0x403   :  { %v1761_v57 = vpop.eup %1760 }
 0x404   :  { %v787_v62 = vmul.f32 %v1761_v57, %v1759_v9 }
 0x406   :  { %858 = vmatmul.mubr.f32.vlgmr.msra.gmra.mxu0 %v787_v62  ;;  %929 = vmatmul.mubr.f32.vlgmr.msra.gmra.mxu1 %v787_v62  ;;  %v1617_v62 = vld [vmem:[%s3283_s0 + $0x90] sm:$0xff] }
 0x407   :  { %969 = vmatpush1.msra.mxu0 %v2642_v0  ;;  %1040 = vmatpush1.msra.mxu1 %v2648_v53 }
 0x408   :  { %970 = vmatprep.subr.mxu0 %v2654_v56  ;;  %1041 = vmatprep.subr.mxu1 %v2660_v3 }
 0x409   :  { %971 = vmatpush1.msra.mxu0 %v2666_v59  ;;  %1042 = vmatpush1.msra.mxu1 %v2672_v54 }
 0x40a   :  { %972 = vmatprep.subr.mxu0 %v2678_v52  ;;  %1043 = vmatprep.subr.mxu1 %v2684_v60 }
 0x40b   :  { %973 = vmatpush1.msra.mxu0 %v2690_v48  ;;  %1044 = vmatpush1.msra.mxu1 %v2696_v50 }
 0x40c   :  { %974 = vmatprep.subr.mxu0 %v2702_v1  ;;  %1045 = vmatprep.subr.mxu1 %v2708_v4 }
 0x40d   :  { %975 = vmatpush1.msra.mxu0 %v2714_v6  ;;  %1046 = vmatpush1.msra.mxu1 %v2720_v8 }
 0x40e   :  { %976 = vmatprep.subr.mxu0 %v2726_v11  ;;  %1047 = vmatprep.subr.mxu1 %v2732_v13 }
 0x40f   :  { %977 = vmatpush1.msra.mxu0 %v2738_v21  ;;  %1048 = vmatpush1.msra.mxu1 %v2744_v22 }
 0x410   :  { %978 = vmatprep.subr.mxu0 %v2750_v23  ;;  %1049 = vmatprep.subr.mxu1 %v2756_v24 }
 0x411   :  { %979 = vmatpush1.msra.mxu0 %v2762_v25  ;;  %1050 = vmatpush1.msra.mxu1 %v2768_v26 }
 0x412   :  { %980 = vmatprep.subr.mxu0 %v2774_v27  ;;  %1051 = vmatprep.subr.mxu1 %v2780_v28 }
 0x413   :  { %981 = vmatpush1.msra.mxu0 %v2786_v29  ;;  %1052 = vmatpush1.msra.mxu1 %v2792_v30 }
 0x414   :  { %982 = vmatprep.subr.mxu0 %v2798_v31  ;;  %1053 = vmatprep.subr.mxu1 %v2804_v32 }
 0x415   :  { %983 = vmatpush1.msra.mxu0 %v2810_v33  ;;  %1054 = vmatpush1.msra.mxu1 %v2816_v34 }
 0x416   :  { %984 = vmatprep.subr.mxu0 %v2822_v35  ;;  %1055 = vmatprep.subr.mxu1 %v2828_v36 }
 0x417   :  { %985 = vmatpush1.msra.mxu0 %v2834_v37  ;;  %1056 = vmatpush1.msra.mxu1 %v2840_v38 }
 0x418   :  { %986 = vmatprep.subr.mxu0 %v2846_v39  ;;  %1057 = vmatprep.subr.mxu1 %v2852_v40 }
 0x419   :  { %987 = vmatpush1.msra.mxu0 %v2858_v41  ;;  %1058 = vmatpush1.msra.mxu1 %v2181_v45  ;;  %v2879_v45 = vld [vmem:[%s3282_s1 + $0x88] sm:$0xff] }
 0x41a   :  { %988 = vmatprep.subr.mxu0 %v2865_v42  ;;  %1059 = vmatprep.subr.mxu1 %v2193_v47  ;;  %v2886_v47 = vld [vmem:[%s3282_s1 + $0x80] sm:$0xff] }
 0x41b   :  { %989 = vmatpush1.msra.mxu0 %v2872_v43  ;;  %1060 = vmatpush1.msra.mxu1 %v2205_v49  ;;  %v2893_v49 = vld [vmem:[%s3282_s1 + $0x68] sm:$0xff] }
 0x41c   :  { %990 = vmatprep.subr.mxu0 %v2879_v45  ;;  %1061 = vmatprep.subr.mxu1 %v2217_v51  ;;  %3430 = vst [vmem:[#allocation4_spill] sm:$0xff] %v2893_v49  ;;  %v2900_v51 = vld [vmem:[%s3282_s1 + $0x60] sm:$0xff] }
 0x41d   :  { %991 = vmatpush1.msra.mxu0 %v2886_v47  ;;  %1062 = vmatpush1.msra.mxu1 %v3372_v44  ;;  %3431 = vst [vmem:[#allocation6_spill] sm:$0xff] %v2900_v51  ;;  %v2907_v44 = vld [vmem:[%s3282_s1 + $0x48] sm:$0xff] }
 0x41e   :  { %992 = vmatprep.subr.mxu0 %v2893_v49  ;;  %1063 = vmatprep.subr.mxu1 %v3412_v2  ;;  %3432 = vst [vmem:[#allocation13_spill] sm:$0xff] %v2907_v44  ;;  %v2914_v2 = vld [vmem:[%s3282_s1 + $0x40] sm:$0xff] }
 0x41f   :  { %993 = vmatpush1.msra.mxu0 %v2900_v51  ;;  %1064 = vmatpush1.msra.mxu1 %v3414_v5  ;;  %3433 = vst [vmem:[#allocation7_spill] sm:$0xff] %v2914_v2  ;;  %v2921_v5 = vld [vmem:[%s3282_s1 + $0x28] sm:$0xff] }
 0x420   :  { %994 = vmatprep.subr.mxu0 %v2907_v44  ;;  %1065 = vmatprep.subr.mxu1 %v3416_v7  ;;  %3434 = vst [vmem:[#allocation15_spill] sm:$0xff] %v2921_v5  ;;  %v2928_v7 = vld [vmem:[%s3282_s1 + $0x20] sm:$0xff] }
 0x421   :  { %995 = vmatpush1.msra.mxu0 %v2914_v2  ;;  %1066 = vmatpush1.msra.mxu1 %v3418_v10  ;;  %3435 = vst [vmem:[#allocation8_spill] sm:$0xff] %v2928_v7  ;;  %v2942_v10 = vld [vmem:[%s3282_s1 + $0x1f8] sm:$0xff] }
 0x422   :  { %996 = vmatprep.subr.mxu0 %v2921_v5  ;;  %1067 = vmatprep.subr.mxu1 %v3420_v12  ;;  %3436 = vst [vmem:[#allocation17_spill] sm:$0xff] %v2942_v10  ;;  %v1615_v12 = vld [vmem:[%s3283_s0 + $0x80] sm:$0xff] }
 0x423   :  { %997 = vmatpush1.msra.mxu0 %v2928_v7  ;;  %1068 = vmatpush1.msra.mxu1 %v3422_v14 }
 0x424   :  { %998 = vmatprep.subr.mxu0 %v3423_v15  ;;  %1069 = vmatprep.subr.mxu1 %v3424_v16  ;;  %v1616_v15 = vld [vmem:[%s3283_s0 + $0x88] sm:$0xff] }
 0x425   :  { %999 = vmatpush1.msra.mxu0 %v3425_v17  ;;  %1032 = vmatprep.mubr.f32.mxu0 %v3426_v18 }
 0x426   :  { %1070 = vmatpush1.msra.mxu1 %v3427_v19  ;;  %1103 = vmatprep.mubr.f32.mxu1 %v3426_v18 }
 0x427   :  { %1143 = vmatprep.subr.mxu0 %v2619_v20  ;;  %1214 = vmatprep.subr.mxu1 %v2942_v10 }
 0x4c6   :  { %v859_v14 = vpop.f32.mrf.mxu0  ;;  %v930_v55 = vpop.f32.mrf.mxu1 }
 0x4c7   :  { %v935_v16 = vadd.f32 %v1615_v12, %v859_v14  ;;  %v937_v12 = vadd.f32 %v1617_v62, %v930_v55  ;;  %v3022_v62 = vld [vmem:[%s3282_s1 + $0x98] sm:$0xff] }
 0x4c8   :  { %v861_v17 = vpop.f32.mrf.mxu0  ;;  %v932_v9 = vpop.f32.mrf.mxu1 }
 0x4c9   :  { %v1619_v19 = vmul.f32 -1.442695, %v935_v16  ;;  %v936_v46 = vadd.f32 %v1616_v15, %v861_v17  ;;  %v938_v57 = vadd.f32 %v1618_v58, %v932_v9 }
 0x4cb   :  { %1762 = vpow2.f32 %v1619_v19  ;;  %v1620_v61 = vmul.f32 -1.442695, %v936_v46  ;;  %v1621_v10 = vmul.f32 -1.442695, %v938_v57  ;;  %v3015_v57 = vld [vmem:[%s3282_s1 + $0xb0] sm:$0xff] }
 0x4cd   :  { %1764 = vpow2.f32 %v1620_v61 }
 0x4ce   :  { %1766 = vpow2.f32 %v1621_v10 }
 0x4d8   :  { %v1763_v20 = vpop.eup %1762 }
 0x4d9   :  { %v942_v14 = vadd.f32 1.0, %v1763_v20 }
 0x4da   :  { %v1765_v16 = vpop.eup %1764 }
 0x4db   :  { %1768 = vrcp.f32 %v942_v14  ;;  %v948_v15 = vadd.f32 1.0, %v1765_v16  ;;  %v1767_v17 = vpop.eup %1766  ;;  %v3036_v14 = vld [vmem:[%s3282_s1 + $0x78] sm:$0xff]  ;;  %v3043_v16 = vld [vmem:[%s3282_s1 + $0x70] sm:$0xff] }
 0x4dc   :  { %1770 = vtanh.f32 %v937_v12  ;;  %v955_v18 = vadd.f32 1.0, %v1767_v17  ;;  %v3029_v12 = vld [vmem:[%s3282_s1 + $0x90] sm:$0xff]  ;;  %3437 = vst [vmem:[#allocation9_spill] sm:$0xff] %v3036_v14  ;;  %3438 = vst [vmem:[#allocation18_spill] sm:$0xff] %v3043_v16 }
 0x4dd   :  { %1772 = vrcp.f32 %v948_v15  ;;  %v3050_v15 = vld [vmem:[%s3282_s1 + $0x58] sm:$0xff]  ;;  %v3057_v17 = vld [vmem:[%s3282_s1 + $0x50] sm:$0xff] }
 0x4de   :  { %1774 = vrcp.f32 %v955_v18  ;;  %v3001_v18 = vld [vmem:[%s3282_s1 + $0xd0] sm:$0xff]  ;;  %3439 = vst [vmem:[#allocation10_spill] sm:$0xff] %v3050_v15  ;;  %3440 = vst [vmem:[#allocation19_spill] sm:$0xff] %v3057_v17 }
 0x4e8   :  { %v1769_v19 = vpop.eup %1768 }
 0x4e9   :  { %v1771_v46 = vpop.eup %1770 }
 0x4ea   :  { %v1773_v61 = vpop.eup %1772  ;;  %v959_v58 = vmul.f32 %v1771_v46, %v1769_v19  ;;  %v3064_v19 = vld [vmem:[%s3282_s1 + $0x38] sm:$0xff]  ;;  %v3442_v46 = vld [vmem:[#allocation8_spill] sm:$0xff] }
 0x4eb   :  { %v958_v9 = vmul.f32 %v1773_v61, %v2636_v63  ;;  %v1775_v20 = vpop.eup %1774  ;;  %v3008_v63 = vld [vmem:[%s3282_s1 + $0xb8] sm:$0xff]  ;;  %3441 = vst [vmem:[#allocation12_spill] sm:$0xff] %v3064_v19  ;;  %v3071_v61 = vld [vmem:[%s3282_s1 + $0x30] sm:$0xff] }
 0x4ec   :  { %3443 = vst [vmem:[#allocation20_spill] sm:$0xff] %v3071_v61 }
 0x4ed   :  { %v2958_v7 = vadd.f32 %v959_v58, %v958_v9  ;;  %v3077_v58 = vld [vmem:[%s3282_s1 + $0x8] sm:$0xff]  ;;  %v3083_v9 = vld [vmem:[%s3282_s1 + $0x18] sm:$0xff] }
 0x4ee   :  { %3444 = vst [vmem:[#allocation14_spill] sm:$0xff] %v3077_v58  ;;  %3445 = vst [vmem:[#allocation21_spill] sm:$0xff] %v3083_v9 }
 0x4ef   :  { %1776 = vtanh.f32 %v2958_v7 }
 0x4fc   :  { %v1777_v55 = vpop.eup %1776 }
 0x4fd   :  { %v962_v10 = vmul.f32 %v1777_v55, %v1775_v20  ;;  %v3089_v20 = vld [vmem:[%s3282_s1] sm:$0xff]  ;;  %v3447_v55 = vmov 0.0  }
 0x4fe   :  { %3446 = vst [vmem:[#allocation16_spill] sm:$0xff] %v3089_v20 }
 0x4ff   :  { %1033 = vmatmul.mubr.f32.vlgmr.msra.gmra.mxu0 %v962_v10  ;;  %1104 = vmatmul.mubr.f32.vlgmr.msra.gmra.mxu1 %v962_v10  ;;  %v3096_v10 = vld [vmem:[%s3282_s1 + $0x10] sm:$0xff] }
 0x500   :  { %1144 = vmatpush1.msra.mxu0 %v2642_v0  ;;  %1215 = vmatpush1.msra.mxu1 %v2648_v53  ;;  %3448 = vst [vmem:[#allocation22_spill] sm:$0xff] %v3096_v10 }
 0x501   :  { %1145 = vmatprep.subr.mxu0 %v2654_v56  ;;  %1216 = vmatprep.subr.mxu1 %v2660_v3 }
 0x502   :  { %1146 = vmatpush1.msra.mxu0 %v2666_v59  ;;  %1217 = vmatpush1.msra.mxu1 %v2672_v54 }
 0x503   :  { %1147 = vmatprep.subr.mxu0 %v2678_v52  ;;  %1218 = vmatprep.subr.mxu1 %v2684_v60 }
 0x504   :  { %1148 = vmatpush1.msra.mxu0 %v2690_v48  ;;  %1219 = vmatpush1.msra.mxu1 %v2696_v50 }
 0x505   :  { %1149 = vmatprep.subr.mxu0 %v2702_v1  ;;  %1220 = vmatprep.subr.mxu1 %v2708_v4 }
 0x506   :  { %1150 = vmatpush1.msra.mxu0 %v2714_v6  ;;  %1221 = vmatpush1.msra.mxu1 %v2720_v8 }
 0x507   :  { %1151 = vmatprep.subr.mxu0 %v2726_v11  ;;  %1222 = vmatprep.subr.mxu1 %v2732_v13 }
 0x508   :  { %1152 = vmatpush1.msra.mxu0 %v2738_v21  ;;  %1223 = vmatpush1.msra.mxu1 %v2744_v22 }
 0x509   :  { %1153 = vmatprep.subr.mxu0 %v2750_v23  ;;  %1224 = vmatprep.subr.mxu1 %v2756_v24 }
 0x50a   :  { %1154 = vmatpush1.msra.mxu0 %v2762_v25  ;;  %1225 = vmatpush1.msra.mxu1 %v2768_v26 }
 0x50b   :  { %1155 = vmatprep.subr.mxu0 %v2774_v27  ;;  %1226 = vmatprep.subr.mxu1 %v2780_v28 }
 0x50c   :  { %1156 = vmatpush1.msra.mxu0 %v2786_v29  ;;  %1227 = vmatpush1.msra.mxu1 %v2792_v30 }
 0x50d   :  { %1157 = vmatprep.subr.mxu0 %v2798_v31  ;;  %1228 = vmatprep.subr.mxu1 %v2804_v32 }
 0x50e   :  { %1158 = vmatpush1.msra.mxu0 %v2810_v33  ;;  %1229 = vmatpush1.msra.mxu1 %v2816_v34 }
 0x50f   :  { %1159 = vmatprep.subr.mxu0 %v2822_v35  ;;  %1230 = vmatprep.subr.mxu1 %v2828_v36 }
 0x510   :  { %1160 = vmatpush1.msra.mxu0 %v2834_v37  ;;  %1231 = vmatpush1.msra.mxu1 %v2840_v38 }
 0x511   :  { %1161 = vmatprep.subr.mxu0 %v2846_v39  ;;  %1232 = vmatprep.subr.mxu1 %v2852_v40 }
 0x512   :  { %1162 = vmatpush1.msra.mxu0 %v2858_v41  ;;  %1233 = vmatpush1.msra.mxu1 %v3001_v18 }
 0x513   :  { %1163 = vmatprep.subr.mxu0 %v2865_v42  ;;  %1234 = vmatprep.subr.mxu1 %v3008_v63 }
 0x514   :  { %1164 = vmatpush1.msra.mxu0 %v2872_v43  ;;  %1235 = vmatpush1.msra.mxu1 %v3015_v57 }
 0x515   :  { %1165 = vmatprep.subr.mxu0 %v2879_v45  ;;  %1236 = vmatprep.subr.mxu1 %v3022_v62 }
 0x516   :  { %1166 = vmatpush1.msra.mxu0 %v2886_v47  ;;  %1237 = vmatpush1.msra.mxu1 %v3029_v12 }
 0x517   :  { %1167 = vmatprep.subr.mxu0 %v2893_v49  ;;  %1238 = vmatprep.subr.mxu1 %v3036_v14 }
 0x518   :  { %1168 = vmatpush1.msra.mxu0 %v2900_v51  ;;  %1239 = vmatpush1.msra.mxu1 %v3043_v16 }
 0x519   :  { %1169 = vmatprep.subr.mxu0 %v2907_v44  ;;  %1240 = vmatprep.subr.mxu1 %v3050_v15  ;;  %v1624_v44 = vld [vmem:[%s3283_s0 + $0xb0] sm:$0xff] }
 0x51a   :  { %1170 = vmatpush1.msra.mxu0 %v2914_v2  ;;  %1241 = vmatpush1.msra.mxu1 %v3057_v17 }
 0x51b   :  { %1171 = vmatprep.subr.mxu0 %v2921_v5  ;;  %1242 = vmatprep.subr.mxu1 %v3064_v19 }
 0x51c   :  { %1172 = vmatpush1.msra.mxu0 %v3442_v46  ;;  %1243 = vmatpush1.msra.mxu1 %v3071_v61  ;;  %v1622_v61 = vld [vmem:[%s3283_s0 + $0xa0] sm:$0xff]  ;;  %v1623_v46 = vld [vmem:[%s3283_s0 + $0xa8] sm:$0xff] }
 0x51d   :  { %1173 = vmatprep.subr.mxu0 %v3077_v58  ;;  %1244 = vmatprep.subr.mxu1 %v3083_v9  ;;  %v3449_v58 = vld [vmem:[#allocation11_spill] sm:$0xff]  ;;  %v3450_v9 = vld [vmem:[#allocation17_spill] sm:$0xff] }
 0x51e   :  { %1174 = vmatpush1.msra.mxu0 %v3089_v20  ;;  %1207 = vmatprep.mubr.f32.mxu0 %v3447_v55 }
 0x51f   :  { %1245 = vmatpush1.msra.mxu1 %v3096_v10  ;;  %1278 = vmatprep.mubr.f32.mxu1 %v3447_v55 }
 0x520   :  { %1318 = vmatprep.subr.mxu0 %v3449_v58  ;;  %1389 = vmatprep.subr.mxu1 %v3450_v9  ;;  %v1625_v58 = vld [vmem:[%s3283_s0 + $0xb8] sm:$0xff] }
 0x5bf   :  { %v1034_v20 = vpop.f32.mrf.mxu0  ;;  %v1105_v10 = vpop.f32.mrf.mxu1 }
 0x5c0   :  { %v1110_v19 = vadd.f32 %v1622_v61, %v1034_v20  ;;  %v1112_v61 = vadd.f32 %v1624_v44, %v1105_v10  ;;  %v1505_v10 = vld [vmem:[%s3284_s2 + $0x60] sm:$0xff] }
 0x5c1   :  { %v1036_v5 = vpop.f32.mrf.mxu0  ;;  %v1107_v9 = vpop.f32.mrf.mxu1 }
 0x5c2   :  { %v1626_v17 = vmul.f32 -1.442695, %v1110_v19  ;;  %v1111_v2 = vadd.f32 %v1623_v46, %v1036_v5  ;;  %v1113_v15 = vadd.f32 %v1625_v58, %v1107_v9 }
 0x5c4   :  { %1778 = vpow2.f32 %v1626_v17  ;;  %v1627_v55 = vmul.f32 -1.442695, %v1111_v2  ;;  %v1628_v16 = vmul.f32 -1.442695, %v1113_v15  ;;  %v1506_v15 = vld [vmem:[%s3284_s2 + $0x68] sm:$0xff] }
 0x5c6   :  { %1780 = vpow2.f32 %v1627_v55 }
 0x5c7   :  { %1782 = vpow2.f32 %v1628_v16 }
 0x5d1   :  { %v1779_v51 = vpop.eup %1778 }
 0x5d2   :  { %v1117_v20 = vadd.f32 1.0, %v1779_v51 }
 0x5d3   :  { %v1781_v19 = vpop.eup %1780 }
 0x5d4   :  { %1784 = vrcp.f32 %v1117_v20  ;;  %v1123_v5 = vadd.f32 1.0, %v1781_v19  ;;  %v1783_v2 = vpop.eup %1782  ;;  %v1503_v20 = vld [vmem:[%s3284_s2 + $0x50] sm:$0xff]  ;;  %v1502_v19 = vld [vmem:[%s3284_s2 + $0x48] sm:$0xff] }
 0x5d5   :  { %1786 = vtanh.f32 %v1112_v61  ;;  %v1130_v14 = vadd.f32 1.0, %v1783_v2  ;;  %v1504_v61 = vld [vmem:[%s3284_s2 + $0x58] sm:$0xff] }
 0x5d6   :  { %1788 = vrcp.f32 %v1123_v5  ;;  %v1501_v5 = vld [vmem:[%s3284_s2 + $0x40] sm:$0xff]  ;;  %v1500_v2 = vld [vmem:[%s3284_s2 + $0x38] sm:$0xff] }
 0x5d7   :  { %1790 = vrcp.f32 %v1130_v14  ;;  %v1508_v14 = vld [vmem:[%s3284_s2 + $0x78] sm:$0xff] }
 0x5e1   :  { %v1785_v17 = vpop.eup %1784 }
 0x5e2   :  { %v1787_v46 = vpop.eup %1786 }
 0x5e3   :  { %v1789_v55 = vpop.eup %1788  ;;  %v1134_v58 = vmul.f32 %v1787_v46, %v1785_v17  ;;  %v1499_v17 = vld [vmem:[%s3284_s2 + $0x30] sm:$0xff]  ;;  %v1498_v46 = vld [vmem:[%s3284_s2 + $0x28] sm:$0xff] }
 0x5e4   :  { %v1133_v9 = vmul.f32 %v1789_v55, %v2958_v7  ;;  %v1791_v51 = vpop.eup %1790  ;;  %v1497_v55 = vld [vmem:[%s3284_s2 + $0x20] sm:$0xff] }
 0x5e6   :  { %v3115_v49 = vadd.f32 %v1134_v58, %v1133_v9  ;;  %v1496_v58 = vld [vmem:[%s3284_s2 + $0x18] sm:$0xff]  ;;  %v1495_v9 = vld [vmem:[%s3284_s2 + $0x10] sm:$0xff] }
 0x5e8   :  { %1792 = vtanh.f32 %v3115_v49 }
 0x5f5   :  { %v1793_v44 = vpop.eup %1792 }
 0x5f6   :  { %v1137_v16 = vmul.f32 %v1793_v44, %v1791_v51  ;;  %v1494_v51 = vld [vmem:[%s3284_s2 + $0x8] sm:$0xff]  ;;  %v1493_v44 = vld [vmem:[%s3284_s2] sm:$0xff] }
 0x5f8   :  { %1208 = vmatmul.mubr.f32.vlgmr.msra.gmra.mxu0 %v1137_v16  ;;  %1279 = vmatmul.mubr.f32.vlgmr.msra.gmra.mxu1 %v1137_v16  ;;  %v1636_v16 = vld [vmem:[%s3283_s0 + $0xe0] sm:$0xff] }
 0x5f9   :  { %1319 = vmatpush1.msra.mxu0 %v2642_v0  ;;  %1390 = vmatpush1.msra.mxu1 %v2648_v53  ;;  %v3451_v0 = vld [vmem:[#allocation4_spill] sm:$0xff]  ;;  %v3452_v53 = vld [vmem:[#allocation9_spill] sm:$0xff] }
 0x5fa   :  { %1320 = vmatprep.subr.mxu0 %v2654_v56  ;;  %1391 = vmatprep.subr.mxu1 %v2660_v3  ;;  %v3453_v56 = vld [vmem:[#allocation6_spill] sm:$0xff] }
 0x5fb   :  { %1321 = vmatpush1.msra.mxu0 %v2666_v59  ;;  %1392 = vmatpush1.msra.mxu1 %v2672_v54  ;;  %v3454_v3 = vld [vmem:[#allocation18_spill] sm:$0xff]  ;;  %v3455_v59 = vld [vmem:[#allocation13_spill] sm:$0xff] }
 0x5fc   :  { %1322 = vmatprep.subr.mxu0 %v2678_v52  ;;  %1393 = vmatprep.subr.mxu1 %v2684_v60  ;;  %v3456_v54 = vld [vmem:[#allocation10_spill] sm:$0xff]  ;;  %v3457_v52 = vld [vmem:[#allocation7_spill] sm:$0xff] }
 0x5fd   :  { %1323 = vmatpush1.msra.mxu0 %v2690_v48  ;;  %1394 = vmatpush1.msra.mxu1 %v2696_v50  ;;  %v3458_v60 = vld [vmem:[#allocation19_spill] sm:$0xff]  ;;  %v3460_v50 = vld [vmem:[#allocation12_spill] sm:$0xff] }
 0x5fe   :  { %1324 = vmatprep.subr.mxu0 %v2702_v1  ;;  %1395 = vmatprep.subr.mxu1 %v2708_v4  ;;  %v3459_v48 = vld [vmem:[#allocation15_spill] sm:$0xff]  ;;  %v3461_v1 = vld [vmem:[#allocation8_spill] sm:$0xff] }
 0x5ff   :  { %1325 = vmatpush1.msra.mxu0 %v2714_v6  ;;  %1396 = vmatpush1.msra.mxu1 %v2720_v8  ;;  %v3462_v4 = vld [vmem:[#allocation20_spill] sm:$0xff]  ;;  %v3463_v6 = vld [vmem:[#allocation14_spill] sm:$0xff]  ;;  %v3464_v8 = vld [vmem:[#allocation21_spill] sm:$0xff] }
 0x600   :  { %1326 = vmatprep.subr.mxu0 %v2726_v11  ;;  %1397 = vmatprep.subr.mxu1 %v2732_v13  ;;  %v3465_v11 = vld [vmem:[#allocation16_spill] sm:$0xff]  ;;  %v3466_v13 = vmov 0.0  }
 0x601   :  { %1327 = vmatpush1.msra.mxu0 %v2738_v21  ;;  %1398 = vmatpush1.msra.mxu1 %v2744_v22  ;;  %v3467_v21 = vld [vmem:[#allocation22_spill] sm:$0xff]  ;;  %v1629_v22 = vld [vmem:[%s3283_s0 + $0xc0] sm:$0xff] }
 0x602   :  { %1328 = vmatprep.subr.mxu0 %v2750_v23  ;;  %1399 = vmatprep.subr.mxu1 %v2756_v24  ;;  %v1630_v24 = vld [vmem:[%s3283_s0 + $0xc8] sm:$0xff] }
 0x603   :  { %1329 = vmatpush1.msra.mxu0 %v2762_v25  ;;  %1400 = vmatpush1.msra.mxu1 %v2768_v26 }
 0x604   :  { %1330 = vmatprep.subr.mxu0 %v2774_v27  ;;  %1401 = vmatprep.subr.mxu1 %v2780_v28 }
 0x605   :  { %1331 = vmatpush1.msra.mxu0 %v2786_v29  ;;  %1402 = vmatpush1.msra.mxu1 %v2792_v30 }
 0x606   :  { %1332 = vmatprep.subr.mxu0 %v2798_v31  ;;  %1403 = vmatprep.subr.mxu1 %v2804_v32  ;;  %v1632_v31 = vld [vmem:[%s3283_s0 + $0xd8] sm:$0xff] }
 0x607   :  { %1333 = vmatpush1.msra.mxu0 %v2810_v33  ;;  %1404 = vmatpush1.msra.mxu1 %v2816_v34  ;;  %v1631_v34 = vld [vmem:[%s3283_s0 + $0xd0] sm:$0xff] }
 0x608   :  { %1334 = vmatprep.subr.mxu0 %v2822_v35  ;;  %1405 = vmatprep.subr.mxu1 %v2828_v36 }
 0x609   :  { %1335 = vmatpush1.msra.mxu0 %v2834_v37  ;;  %1406 = vmatpush1.msra.mxu1 %v2840_v38 }
 0x60a   :  { %1336 = vmatprep.subr.mxu0 %v2846_v39  ;;  %1407 = vmatprep.subr.mxu1 %v2852_v40 }
 0x60b   :  { %1337 = vmatpush1.msra.mxu0 %v2858_v41  ;;  %1408 = vmatpush1.msra.mxu1 %v3001_v18 }
 0x60c   :  { %1338 = vmatprep.subr.mxu0 %v2865_v42  ;;  %1409 = vmatprep.subr.mxu1 %v3008_v63 }
 0x60d   :  { %1339 = vmatpush1.msra.mxu0 %v2872_v43  ;;  %1410 = vmatpush1.msra.mxu1 %v3015_v57 }
 0x60e   :  { %1340 = vmatprep.subr.mxu0 %v2879_v45  ;;  %1411 = vmatprep.subr.mxu1 %v3022_v62 }
 0x60f   :  { %1341 = vmatpush1.msra.mxu0 %v2886_v47  ;;  %1412 = vmatpush1.msra.mxu1 %v3029_v12 }
 0x610   :  { %1342 = vmatprep.subr.mxu0 %v3451_v0  ;;  %1413 = vmatprep.subr.mxu1 %v3452_v53  ;;  %v1637_v53 = vld [vmem:[%s3283_s0 + $0xe8] sm:$0xff] }
 0x611   :  { %1343 = vmatpush1.msra.mxu0 %v3453_v56  ;;  %1414 = vmatpush1.msra.mxu1 %v3454_v3 }
 0x612   :  { %1344 = vmatprep.subr.mxu0 %v3455_v59  ;;  %1415 = vmatprep.subr.mxu1 %v3456_v54 }
 0x613   :  { %1345 = vmatpush1.msra.mxu0 %v3457_v52  ;;  %1416 = vmatpush1.msra.mxu1 %v3458_v60 }
 0x614   :  { %1346 = vmatprep.subr.mxu0 %v3459_v48  ;;  %1417 = vmatprep.subr.mxu1 %v3460_v50  ;;  %v1639_v48 = vld [vmem:[%s3283_s0 + $0xf8] sm:$0xff] }
 0x615   :  { %1347 = vmatpush1.msra.mxu0 %v3461_v1  ;;  %1418 = vmatpush1.msra.mxu1 %v3462_v4  ;;  %v1638_v4 = vld [vmem:[%s3283_s0 + $0xf0] sm:$0xff] }
 0x616   :  { %1348 = vmatprep.subr.mxu0 %v3463_v6  ;;  %1419 = vmatprep.subr.mxu1 %v3464_v8 }
 0x617   :  { %1349 = vmatpush1.msra.mxu0 %v3465_v11  ;;  %1382 = vmatprep.mubr.f32.mxu0 %v3466_v13 }
 0x618   :  { %1420 = vmatpush1.msra.mxu1 %v3467_v21  ;;  %1453 = vmatprep.mubr.f32.mxu1 %v3466_v13 }
 0x619   :  { %1661 = vmatprep.subr.mxu0 %v3466_v13 }
 0x6b8   :  { %v1209_v23 = vpop.f32.mrf.mxu0  ;;  %v1280_v29 = vpop.f32.mrf.mxu1 }
 0x6b9   :  { %v1285_v25 = vadd.f32 %v1629_v22, %v1209_v23  ;;  %v1287_v37 = vadd.f32 %v1631_v34, %v1280_v29  ;;  %v1643_v34 = vld [vmem:[%s3285_s3] ss:$0 sm:$0xff] }
 0x6ba   :  { %v1211_v26 = vpop.f32.mrf.mxu0  ;;  %v1282_v32 = vpop.f32.mrf.mxu1 }
 0x6bb   :  { %v1633_v27 = vmul.f32 -1.442695, %v1285_v25  ;;  %v1286_v28 = vadd.f32 %v1630_v24, %v1211_v26  ;;  %v1288_v33 = vadd.f32 %v1632_v31, %v1282_v32 }
 0x6bd   :  { %1794 = vpow2.f32 %v1633_v27  ;;  %v1634_v30 = vmul.f32 -1.442695, %v1286_v28  ;;  %v1635_v35 = vmul.f32 -1.442695, %v1288_v33 }
 0x6bf   :  { %1796 = vpow2.f32 %v1634_v30 }
 0x6c0   :  { %1798 = vpow2.f32 %v1635_v35 }
 0x6ca   :  { %v1795_v36 = vpop.eup %1794 }
 0x6cb   :  { %v1292_v38 = vadd.f32 1.0, %v1795_v36 }
 0x6cc   :  { %v1797_v39 = vpop.eup %1796 }
 0x6cd   :  { %1800 = vrcp.f32 %v1292_v38  ;;  %v1298_v40 = vadd.f32 1.0, %v1797_v39  ;;  %v1799_v41 = vpop.eup %1798 }
 0x6ce   :  { %1802 = vtanh.f32 %v1287_v37  ;;  %v1305_v47 = vadd.f32 1.0, %v1799_v41 }
 0x6cf   :  { %1804 = vrcp.f32 %v1298_v40 }
 0x6d0   :  { %1806 = vrcp.f32 %v1305_v47 }
 0x6da   :  { %v1801_v42 = vpop.eup %1800 }
 0x6db   :  { %v1803_v43 = vpop.eup %1802 }
 0x6dc   :  { %v1805_v45 = vpop.eup %1804  ;;  %v1309_v7 = vmul.f32 %v1803_v43, %v1801_v42 }
 0x6dd   :  { %v1308_v18 = vmul.f32 %v1805_v45, %v3115_v49  ;;  %v1807_v57 = vpop.eup %1806  ;;  %v1507_v49 = vld [vmem:[%s3284_s2 + $0x70] sm:$0xff] }
 0x6df   :  { %v3196_v63 = vadd.f32 %v1309_v7, %v1308_v18 }
 0x6e1   :  { %1808 = vtanh.f32 %v3196_v63 }
 0x6ee   :  { %v1809_v62 = vpop.eup %1808 }
 0x6ef   :  { %v1312_v12 = vmul.f32 %v1809_v62, %v1807_v57 }
 0x6f1   :  { %1383 = vmatmul.mubr.f32.vlgmr.msra.gmra.mxu0 %v1312_v12  ;;  %1454 = vmatmul.mubr.f32.vlgmr.msra.gmra.mxu1 %v1312_v12 }
 0x6f2   :  { %1662 = vmatpush3.msra.mxu0 %v1508_v14  ;;  %1693 = vmatprep.mubr.msk.f32.mxu0 %vm1891_vm0, %v3466_v13 }
 0x6f3   :  { %1663 = vmatprep.subr.mxu0 %v3466_v13 }
 0x6f4   :  { %1664 = vmatpush3.msra.mxu0 %v1507_v49 }
 0x6f5   :  { %1665 = vmatprep.subr.mxu0 %v3466_v13 }
 0x6f6   :  { %1666 = vmatpush3.msra.mxu0 %v1506_v15 }
 0x6f7   :  { %1667 = vmatprep.subr.mxu0 %v3466_v13 }
 0x6f8   :  { %1668 = vmatpush3.msra.mxu0 %v1505_v10 }
 0x6f9   :  { %1669 = vmatprep.subr.mxu0 %v3466_v13 }
 0x6fa   :  { %1670 = vmatpush3.msra.mxu0 %v1504_v61 }
 0x6fb   :  { %1671 = vmatprep.subr.mxu0 %v3466_v13 }
 0x6fc   :  { %1672 = vmatpush3.msra.mxu0 %v1503_v20 }
 0x6fd   :  { %1673 = vmatprep.subr.mxu0 %v3466_v13 }
 0x6fe   :  { %1674 = vmatpush3.msra.mxu0 %v1502_v19 }
 0x6ff   :  { %1675 = vmatprep.subr.mxu0 %v3466_v13 }
 0x700   :  { %1676 = vmatpush3.msra.mxu0 %v1501_v5 }
 0x701   :  { %1677 = vmatprep.subr.mxu0 %v3466_v13 }
 0x702   :  { %1678 = vmatpush3.msra.mxu0 %v1500_v2 }
 0x703   :  { %1679 = vmatprep.subr.mxu0 %v3466_v13 }
 0x704   :  { %1680 = vmatpush3.msra.mxu0 %v1499_v17 }
 0x705   :  { %1681 = vmatprep.subr.mxu0 %v3466_v13 }
 0x706   :  { %1682 = vmatpush3.msra.mxu0 %v1498_v46 }
 0x707   :  { %1683 = vmatprep.subr.mxu0 %v3466_v13 }
 0x708   :  { %1684 = vmatpush3.msra.mxu0 %v1497_v55 }
 0x709   :  { %1685 = vmatprep.subr.mxu0 %v3466_v13 }
 0x70a   :  { %1686 = vmatpush3.msra.mxu0 %v1496_v58 }
 0x70b   :  { %1687 = vmatprep.subr.mxu0 %v3466_v13 }
 0x70c   :  { %1688 = vmatpush3.msra.mxu0 %v1495_v9 }
 0x70d   :  { %1689 = vmatprep.subr.mxu0 %v3466_v13 }
 0x70e   :  { %1690 = vmatpush3.msra.mxu0 %v1494_v51 }
 0x70f   :  { %1691 = vmatprep.subr.mxu0 %v3466_v13 }
 0x710   :  { %1692 = vmatpush3.msra.mxu0 %v1493_v44 }
 0x7b1   :  { %v1384_v0 = vpop.f32.mrf.mxu0  ;;  %v1455_v52 = vpop.f32.mrf.mxu1 }
 0x7b2   :  { %v1460_v56 = vadd.f32 %v1636_v16, %v1384_v0  ;;  %v1462_v11 = vadd.f32 %v1638_v4, %v1455_v52 }
 0x7b3   :  { %v1386_v3 = vpop.f32.mrf.mxu0  ;;  %v1457_v50 = vpop.f32.mrf.mxu1 }
 0x7b4   :  { %v1640_v59 = vmul.f32 -1.442695, %v1460_v56  ;;  %v1461_v54 = vadd.f32 %v1637_v53, %v1386_v3  ;;  %v1463_v1 = vadd.f32 %v1639_v48, %v1457_v50 }
 0x7b6   :  { %1810 = vpow2.f32 %v1640_v59  ;;  %v1641_v60 = vmul.f32 -1.442695, %v1461_v54  ;;  %v1642_v6 = vmul.f32 -1.442695, %v1463_v1 }
 0x7b8   :  { %1812 = vpow2.f32 %v1641_v60 }
 0x7b9   :  { %1814 = vpow2.f32 %v1642_v6 }
 0x7c3   :  { %v1811_v8 = vpop.eup %1810 }
 0x7c4   :  { %v1467_v13 = vadd.f32 1.0, %v1811_v8 }
 0x7c5   :  { %v1813_v21 = vpop.eup %1812 }
 0x7c6   :  { %1816 = vrcp.f32 %v1467_v13  ;;  %v1473_v22 = vadd.f32 1.0, %v1813_v21  ;;  %v1815_v23 = vpop.eup %1814 }
 0x7c7   :  { %1818 = vtanh.f32 %v1462_v11  ;;  %v1480_v27 = vadd.f32 1.0, %v1815_v23 }
 0x7c8   :  { %1820 = vrcp.f32 %v1473_v22 }
 0x7c9   :  { %1822 = vrcp.f32 %v1480_v27 }
 0x7d3   :  { %v1817_v24 = vpop.eup %1816 }
 0x7d4   :  { %v1819_v25 = vpop.eup %1818 }
 0x7d5   :  { %v1821_v26 = vpop.eup %1820  ;;  %v1484_v28 = vmul.f32 %v1819_v25, %v1817_v24 }
 0x7d6   :  { %v1483_v29 = vmul.f32 %v1821_v26, %v3196_v63  ;;  %v1823_v31 = vpop.eup %1822 }
 0x7d8   :  { %v1485_v30 = vadd.f32 %v1484_v28, %v1483_v29 }
 0x7da   :  { %1824 = vtanh.f32 %v1485_v30 }
 0x7e7   :  { %v1825_v32 = vpop.eup %1824 }
 0x7e8   :  { %v1487_v33 = vmul.f32 %v1825_v32, %v1823_v31 }
 0x7ea   :  { %1694 = vmatmul.mubr.f32.vlgmr.msra.gmra.mxu0 %v1487_v33 }
 0x8aa   :  { %v1582_v35 = vpop.f32.mrf.mxu0 }
 0x8ab   :  { %v1583_v36 = vadd.f32 %v1643_v34, %v1582_v35 }
 0x8ac   :  { %v1695_v37 = vpop.f32.mrf.mxu0 }
 0x8ad   :  { %1586 = vst [vmem:[%s3286_s4] sm:$0xff] %v1583_v36 }

</bundles_post_ra>
